<compile_context>
chip_gen: v5e
topology: v5e:2x2
jax: 0.10.0
libtpu: 0.0.40
codegen_flags: <defaults>
</compile_context>

<pallas_src>
import functools

import jax
import jax.numpy as jnp
from jax.experimental import pallas as pl
from jax.experimental.pallas import tpu as pltpu


def _vae_kernel(x_ref, eta_ref,
                w1_ref, b1_ref,
                wml_ref, bml_ref,
                wd1_ref, bd1_ref,
                wd2_ref, bd2_ref,
                out_ref, ml_ref):
    """Fused VAE forward for one batch tile (all dims 128-aligned, bf16 MXU inputs).

    Encoder:  h      = relu(x @ W1 + b1)
              mu|lv  = h @ [Wmu|Wlv] + [bmu|blv]     (fused projection)
    Reparam:  z      = mu + exp(0.5 * lv) * eta
    Decoder:  h2     = relu(z @ Wd1 + bd1)
              out    = sigmoid(h2 @ Wd2 + bd2)
    """
    lat_pad = eta_ref.shape[-1]

    x = x_ref[...]                                               # bf16 (bt, in_pad)

    # Encoder FFN (bf16 MXU, f32 accumulate)
    h = jnp.dot(x, w1_ref[...], preferred_element_type=jnp.float32) + b1_ref[...]
    h = jnp.maximum(h, 0.0)                                      # ReLU (f32 VPU)

    # Fused mu|logvar projection: one (hid_pad, 2*lat_pad) matmul; split only for
    # the reparameterization (128-lane boundary -> no relayout), stored fused.
    ml = jnp.dot(h.astype(jnp.bfloat16), wml_ref[...],
                 preferred_element_type=jnp.float32) + bml_ref[...]
    mu = ml[:, :lat_pad]
    lv = ml[:, lat_pad:]

    # Reparameterization (eta ~ N(0,1) supplied from the host, matching randn_like).
    # Padded lanes: mu=0, lv=0 -> exp(0)=1, eta=0 -> z stays exactly 0.
    z = mu + jnp.exp(lv * 0.5) * eta_ref[...]

    # Decoder
    h2 = jnp.dot(z.astype(jnp.bfloat16), wd1_ref[...],
                 preferred_element_type=jnp.float32) + bd1_ref[...]
    h2 = jnp.maximum(h2, 0.0)                                    # ReLU
    logits = jnp.dot(h2.astype(jnp.bfloat16), wd2_ref[...],
                     preferred_element_type=jnp.float32) + bd2_ref[...]

    # sigmoid(x) = 1 / (1 + exp(-x)); exp on EUP, approx reciprocal on EUP slot.
    e = jnp.exp(-logits)
    out_ref[...] = pl.reciprocal(1.0 + e, approx=True).astype(out_ref.dtype)

    # Single wide (bt, 2*lat_pad) store for mu|logvar.
    ml_ref[...] = ml


def _round_up(n, m):
    return (n + m - 1) // m * m


def _cdiv(a, b):
    return -(-a // b)


def _prepare_params(params, in_pad, hid_pad, lat_pad):
    """Zero-pad all weights/biases to 128-aligned dims, fuse mu|logvar, cast
    matmul operands to bf16 (biases stay f32 for the f32 accumulator add)."""
    def pad2(a, r, c):
        return jnp.pad(a, ((0, r - a.shape[0]), (0, c - a.shape[1])))

    w1 = pad2(params["w1"], in_pad, hid_pad).astype(jnp.bfloat16)
    b1 = pad2(params["b1"], 1, hid_pad).astype(jnp.float32)

    wmu = pad2(params["wmu"], hid_pad, lat_pad)
    wlv = pad2(params["wlv"], hid_pad, lat_pad)
    wml = jnp.concatenate([wmu, wlv], axis=1).astype(jnp.bfloat16)       # (hid, 2*lat)
    bml = jnp.concatenate([pad2(params["bmu"], 1, lat_pad),
                           pad2(params["blv"], 1, lat_pad)], axis=1).astype(jnp.float32)

    wd1 = pad2(params["wd1"], lat_pad, hid_pad).astype(jnp.bfloat16)
    bd1 = pad2(params["bd1"], 1, hid_pad).astype(jnp.float32)
    wd2 = pad2(params["wd2"], hid_pad, in_pad).astype(jnp.bfloat16)
    bd2 = pad2(params["bd2"], 1, in_pad).astype(jnp.float32)
    return w1, b1, wml, bml, wd1, bd1, wd2, bd2


@functools.partial(jax.jit, static_argnames=("batch_tile",))
def vae_forward(x_nchw, eta, params, batch_tile=256):
    """Runs the full VAE forward. Returns (decoder_output, mu, logvar),
    each sliced back to the un-padded shapes (B, 784) / (B, 20) / (B, 20)."""
    in_dim = params["w1"].shape[0]        # 784
    hidden = params["w1"].shape[1]        # 400
    latent = params["wmu"].shape[1]       # 20

    in_pad = _round_up(in_dim, 128)       # 896
    hid_pad = _round_up(hidden, 128)      # 512
    lat_pad = _round_up(latent, 128)      # 128

    x = x_nchw.reshape(-1, in_dim).astype(jnp.float32)   # x.view(-1, 784)
    B = x.shape[0]

    # Tiling policy:
    #   * grid size first (cdiv), then tile = round_up(cdiv(B, grid), 16) so
    #     padding is at most 15 rows per tile and bf16 rows pack sublanes cleanly;
    #   * force >= 2 grid steps when B >= 32 so v7x's two TensorCores both get a
    #     "parallel" batch tile (harmless on single-TC v5e/v6e).
    grid_n = max(1, _cdiv(B, batch_tile))
    if grid_n == 1 and B >= 32:
        grid_n = 2
    bt = _round_up(_cdiv(B, grid_n), 16)
    Bp = bt * grid_n

    x_p = jnp.pad(x, ((0, Bp - B), (0, in_pad - in_dim))).astype(jnp.bfloat16)
    eta_p = jnp.pad(eta.astype(jnp.float32),
                    ((0, Bp - B), (0, lat_pad - latent)))

    w1, b1, wml, bml, wd1, bd1, wd2, bd2 = _prepare_params(
        params, in_pad, hid_pad, lat_pad)

    grid = (grid_n,)

    def batch_spec(feat):
        return pl.BlockSpec((bt, feat), lambda i: (i, 0))

    def weight_spec(shape):
        # Constant index map -> re-DMA already skipped; single buffer avoids the
        # dead second copy of the weights in VMEM.
        return pl.BlockSpec(shape, lambda i: (0,) * len(shape),
                            pipeline_mode=pl.Buffered(1))

    out_shapes = (
        jax.ShapeDtypeStruct((Bp, in_pad), jnp.bfloat16),       # decoder output
        jax.ShapeDtypeStruct((Bp, 2 * lat_pad), jnp.float32),   # fused mu|logvar
    )

    in_specs = [
        batch_spec(in_pad),                    # x
        batch_spec(lat_pad),                   # eta
        weight_spec((in_pad, hid_pad)),        # w1
        weight_spec((1, hid_pad)),             # b1
        weight_spec((hid_pad, 2 * lat_pad)),   # fused wmu|wlv
        weight_spec((1, 2 * lat_pad)),         # fused bmu|blv
        weight_spec((lat_pad, hid_pad)),       # wd1
        weight_spec((1, hid_pad)),             # bd1
        weight_spec((hid_pad, in_pad)),        # wd2
        weight_spec((1, in_pad)),              # bd2
    ]
    out_specs = (
        batch_spec(in_pad),
        batch_spec(2 * lat_pad),
    )

    out_p, ml_p = pl.pallas_call(
        _vae_kernel,
        out_shape=out_shapes,
        grid_spec=pltpu.PrefetchScalarGridSpec(
            num_scalar_prefetch=0,
            grid=grid,
            in_specs=in_specs,
            out_specs=out_specs,
        ),
        compiler_params=pltpu.CompilerParams(
            dimension_semantics=("parallel",),
            vmem_limit_bytes=48 * 1024 * 1024,
        ),
    )(x_p, eta_p, w1, b1, wml, bml, wd1, bd1, wd2, bd2)

    # Strip padding back to module shapes; return f32 like the PyTorch module.
    out = out_p[:B, :in_dim].astype(jnp.float32)
    mu = ml_p[:B, :latent]
    logvar = ml_p[:B, lat_pad:lat_pad + latent]
    return out, mu, logvar


def init_params(key, in_dim=784, hidden=400, latent=20):
    """Deterministic Linear-layer init (uniform(-1/sqrt(fan_in), 1/sqrt(fan_in)),
    same distribution family as PyTorch's default nn.Linear init)."""
    ks = jax.random.split(key, 10)

    def lin(kw, kb, fan_in, fan_out):
        bound = 1.0 / jnp.sqrt(fan_in)
        w = jax.random.uniform(kw, (fan_in, fan_out), jnp.float32, -bound, bound)
        b = jax.random.uniform(kb, (1, fan_out), jnp.float32, -bound, bound)
        return w, b

    w1, b1 = lin(ks[0], ks[1], in_dim, hidden)     # encoder.FFN
    wmu, bmu = lin(ks[2], ks[3], hidden, latent)   # encoder.mu
    wlv, blv = lin(ks[4], ks[5], hidden, latent)   # encoder.logvar
    wd1, bd1 = lin(ks[6], ks[7], latent, hidden)   # decoder.FFN1
    wd2, bd2 = lin(ks[8], ks[9], hidden, in_dim)   # decoder.FFN2
    return dict(w1=w1, b1=b1, wmu=wmu, bmu=bmu, wlv=wlv, blv=blv,
                wd1=wd1, bd1=bd1, wd2=wd2, bd2=bd2)


def reference_forward(x_nchw, eta, params):
    """Pure-JAX f32 reference matching the PyTorch module semantics."""
    x = x_nchw.reshape(-1, params["w1"].shape[0]).astype(jnp.float32)
    h = jnp.maximum(x @ params["w1"] + params["b1"], 0.0)
    mu = h @ params["wmu"] + params["bmu"]
    lv = h @ params["wlv"] + params["blv"]
    z = mu + jnp.exp(lv * 0.5) * eta
    h2 = jnp.maximum(z @ params["wd1"] + params["bd1"], 0.0)
    out = jax.nn.sigmoid(h2 @ params["wd2"] + params["bd2"])
    return out, mu, lv


def _check(out, mu, logvar, x, eta, params):
    out_ref, mu_ref, lv_ref = reference_forward(x, eta, params)
    assert jnp.allclose(out, out_ref, atol=3e-2, rtol=3e-2)
    assert jnp.allclose(mu, mu_ref, atol=3e-2, rtol=3e-2)
    assert jnp.allclose(logvar, lv_ref, atol=3e-2, rtol=3e-2)


if __name__ == "__main__":
    key = jax.random.PRNGKey(0)
    k_param, k_x, k_eta, k_x2, k_eta2 = jax.random.split(key, 5)

    C, H, W = 1, 28, 28                  # MNIST-like input -> flattens to (B, 784)
    latent = 20
    params = init_params(k_param, in_dim=C * H * W, hidden=400, latent=latent)

    # Small batch: single 16-row tile, one grid step.
    B = 16
    x = jax.random.normal(k_x, (B, C, H, W), jnp.float32)
    eta = jax.random.normal(k_eta, (B, latent), jnp.float32)   # torch.randn_like(mu)
    out, mu, logvar = vae_forward(x, eta, params)
    jax.block_until_ready((out, mu, logvar))
    assert out.shape == (B, C * H * W)
    assert mu.shape == (B, latent) and logvar.shape == (B, latent)
    _check(out, mu, logvar, x, eta, params)

    # Slightly larger batch: exercises the >=2-grid-step path (v7x megacore) and
    # the new minimal-padding tiling policy (B=48 -> 2 tiles of 32 rows).
    B2 = 48
    x2 = jax.random.normal(k_x2, (B2, C, H, W), jnp.float32)
    eta2 = jax.random.normal(k_eta2, (B2, latent), jnp.float32)
    out2, mu2, logvar2 = vae_forward(x2, eta2, params)
    jax.block_until_ready((out2, mu2, logvar2))
    assert out2.shape == (B2, C * H * W)
    assert mu2.shape == (B2, latent) and logvar2.shape == (B2, latent)
    _check(out2, mu2, logvar2, x2, eta2, params)

    print("KERNEL_OK")
</pallas_src>

<mosaic_0001>
module attributes {stable_mosaic.version = 11 : i64} {
  func.func @_vae_kernel(%arg0: i32, %arg1: memref<16x896xbf16, #tpu.memory_space<vmem>>, %arg2: memref<16x128xf32, #tpu.memory_space<vmem>>, %arg3: memref<896x512xbf16, #tpu.memory_space<vmem>>, %arg4: memref<1x512xf32, #tpu.memory_space<vmem>>, %arg5: memref<512x256xbf16, #tpu.memory_space<vmem>>, %arg6: memref<1x256xf32, #tpu.memory_space<vmem>>, %arg7: memref<128x512xbf16, #tpu.memory_space<vmem>>, %arg8: memref<1x512xf32, #tpu.memory_space<vmem>>, %arg9: memref<512x896xbf16, #tpu.memory_space<vmem>>, %arg10: memref<1x896xf32, #tpu.memory_space<vmem>>, %arg11: memref<16x896xbf16, #tpu.memory_space<vmem>>, %arg12: memref<16x256xf32, #tpu.memory_space<vmem>>) attributes {dimension_semantics = [#tpu.dimension_semantics<parallel>], iteration_bounds = array<i64: 1>, scalar_prefetch = 0 : i64, scratch_operands = 0 : i64, tpu.core_type = #tpu.core_type<tc>, window_params = [{transform_indices = @transform_0, window_bounds = array<i64: 16, 896>}, {transform_indices = @transform_1, window_bounds = array<i64: 16, 128>}, {pipeline_mode = #tpu.pipeline_mode<synchronous>, transform_indices = @transform_2, window_bounds = array<i64: 896, 512>}, {pipeline_mode = #tpu.pipeline_mode<synchronous>, transform_indices = @transform_3, window_bounds = array<i64: 1, 512>}, {pipeline_mode = #tpu.pipeline_mode<synchronous>, transform_indices = @transform_4, window_bounds = array<i64: 512, 256>}, {pipeline_mode = #tpu.pipeline_mode<synchronous>, transform_indices = @transform_5, window_bounds = array<i64: 1, 256>}, {pipeline_mode = #tpu.pipeline_mode<synchronous>, transform_indices = @transform_6, window_bounds = array<i64: 128, 512>}, {pipeline_mode = #tpu.pipeline_mode<synchronous>, transform_indices = @transform_7, window_bounds = array<i64: 1, 512>}, {pipeline_mode = #tpu.pipeline_mode<synchronous>, transform_indices = @transform_8, window_bounds = array<i64: 512, 896>}, {pipeline_mode = #tpu.pipeline_mode<synchronous>, transform_indices = @transform_9, window_bounds = array<i64: 1, 896>}, {transform_indices = @transform_10, window_bounds = array<i64: 16, 896>}, {transform_indices = @transform_11, window_bounds = array<i64: 16, 256>}]} {
    %c0 = arith.constant 0 : index
    %c0_0 = arith.constant 0 : index
    %0 = vector.load %arg1[%c0, %c0_0] : memref<16x896xbf16, #tpu.memory_space<vmem>>, vector<16x896xbf16>
    %c0_1 = arith.constant 0 : index
    %c0_2 = arith.constant 0 : index
    %1 = vector.load %arg3[%c0_1, %c0_2] : memref<896x512xbf16, #tpu.memory_space<vmem>>, vector<896x512xbf16>
    %cst = arith.constant dense<0.000000e+00> : vector<16x512xf32>
    %2 = tpu.matmul %0, %1, %cst {dimension_numbers = #tpu.dot_dimension_numbers<[1], [0], [0], [1], [0, 0, 1, 1], [], []>} : vector<16x896xbf16>, vector<896x512xbf16>, vector<16x512xf32> -> vector<16x512xf32>
    %c0_3 = arith.constant 0 : index
    %c0_4 = arith.constant 0 : index
    %3 = vector.load %arg4[%c0_3, %c0_4] : memref<1x512xf32, #tpu.memory_space<vmem>>, vector<1x512xf32>
    %4 = vector.broadcast %3 : vector<1x512xf32> to vector<16x512xf32>
    %5 = arith.addf %2, %4 : vector<16x512xf32>
    %cst_5 = arith.constant 0.000000e+00 : f32
    %6 = vector.broadcast %cst_5 : f32 to vector<16x512xf32>
    %7 = arith.maximumf %5, %6 : vector<16x512xf32>
    %8 = arith.truncf %7 : vector<16x512xf32> to vector<16x512xbf16>
    %c0_6 = arith.constant 0 : index
    %c0_7 = arith.constant 0 : index
    %9 = vector.load %arg5[%c0_6, %c0_7] : memref<512x256xbf16, #tpu.memory_space<vmem>>, vector<512x256xbf16>
    %cst_8 = arith.constant dense<0.000000e+00> : vector<16x256xf32>
    %10 = tpu.matmul %8, %9, %cst_8 {dimension_numbers = #tpu.dot_dimension_numbers<[1], [0], [0], [1], [0, 0, 1, 1], [], []>} : vector<16x512xbf16>, vector<512x256xbf16>, vector<16x256xf32> -> vector<16x256xf32>
    %c0_9 = arith.constant 0 : index
    %c0_10 = arith.constant 0 : index
    %11 = vector.load %arg6[%c0_9, %c0_10] : memref<1x256xf32, #tpu.memory_space<vmem>>, vector<1x256xf32>
    %12 = vector.broadcast %11 : vector<1x256xf32> to vector<16x256xf32>
    %13 = arith.addf %10, %12 : vector<16x256xf32>
    %14 = vector.extract_strided_slice %13 {offsets = [0, 0], sizes = [16, 128], strides = [1, 1]} : vector<16x256xf32> to vector<16x128xf32>
    %15 = vector.extract_strided_slice %13 {offsets = [0, 128], sizes = [16, 128], strides = [1, 1]} : vector<16x256xf32> to vector<16x128xf32>
    %cst_11 = arith.constant 5.000000e-01 : f32
    %16 = vector.broadcast %cst_11 : f32 to vector<16x128xf32>
    %17 = arith.mulf %15, %16 : vector<16x128xf32>
    %18 = math.exp %17 : vector<16x128xf32>
    %c0_12 = arith.constant 0 : index
    %c0_13 = arith.constant 0 : index
    %19 = vector.load %arg2[%c0_12, %c0_13] : memref<16x128xf32, #tpu.memory_space<vmem>>, vector<16x128xf32>
    %20 = arith.mulf %18, %19 : vector<16x128xf32>
    %21 = arith.addf %14, %20 : vector<16x128xf32>
    %22 = arith.truncf %21 : vector<16x128xf32> to vector<16x128xbf16>
    %c0_14 = arith.constant 0 : index
    %c0_15 = arith.constant 0 : index
    %23 = vector.load %arg7[%c0_14, %c0_15] : memref<128x512xbf16, #tpu.memory_space<vmem>>, vector<128x512xbf16>
    %cst_16 = arith.constant dense<0.000000e+00> : vector<16x512xf32>
    %24 = tpu.matmul %22, %23, %cst_16 {dimension_numbers = #tpu.dot_dimension_numbers<[1], [0], [0], [1], [0, 0, 1, 1], [], []>} : vector<16x128xbf16>, vector<128x512xbf16>, vector<16x512xf32> -> vector<16x512xf32>
    %c0_17 = arith.constant 0 : index
    %c0_18 = arith.constant 0 : index
    %25 = vector.load %arg8[%c0_17, %c0_18] : memref<1x512xf32, #tpu.memory_space<vmem>>, vector<1x512xf32>
    %26 = vector.broadcast %25 : vector<1x512xf32> to vector<16x512xf32>
    %27 = arith.addf %24, %26 : vector<16x512xf32>
    %cst_19 = arith.constant 0.000000e+00 : f32
    %28 = vector.broadcast %cst_19 : f32 to vector<16x512xf32>
    %29 = arith.maximumf %27, %28 : vector<16x512xf32>
    %30 = arith.truncf %29 : vector<16x512xf32> to vector<16x512xbf16>
    %c0_20 = arith.constant 0 : index
    %c0_21 = arith.constant 0 : index
    %31 = vector.load %arg9[%c0_20, %c0_21] : memref<512x896xbf16, #tpu.memory_space<vmem>>, vector<512x896xbf16>
    %cst_22 = arith.constant dense<0.000000e+00> : vector<16x896xf32>
    %32 = tpu.matmul %30, %31, %cst_22 {dimension_numbers = #tpu.dot_dimension_numbers<[1], [0], [0], [1], [0, 0, 1, 1], [], []>} : vector<16x512xbf16>, vector<512x896xbf16>, vector<16x896xf32> -> vector<16x896xf32>
    %c0_23 = arith.constant 0 : index
    %c0_24 = arith.constant 0 : index
    %33 = vector.load %arg10[%c0_23, %c0_24] : memref<1x896xf32, #tpu.memory_space<vmem>>, vector<1x896xf32>
    %34 = vector.broadcast %33 : vector<1x896xf32> to vector<16x896xf32>
    %35 = arith.addf %32, %34 : vector<16x896xf32>
    %cst_25 = arith.constant 0.000000e+00 : f32
    %36 = vector.broadcast %cst_25 : f32 to vector<16x896xf32>
    %37 = arith.subf %36, %35 : vector<16x896xf32>
    %38 = math.exp %37 : vector<16x896xf32>
    %cst_26 = arith.constant 1.000000e+00 : f32
    %39 = vector.broadcast %cst_26 : f32 to vector<16x896xf32>
    %40 = arith.addf %39, %38 : vector<16x896xf32>
    %41 = tpu.reciprocal %40 {approx = true} : vector<16x896xf32> -> vector<16x896xf32>
    %42 = arith.truncf %41 : vector<16x896xf32> to vector<16x896xbf16>
    %c0_27 = arith.constant 0 : index
    %c0_28 = arith.constant 0 : index
    %43 = vector.load %arg11[%c0_27, %c0_28] : memref<16x896xbf16, #tpu.memory_space<vmem>>, vector<16x896xbf16>
    tpu.vector_store %arg11[%c0_27, %c0_28], %42 {strides = array<i32>} : memref<16x896xbf16, #tpu.memory_space<vmem>>, vector<16x896xbf16>,
    %c0_29 = arith.constant 0 : index
    %c0_30 = arith.constant 0 : index
    %44 = vector.load %arg12[%c0_29, %c0_30] : memref<16x256xf32, #tpu.memory_space<vmem>>, vector<16x256xf32>
    tpu.vector_store %arg12[%c0_29, %c0_30], %13 {strides = array<i32>} : memref<16x256xf32, #tpu.memory_space<vmem>>, vector<16x256xf32>,
    return
  }
  func.func @transform_0(%arg0: i32) -> (i32, i32) {
    %c0_i32 = arith.constant 0 : i32
    %c0_i32_0 = arith.constant 0 : i32
    return %arg0, %c0_i32 : i32, i32
  }
  func.func @transform_1(%arg0: i32) -> (i32, i32) {
    %c0_i32 = arith.constant 0 : i32
    %c0_i32_0 = arith.constant 0 : i32
    return %arg0, %c0_i32 : i32, i32
  }
  func.func @transform_2(%arg0: i32) -> (i32, i32) {
    %c0_i32 = arith.constant 0 : i32
    %c0_i32_0 = arith.constant 0 : i32
    %c0_i32_1 = arith.constant 0 : i32
    return %c0_i32, %c0_i32_0 : i32, i32
  }
  func.func @transform_3(%arg0: i32) -> (i32, i32) {
    %c0_i32 = arith.constant 0 : i32
    %c0_i32_0 = arith.constant 0 : i32
    %c0_i32_1 = arith.constant 0 : i32
    return %c0_i32, %c0_i32_0 : i32, i32
  }
  func.func @transform_4(%arg0: i32) -> (i32, i32) {
    %c0_i32 = arith.constant 0 : i32
    %c0_i32_0 = arith.constant 0 : i32
    %c0_i32_1 = arith.constant 0 : i32
    return %c0_i32, %c0_i32_0 : i32, i32
  }
  func.func @transform_5(%arg0: i32) -> (i32, i32) {
    %c0_i32 = arith.constant 0 : i32
    %c0_i32_0 = arith.constant 0 : i32
    %c0_i32_1 = arith.constant 0 : i32
    return %c0_i32, %c0_i32_0 : i32, i32
  }
  func.func @transform_6(%arg0: i32) -> (i32, i32) {
    %c0_i32 = arith.constant 0 : i32
    %c0_i32_0 = arith.constant 0 : i32
    %c0_i32_1 = arith.constant 0 : i32
    return %c0_i32, %c0_i32_0 : i32, i32
  }
  func.func @transform_7(%arg0: i32) -> (i32, i32) {
    %c0_i32 = arith.constant 0 : i32
    %c0_i32_0 = arith.constant 0 : i32
    %c0_i32_1 = arith.constant 0 : i32
    return %c0_i32, %c0_i32_0 : i32, i32
  }
  func.func @transform_8(%arg0: i32) -> (i32, i32) {
    %c0_i32 = arith.constant 0 : i32
    %c0_i32_0 = arith.constant 0 : i32
    %c0_i32_1 = arith.constant 0 : i32
    return %c0_i32, %c0_i32_0 : i32, i32
  }
  func.func @transform_9(%arg0: i32) -> (i32, i32) {
    %c0_i32 = arith.constant 0 : i32
    %c0_i32_0 = arith.constant 0 : i32
    %c0_i32_1 = arith.constant 0 : i32
    return %c0_i32, %c0_i32_0 : i32, i32
  }
  func.func @transform_10(%arg0: i32) -> (i32, i32) {
    %c0_i32 = arith.constant 0 : i32
    %c0_i32_0 = arith.constant 0 : i32
    return %arg0, %c0_i32 : i32, i32
  }
  func.func @transform_11(%arg0: i32) -> (i32, i32) {
    %c0_i32 = arith.constant 0 : i32
    %c0_i32_0 = arith.constant 0 : i32
    return %arg0, %c0_i32 : i32, i32
  }
}

</mosaic_0001>

<bundles_post_ra>
// kernel: vae_forward.1
= control target key start
LH: loop header
LB: loop body
LE: loop exit
PB: predicated region body
PF: predicated region fallthrough
CT: control target
= control target key end

     0   :  { %s10902_s2 = inlined_call_operand.vmem [shape: bf16[896,512], index: 2, kind: input, shape index: {}]   ;;  %s10903_s0 = inlined_call_operand.vmem [shape: bf16[16,896], index: 0, kind: input, shape index: {}]   ;;  %s10904_s3 = inlined_call_operand.vmem [shape: f32[1,512], index: 3, kind: input, shape index: {}]   ;;  %s10905_s4 = inlined_call_operand.vmem [shape: bf16[512,256], index: 4, kind: input, shape index: {}]   ;;  %s10906_s6 = inlined_call_operand.vmem [shape: bf16[128,512], index: 6, kind: input, shape index: {}]   ;;  %s10907_s5 = inlined_call_operand.vmem [shape: f32[1,256], index: 5, kind: input, shape index: {}]   ;;  %s10908_s11 = inlined_call_operand.vmem [shape: f32[16,256], index: 11, kind: output, shape index: {1}]   ;;  %s10909_s8 = inlined_call_operand.vmem [shape: bf16[512,896], index: 8, kind: input, shape index: {}]   ;;  %s10910_s1 = inlined_call_operand.vmem [shape: f32[16,128], index: 1, kind: input, shape index: {}]   ;;  %s10911_s7 = inlined_call_operand.vmem [shape: f32[1,512], index: 7, kind: input, shape index: {}]   ;;  %s10912_s9 = inlined_call_operand.vmem [shape: f32[1,896], index: 9, kind: input, shape index: {}]   ;;  %s10913_s10 = inlined_call_operand.vmem [shape: bf16[16,896], index: 10, kind: output, shape index: {0}]  }
   0x1   :  { %v4680_v0 = vld [vmem:[%s10902_s2 + $0xe0] sm:$0xf]  ;;  %v6779_v1 = vld [vmem:[%s10902_s2 + $0xec] sm:$0xf0] }
   0x2   :  { %v4808_v2 = vld [vmem:[%s10902_s2 + $0x1e0] sm:$0xf]  ;;  %v4681_v3 = vor.u32 %v6779_v1, %v4680_v0  ;;  %v6811_v4 = vld [vmem:[%s10902_s2 + $0x1ec] sm:$0xf0] }
   0x3   :  { %v4936_v5 = vld [vmem:[%s10902_s2 + $0x2e0] sm:$0xf]  ;;  %v6843_v6 = vld [vmem:[%s10902_s2 + $0x2ec] sm:$0xf0]  ;;  %v4809_v7 = vor.u32 %v6811_v4, %v4808_v2 }
   0x4   :  { %v4937_v8 = vor.u32 %v6843_v6, %v4936_v5  ;;  %v5064_v9 = vld [vmem:[%s10902_s2 + $0x3e0] sm:$0xf]  ;;  %v6875_v10 = vld [vmem:[%s10902_s2 + $0x3ec] sm:$0xf0]  ;;  %1435 = vmatpush.bf16.msra.mxu0 %v4681_v3 }
   0x5   :  { %v4664_v11 = vld [vmem:[%s10902_s2 + $0xc0] sm:$0xf]  ;;  %v5065_v12 = vor.u32 %v6875_v10, %v5064_v9  ;;  %v6775_v13 = vld [vmem:[%s10902_s2 + $0xcc] sm:$0xf0]  ;;  %1449 = vmatpush.bf16.msra.mxu1 %v4809_v7 }
   0x6   :  { %v4792_v14 = vld [vmem:[%s10902_s2 + $0x1c0] sm:$0xf]  ;;  %v6807_v15 = vld [vmem:[%s10902_s2 + $0x1cc] sm:$0xf0]  ;;  %1463 = vmatpush.bf16.msra.mxu2 %v4937_v8  ;;  %v4665_v16 = vor.u32 %v6775_v13, %v4664_v11 }
   0x7   :  { %v4793_v17 = vor.u32 %v6807_v15, %v4792_v14  ;;  %v4920_v18 = vld [vmem:[%s10902_s2 + $0x2c0] sm:$0xf]  ;;  %v6839_v19 = vld [vmem:[%s10902_s2 + $0x2cc] sm:$0xf0]  ;;  %1477 = vmatpush.bf16.msra.mxu3 %v5065_v12 }
   0x8   :  { %v5048_v20 = vld [vmem:[%s10902_s2 + $0x3c0] sm:$0xf]  ;;  %v4921_v21 = vor.u32 %v6839_v19, %v4920_v18  ;;  %v6871_v22 = vld [vmem:[%s10902_s2 + $0x3cc] sm:$0xf0]  ;;  %1436 = vmatpush.bf16.msra.mxu0 %v4665_v16 }
   0x9   :  { %v4648_v23 = vld [vmem:[%s10902_s2 + $0xa0] sm:$0xf]  ;;  %v6771_v24 = vld [vmem:[%s10902_s2 + $0xac] sm:$0xf0]  ;;  %v5049_v25 = vor.u32 %v6871_v22, %v5048_v20  ;;  %1450 = vmatpush.bf16.msra.mxu1 %v4793_v17 }
   0xa   :  { %v4776_v26 = vld [vmem:[%s10902_s2 + $0x1a0] sm:$0xf]  ;;  %v6803_v27 = vld [vmem:[%s10902_s2 + $0x1ac] sm:$0xf0]  ;;  %v4649_v29 = vor.u32 %v6771_v24, %v4648_v23  ;;  %1464 = vmatpush.bf16.msra.mxu2 %v4921_v21 }
   0xb   :  { %v4904_v28 = vld [vmem:[%s10902_s2 + $0x2a0] sm:$0xf]  ;;  %v6835_v30 = vld [vmem:[%s10902_s2 + $0x2ac] sm:$0xf0]  ;;  %v4777_v33 = vor.u32 %v6803_v27, %v4776_v26  ;;  %1478 = vmatpush.bf16.msra.mxu3 %v5049_v25 }
   0xc   :  { %v5032_v31 = vld [vmem:[%s10902_s2 + $0x3a0] sm:$0xf]  ;;  %v6867_v32 = vld [vmem:[%s10902_s2 + $0x3ac] sm:$0xf0]  ;;  %v4905_v34 = vor.u32 %v6835_v30, %v4904_v28  ;;  %1437 = vmatpush.bf16.msra.mxu0 %v4649_v29 }
   0xd   :  { %v4632_v35 = vld [vmem:[%s10902_s2 + $0x80] sm:$0xf]  ;;  %v6767_v36 = vld [vmem:[%s10902_s2 + $0x8c] sm:$0xf0]  ;;  %v5033_v38 = vor.u32 %v6867_v32, %v5032_v31  ;;  %1451 = vmatpush.bf16.msra.mxu1 %v4777_v33 }
   0xe   :  { %v4760_v37 = vld [vmem:[%s10902_s2 + $0x180] sm:$0xf]  ;;  %v6799_v39 = vld [vmem:[%s10902_s2 + $0x18c] sm:$0xf0]  ;;  %v4633_v44 = vor.u32 %v6767_v36, %v4632_v35  ;;  %1465 = vmatpush.bf16.msra.mxu2 %v4905_v34 }
   0xf   :  { %v4888_v40 = vld [vmem:[%s10902_s2 + $0x280] sm:$0xf]  ;;  %v6831_v41 = vld [vmem:[%s10902_s2 + $0x28c] sm:$0xf0]  ;;  %v4761_v45 = vor.u32 %v6799_v39, %v4760_v37  ;;  %1479 = vmatpush.bf16.msra.mxu3 %v5033_v38  ;;  %v6777_v37 = vld [vmem:[%s10902_s2 + $0xe4] sm:$0xf] }
  0x10   :  { %v5016_v42 = vld [vmem:[%s10902_s2 + $0x380] sm:$0xf]  ;;  %v6863_v43 = vld [vmem:[%s10902_s2 + $0x38c] sm:$0xf0]  ;;  %v4889_v46 = vor.u32 %v6831_v41, %v4888_v40  ;;  %1438 = vmatpush.bf16.msra.mxu0 %v4633_v44  ;;  %v4682_v38 = vld [vmem:[%s10902_s2 + $0xf0] sm:$0xf0] }
  0x11   :  { %v4616_v47 = vld [vmem:[%s10902_s2 + $0x60] sm:$0xf]  ;;  %v6763_v48 = vld [vmem:[%s10902_s2 + $0x6c] sm:$0xf0]  ;;  %v5017_v50 = vor.u32 %v6863_v43, %v5016_v42  ;;  %1452 = vmatpush.bf16.msra.mxu1 %v4761_v45 }
  0x12   :  { %v4744_v49 = vld [vmem:[%s10902_s2 + $0x160] sm:$0xf]  ;;  %v6795_v51 = vld [vmem:[%s10902_s2 + $0x16c] sm:$0xf0]  ;;  %v4617_v56 = vor.u32 %v6763_v48, %v4616_v47  ;;  %1466 = vmatpush.bf16.msra.mxu2 %v4889_v46  ;;  %v4685_v48 = vor.u32 %v6777_v37, %v4682_v38 }
  0x13   :  { %v4872_v52 = vld [vmem:[%s10902_s2 + $0x260] sm:$0xf]  ;;  %v6827_v53 = vld [vmem:[%s10902_s2 + $0x26c] sm:$0xf0]  ;;  %v4745_v57 = vor.u32 %v6795_v51, %v4744_v49  ;;  %1480 = vmatpush.bf16.msra.mxu3 %v5017_v50  ;;  %v6773_v50 = vld [vmem:[%s10902_s2 + $0xc4] sm:$0xf] }
  0x14   :  { %v5000_v54 = vld [vmem:[%s10902_s2 + $0x360] sm:$0xf]  ;;  %v6859_v55 = vld [vmem:[%s10902_s2 + $0x36c] sm:$0xf0]  ;;  %v4873_v58 = vor.u32 %v6827_v53, %v4872_v52  ;;  %1439 = vmatpush.bf16.msra.mxu0 %v4617_v56  ;;  %v4666_v51 = vld [vmem:[%s10902_s2 + $0xd0] sm:$0xf0] }
  0x15   :  { %v4600_v59 = vld [vmem:[%s10902_s2 + $0x40] sm:$0xf]  ;;  %v6759_v60 = vld [vmem:[%s10902_s2 + $0x4c] sm:$0xf0]  ;;  %v5001_v62 = vor.u32 %v6859_v55, %v5000_v54  ;;  %1453 = vmatpush.bf16.msra.mxu1 %v4745_v57  ;;  %v6745_v53 = vld [vmem:[%s10903_s0 + $0x18] sm:$0xf0] }
  0x16   :  { %v4728_v61 = vld [vmem:[%s10902_s2 + $0x140] sm:$0xf]  ;;  %v6791_v63 = vld [vmem:[%s10902_s2 + $0x14c] sm:$0xf0]  ;;  %v4601_v4 = vor.u32 %v6759_v60, %v4600_v59  ;;  %1467 = vmatpush.bf16.msra.mxu2 %v4873_v58  ;;  %v4548_v54 = vld [vmem:[%s10903_s0 + $0x8] sm:$0xf] }
  0x17   :  { %v4856_v0 = vld [vmem:[%s10902_s2 + $0x240] sm:$0xf]  ;;  %v6823_v1 = vld [vmem:[%s10902_s2 + $0x24c] sm:$0xf0]  ;;  %v4729_v5 = vor.u32 %v6791_v63, %v4728_v61  ;;  %1481 = vmatpush.bf16.msra.mxu3 %v5001_v62  ;;  %v6746_v58 = vld [vmem:[%s10903_s0 + $0x20] sm:$0xf0] }
  0x18   :  { %v4984_v2 = vld [vmem:[%s10902_s2 + $0x340] sm:$0xf]  ;;  %v6855_v3 = vld [vmem:[%s10902_s2 + $0x34c] sm:$0xf0]  ;;  %v4857_v6 = vor.u32 %v6823_v1, %v4856_v0  ;;  %1440 = vmatpush.bf16.msra.mxu0 %v4601_v4  ;;  %v7679_v0 = vor.u32 %v6746_v58, %v4548_v54  ;;  %v4669_v1 = vor.u32 %v6773_v50, %v4666_v51  ;;  %v6769_v4 = vld [vmem:[%s10902_s2 + $0xa4] sm:$0xf] }
  0x19   :  { %v4584_v7 = vld [vmem:[%s10902_s2 + $0x20] sm:$0xf]  ;;  %v6755_v8 = vld [vmem:[%s10902_s2 + $0x2c] sm:$0xf0]  ;;  %v4985_v10 = vor.u32 %v6855_v3, %v4984_v2  ;;  %1454 = vmatpush.bf16.msra.mxu1 %v4729_v5  ;;  %v4650_v5 = vld [vmem:[%s10902_s2 + $0xb0] sm:$0xf0] }
  0x1a   :  { %v4712_v9 = vld [vmem:[%s10902_s2 + $0x120] sm:$0xf]  ;;  %v6787_v11 = vld [vmem:[%s10902_s2 + $0x12c] sm:$0xf0]  ;;  %v4585_v16 = vor.u32 %v6755_v8, %v4584_v7  ;;  %1468 = vmatpush.bf16.msra.mxu2 %v4857_v6  ;;  %v6742_v6 = vld [vmem:[%s10903_s0 + $0x4] sm:$0xf] }
  0x1b   :  { %v4840_v12 = vld [vmem:[%s10902_s2 + $0x220] sm:$0xf]  ;;  %v6819_v13 = vld [vmem:[%s10902_s2 + $0x22c] sm:$0xf0]  ;;  %v4713_v19 = vor.u32 %v6787_v11, %v4712_v9  ;;  %1482 = vmatpush.bf16.msra.mxu3 %v4985_v10 }
  0x1c   :  { %v4968_v14 = vld [vmem:[%s10902_s2 + $0x320] sm:$0xf]  ;;  %v6851_v15 = vld [vmem:[%s10902_s2 + $0x32c] sm:$0xf0]  ;;  %v4841_v20 = vor.u32 %v6819_v13, %v4840_v12  ;;  %1441 = vmatpush.bf16.msra.mxu0 %v4585_v16 }
  0x1d   :  { %v4568_v17 = vld [vmem:[%s10902_s2] sm:$0xf]  ;;  %v6751_v18 = vld [vmem:[%s10902_s2 + $0xc] sm:$0xf0]  ;;  %v4969_v24 = vor.u32 %v6851_v15, %v4968_v14  ;;  %1455 = vmatpush.bf16.msra.mxu1 %v4713_v19  ;;  %v6743_v19 = vld [vmem:[%s10903_s0 + $0xc] sm:$0xf] }
  0x1e   :  { %v4696_v21 = vld [vmem:[%s10902_s2 + $0x100] sm:$0xf]  ;;  %v6783_v22 = vld [vmem:[%s10902_s2 + $0x10c] sm:$0xf0]  ;;  %v4569_v31 = vor.u32 %v6751_v18, %v4568_v17  ;;  %1469 = vmatpush.bf16.msra.mxu2 %v4841_v20  ;;  %v4653_v17 = vor.u32 %v6769_v4, %v4650_v5  ;;  %v4550_v20 = vld [vmem:[%s10903_s0 + $0x24] sm:$0xf0] }
  0x1f   :  { %v4824_v23 = vld [vmem:[%s10902_s2 + $0x200] sm:$0xf]  ;;  %v6815_v25 = vld [vmem:[%s10902_s2 + $0x20c] sm:$0xf0]  ;;  %v4697_v35 = vor.u32 %v6783_v22, %v4696_v21  ;;  %1483 = vmatpush.bf16.msra.mxu3 %v4969_v24  ;;  %v6765_v21 = vld [vmem:[%s10902_s2 + $0x84] sm:$0xf] }
  0x20   :  { %v4952_v26 = vld [vmem:[%s10902_s2 + $0x300] sm:$0xf]  ;;  %v6847_v27 = vld [vmem:[%s10902_s2 + $0x30c] sm:$0xf0]  ;;  %v4825_v36 = vor.u32 %v6815_v25, %v4824_v23  ;;  %1442 = vmatpush.bf16.msra.mxu0 %v4569_v31  ;;  %v4634_v22 = vld [vmem:[%s10902_s2 + $0x90] sm:$0xf0]  ;;  %v7734_v23 = vor.u32 %v6743_v19, %v4550_v20 }
  0x21   :  { %v5192_v28 = vld [vmem:[%s10902_s2 + $0x4e0] sm:$0xf]  ;;  %v6907_v29 = vld [vmem:[%s10902_s2 + $0x4ec] sm:$0xf0]  ;;  %v4953_v39 = vor.u32 %v6847_v27, %v4952_v26  ;;  %1456 = vmatpush.bf16.msra.mxu1 %v4697_v35  ;;  %v4618_v35 = vld [vmem:[%s10902_s2 + $0x70] sm:$0xf0] }
  0x22   :  { %v5320_v30 = vld [vmem:[%s10902_s2 + $0x5e0] sm:$0xf]  ;;  %v6939_v32 = vld [vmem:[%s10902_s2 + $0x5ec] sm:$0xf0]  ;;  %v5193_v40 = vor.u32 %v6907_v29, %v5192_v28  ;;  %1470 = vmatpush.bf16.msra.mxu2 %v4825_v36  ;;  %v5194_v19 = vld [vmem:[%s10902_s2 + $0x4f0] sm:$0xf0] }
  0x23   :  { %v5448_v33 = vld [vmem:[%s10902_s2 + $0x6e0] sm:$0xf]  ;;  %v6971_v34 = vld [vmem:[%s10902_s2 + $0x6ec] sm:$0xf0]  ;;  %v5321_v43 = vor.u32 %v6939_v32, %v5320_v30  ;;  %1484 = vmatpush.bf16.msra.mxu3 %v4953_v39  ;;  %v4637_v30 = vor.u32 %v6765_v21, %v4634_v22 }
  0x24   :  { %v5176_v41 = vld [vmem:[%s10902_s2 + $0x4c0] sm:$0xf]  ;;  %v6903_v42 = vld [vmem:[%s10902_s2 + $0x4cc] sm:$0xf0]  ;;  %v5449_v44 = vor.u32 %v6971_v34, %v5448_v33  ;;  %1491 = vmatpush.bf16.msrb.mxu0 %v5193_v40  ;;  %v6761_v34 = vld [vmem:[%s10902_s2 + $0x64] sm:$0xf] }
  0x25   :  { %v5304_v45 = vld [vmem:[%s10902_s2 + $0x5c0] sm:$0xf]  ;;  %v6935_v46 = vld [vmem:[%s10902_s2 + $0x5cc] sm:$0xf0]  ;;  %v5177_v55 = vor.u32 %v6903_v42, %v5176_v41  ;;  %1505 = vmatpush.bf16.msrb.mxu1 %v5321_v43  ;;  %1471 = vmatmul.bf16.vlgmr.msra.gmra.mxu2 %v7679_v0  ;;  %v4621_v42 = vor.u32 %v6761_v34, %v4618_v35  ;;  %v4794_v34 = vld [vmem:[%s10902_s2 + $0x1d0] sm:$0xf0] }
  0x26   :  { %v5432_v47 = vld [vmem:[%s10902_s2 + $0x6c0] sm:$0xf]  ;;  %v6967_v49 = vld [vmem:[%s10902_s2 + $0x6cc] sm:$0xf0]  ;;  %1519 = vmatpush.bf16.msrb.mxu2 %v5449_v44  ;;  %v5305_v59 = vor.u32 %v6935_v46, %v5304_v45  ;;  %1485 = vmatmul.bf16.vlgmr.msra.gmra.mxu3 %v7734_v23  ;;  %v6757_v46 = vld [vmem:[%s10902_s2 + $0x44] sm:$0xf] }
  0x27   :  { %v4540_v52 = vld [vmem:[%s10903_s0] sm:$0xf]  ;;  %v5433_v60 = vor.u32 %v6967_v49, %v5432_v47  ;;  %v6899_v61 = vld [vmem:[%s10902_s2 + $0x4ac] sm:$0xf0]  ;;  %1533 = vmatpush.bf16.msrb.mxu3 %v4685_v48  ;;  %v4602_v47 = vld [vmem:[%s10902_s2 + $0x50] sm:$0xf0] }
  0x28   :  { %v5160_v56 = vld [vmem:[%s10902_s2 + $0x4a0] sm:$0xf]  ;;  %v7665_v57 = vor.u32 %v6745_v53, %v4540_v52  ;;  %v6931_v63 = vld [vmem:[%s10902_s2 + $0x5ac] sm:$0xf0]  ;;  %1492 = vmatpush.bf16.msrb.mxu0 %v5177_v55  ;;  %v4605_v54 = vor.u32 %v6757_v46, %v4602_v47  ;;  %v6837_v35 = vld [vmem:[%s10902_s2 + $0x2c4] sm:$0xf] }
  0x29   :  { %v5288_v62 = vld [vmem:[%s10902_s2 + $0x5a0] sm:$0xf]  ;;  %v6963_v3 = vld [vmem:[%s10902_s2 + $0x6ac] sm:$0xf0]  ;;  %v5161_v8 = vor.u32 %v6899_v61, %v5160_v56  ;;  %1506 = vmatpush.bf16.msrb.mxu1 %v5305_v59  ;;  %v6753_v59 = vld [vmem:[%s10902_s2 + $0x24] sm:$0xf] }
  0x2a   :  { %v5416_v2 = vld [vmem:[%s10902_s2 + $0x6a0] sm:$0xf]  ;;  %1443 = vmatmul.bf16.vlgmr.msra.gmra.mxu0 %v7665_v57  ;;  %v6895_v10 = vld [vmem:[%s10902_s2 + $0x48c] sm:$0xf0]  ;;  %1520 = vmatpush.bf16.msrb.mxu2 %v5433_v60  ;;  %v5289_v12 = vor.u32 %v6931_v63, %v5288_v62  ;;  %v4586_v60 = vld [vmem:[%s10902_s2 + $0x30] sm:$0xf0] }
  0x2b   :  { %v4542_v7 = vld [vmem:[%s10903_s0 + $0x1c] sm:$0xf0]  ;;  %v5417_v13 = vor.u32 %v6963_v3, %v5416_v2  ;;  %v6927_v15 = vld [vmem:[%s10902_s2 + $0x58c] sm:$0xf0]  ;;  %1534 = vmatpush.bf16.msrb.mxu3 %v4669_v1 }
  0x2c   :  { %v5144_v9 = vld [vmem:[%s10902_s2 + $0x480] sm:$0xf]  ;;  %v7707_v11 = vor.u32 %v6742_v6, %v4542_v7  ;;  %v6959_v18 = vld [vmem:[%s10902_s2 + $0x68c] sm:$0xf0]  ;;  %1493 = vmatpush.bf16.msrb.mxu0 %v5161_v8  ;;  %v6749_v7 = vld [vmem:[%s10902_s2 + $0x4] sm:$0xf]  ;;  %v4589_v8 = vor.u32 %v6753_v59, %v4586_v60 }
  0x2d   :  { %v5272_v14 = vld [vmem:[%s10902_s2 + $0x580] sm:$0xf]  ;;  %v5145_v24 = vor.u32 %v6895_v10, %v5144_v9  ;;  %1507 = vmatpush.bf16.msrb.mxu1 %v5289_v12  ;;  %v6891_v28 = vld [vmem:[%s10902_s2 + $0x46c] sm:$0xf0]  ;;  %v4570_v9 = vld [vmem:[%s10902_s2 + $0x10] sm:$0xf0] }
  0x2e   :  { %v5400_v16 = vld [vmem:[%s10902_s2 + $0x680] sm:$0xf]  ;;  %1457 = vmatmul.bf16.vlgmr.msra.gmra.mxu1 %v7707_v11  ;;  %1521 = vmatpush.bf16.msrb.mxu2 %v5417_v13  ;;  %v5273_v25 = vor.u32 %v6927_v15, %v5272_v14  ;;  %v6923_v31 = vld [vmem:[%s10902_s2 + $0x56c] sm:$0xf0]  ;;  %v6809_v10 = vld [vmem:[%s10902_s2 + $0x1e4] sm:$0xf] }
  0x2f   :  { %v5401_v26 = vor.u32 %v6959_v18, %v5400_v16  ;;  %v5128_v27 = vld [vmem:[%s10902_s2 + $0x460] sm:$0xf]  ;;  %1535 = vmatpush.bf16.msrb.mxu3 %v4653_v17  ;;  %v6955_v33 = vld [vmem:[%s10902_s2 + $0x66c] sm:$0xf0]  ;;  %v4810_v12 = vld [vmem:[%s10902_s2 + $0x1f0] sm:$0xf0] }
  0x30   :  { %v5256_v29 = vld [vmem:[%s10902_s2 + $0x560] sm:$0xf]  ;;  %1494 = vmatpush.bf16.msrb.mxu0 %v5145_v24  ;;  %v5129_v36 = vor.u32 %v6891_v28, %v5128_v27  ;;  %v6887_v40 = vld [vmem:[%s10902_s2 + $0x44c] sm:$0xf0]  ;;  %v6841_v13 = vld [vmem:[%s10902_s2 + $0x2e4] sm:$0xf]  ;;  %v4813_v27 = vor.u32 %v6809_v10, %v4810_v12 }
  0x31   :  { %v5384_v32 = vld [vmem:[%s10902_s2 + $0x660] sm:$0xf]  ;;  %1508 = vmatpush.bf16.msrb.mxu1 %v5273_v25  ;;  %v5257_v37 = vor.u32 %v6923_v31, %v5256_v29  ;;  %v6919_v43 = vld [vmem:[%s10902_s2 + $0x54c] sm:$0xf0]  ;;  %v4938_v14 = vld [vmem:[%s10902_s2 + $0x2f0] sm:$0xf0] }
  0x32   :  { %1522 = vmatpush.bf16.msrb.mxu2 %v5401_v26  ;;  %v5385_v38 = vor.u32 %v6955_v33, %v5384_v32  ;;  %v5112_v39 = vld [vmem:[%s10902_s2 + $0x440] sm:$0xf]  ;;  %v6951_v45 = vld [vmem:[%s10902_s2 + $0x64c] sm:$0xf0]  ;;  %v6873_v15 = vld [vmem:[%s10902_s2 + $0x3e4] sm:$0xf]  ;;  %v4573_v26 = vor.u32 %v6749_v7, %v4570_v9  ;;  %v4941_v31 = vor.u32 %v6841_v13, %v4938_v14 }
  0x33   :  { %v5240_v41 = vld [vmem:[%s10902_s2 + $0x540] sm:$0xf]  ;;  %1536 = vmatpush.bf16.msrb.mxu3 %v4637_v30  ;;  %v5113_v48 = vor.u32 %v6887_v40, %v5112_v39  ;;  %v6883_v52 = vld [vmem:[%s10902_s2 + $0x42c] sm:$0xf0]  ;;  %v5066_v17 = vld [vmem:[%s10902_s2 + $0x3f0] sm:$0xf0] }
  0x34   :  { %v5368_v44 = vld [vmem:[%s10902_s2 + $0x640] sm:$0xf]  ;;  %1495 = vmatpush.bf16.msrb.mxu0 %v5129_v36  ;;  %v5241_v49 = vor.u32 %v6919_v43, %v5240_v41  ;;  %v6915_v55 = vld [vmem:[%s10902_s2 + $0x52c] sm:$0xf0]  ;;  %v6905_v18 = vld [vmem:[%s10902_s2 + $0x4e4] sm:$0xf]  ;;  %v5069_v32 = vor.u32 %v6873_v15, %v5066_v17 }
  0x35   :  { %1509 = vmatpush.bf16.msrb.mxu1 %v5257_v37  ;;  %v5369_v50 = vor.u32 %v6951_v45, %v5368_v44  ;;  %v5096_v51 = vld [vmem:[%s10902_s2 + $0x420] sm:$0xf]  ;;  %v6947_v58 = vld [vmem:[%s10902_s2 + $0x62c] sm:$0xf0]  ;;  %v6747_v24 = vld [vmem:[%s10903_s0 + $0x28] sm:$0xf0]  ;;  %v5197_v36 = vor.u32 %v6905_v18, %v5194_v19 }
  0x36   :  { %1523 = vmatpush.bf16.msrb.mxu2 %v5385_v38  ;;  %v5224_v53 = vld [vmem:[%s10902_s2 + $0x520] sm:$0xf]  ;;  %v5097_v62 = vor.u32 %v6883_v52, %v5096_v51  ;;  %v6879_v63 = vld [vmem:[%s10902_s2 + $0x40c] sm:$0xf0]  ;;  %v4564_v25 = vld [vmem:[%s10903_s0 + $0x18] sm:$0xf] }
  0x37   :  { %1537 = vmatpush.bf16.msrb.mxu3 %v4621_v42  ;;  %v5352_v56 = vld [vmem:[%s10902_s2 + $0x620] sm:$0xf]  ;;  %v6911_v2 = vld [vmem:[%s10902_s2 + $0x50c] sm:$0xf0]  ;;  %v5225_v3 = vor.u32 %v6915_v55, %v5224_v53  ;;  %v6748_v28 = vld [vmem:[%s10903_s0 + $0x30] sm:$0xf0] }
  0x38   :  { %v5080_v61 = vld [vmem:[%s10902_s2 + $0x400] sm:$0xf]  ;;  %1496 = vmatpush.bf16.msrb.mxu0 %v5113_v48  ;;  %v5353_v4 = vor.u32 %v6947_v58, %v5352_v56  ;;  %v6943_v6 = vld [vmem:[%s10902_s2 + $0x60c] sm:$0xf0]  ;;  %v6744_v29 = vld [vmem:[%s10903_s0 + $0x14] sm:$0xf]  ;;  %v7895_v41 = vor.u32 %v6748_v28, %v4564_v25 }
  0x39   :  { %v5208_v1 = vld [vmem:[%s10902_s2 + $0x500] sm:$0xf]  ;;  %1510 = vmatpush.bf16.msrb.mxu1 %v5241_v49  ;;  %v5081_v16 = vor.u32 %v6879_v63, %v5080_v61  ;;  %v4556_v22 = vld [vmem:[%s10903_s0 + $0x10] sm:$0xf]  ;;  %v6805_v33 = vld [vmem:[%s10902_s2 + $0x1c4] sm:$0xf] }
  0x3a   :  { %1524 = vmatpush.bf16.msrb.mxu2 %v5369_v50  ;;  %v5336_v5 = vld [vmem:[%s10902_s2 + $0x600] sm:$0xf]  ;;  %v5209_v20 = vor.u32 %v6911_v2, %v5208_v1  ;;  %v4558_v30 = vld [vmem:[%s10903_s0 + $0x2c] sm:$0xf0]  ;;  %v7884_v37 = vor.u32 %v6747_v24, %v4556_v22  ;;  %v4922_v38 = vld [vmem:[%s10902_s2 + $0x2d0] sm:$0xf0]  ;;  %v4797_v45 = vor.u32 %v6805_v33, %v4794_v34 }
  0x3b   :  { %1538 = vmatpush.bf16.msrb.mxu3 %v4605_v54  ;;  %v5337_v21 = vor.u32 %v6943_v6, %v5336_v5  ;;  %v6869_v39 = vld [vmem:[%s10902_s2 + $0x3c4] sm:$0xf]  ;;  %v5050_v40 = vld [vmem:[%s10902_s2 + $0x3d0] sm:$0xf0]  ;;  %v7897_v42 = vor.u32 %v6744_v29, %v4558_v30  ;;  %v4925_v46 = vor.u32 %v6837_v35, %v4922_v38 }
  0x3c   :  { %1497 = vmatpush.bf16.msrb.mxu0 %v5097_v62  ;;  %v6901_v43 = vld [vmem:[%s10902_s2 + $0x4c4] sm:$0xf]  ;;  %v5178_v44 = vld [vmem:[%s10902_s2 + $0x4d0] sm:$0xf0]  ;;  %v5053_v47 = vor.u32 %v6869_v39, %v5050_v40 }
  0x3d   :  { %1511 = vmatpush.bf16.msrb.mxu1 %v5225_v3  ;;  %v6801_v48 = vld [vmem:[%s10902_s2 + $0x1a4] sm:$0xf]  ;;  %v4778_v49 = vld [vmem:[%s10902_s2 + $0x1b0] sm:$0xf0]  ;;  %v5181_v51 = vor.u32 %v6901_v43, %v5178_v44 }
  0x3e   :  { %1525 = vmatpush.bf16.msrb.mxu2 %v5353_v4  ;;  %v6833_v50 = vld [vmem:[%s10902_s2 + $0x2a4] sm:$0xf]  ;;  %v4906_v52 = vld [vmem:[%s10902_s2 + $0x2b0] sm:$0xf0]  ;;  %v4781_v58 = vor.u32 %v6801_v48, %v4778_v49 }
  0x3f   :  { %1539 = vmatpush.bf16.msrb.mxu3 %v4589_v8  ;;  %v6865_v53 = vld [vmem:[%s10902_s2 + $0x3a4] sm:$0xf]  ;;  %v5034_v54 = vld [vmem:[%s10902_s2 + $0x3b0] sm:$0xf0]  ;;  %v4909_v59 = vor.u32 %v6833_v50, %v4906_v52 }
  0x40   :  { %1498 = vmatpush.bf16.msrb.mxu0 %v5081_v16  ;;  %v6897_v55 = vld [vmem:[%s10902_s2 + $0x4a4] sm:$0xf]  ;;  %v5162_v56 = vld [vmem:[%s10902_s2 + $0x4b0] sm:$0xf0]  ;;  %v5037_v60 = vor.u32 %v6865_v53, %v5034_v54 }
  0x41   :  { %1512 = vmatpush.bf16.msrb.mxu1 %v5209_v20  ;;  %v6797_v61 = vld [vmem:[%s10902_s2 + $0x184] sm:$0xf]  ;;  %v4762_v62 = vld [vmem:[%s10902_s2 + $0x190] sm:$0xf0]  ;;  %v5165_v1 = vor.u32 %v6897_v55, %v5162_v56 }
  0x42   :  { %1526 = vmatpush.bf16.msrb.mxu2 %v5337_v21  ;;  %v6829_v63 = vld [vmem:[%s10902_s2 + $0x284] sm:$0xf]  ;;  %v4890_v2 = vld [vmem:[%s10902_s2 + $0x290] sm:$0xf0]  ;;  %v4765_v7 = vor.u32 %v6797_v61, %v4762_v62 }
  0x43   :  { %1540 = vmatpush.bf16.msrb.mxu3 %v4573_v26  ;;  %1499 = vmatmul.bf16.vlgmr.msrb.gmra.mxu0 %v7884_v37  ;;  %v6861_v3 = vld [vmem:[%s10902_s2 + $0x384] sm:$0xf]  ;;  %v5018_v4 = vld [vmem:[%s10902_s2 + $0x390] sm:$0xf0]  ;;  %v4893_v8 = vor.u32 %v6829_v63, %v4890_v2 }
  0x44   :  { %1547 = vmatpush.bf16.msra.mxu0 %v4813_v27  ;;  %1513 = vmatmul.bf16.vlgmr.msrb.gmra.mxu1 %v7897_v42  ;;  %v6893_v5 = vld [vmem:[%s10902_s2 + $0x484] sm:$0xf]  ;;  %v5146_v6 = vld [vmem:[%s10902_s2 + $0x490] sm:$0xf0]  ;;  %v5021_v9 = vor.u32 %v6861_v3, %v5018_v4  ;;  %v4688_v3 = vld [vmem:[%s10902_s2 + $0xe8] sm:$0xf] }
  0x45   :  { %1561 = vmatpush.bf16.msra.mxu1 %v4941_v31  ;;  %1527 = vmatmul.bf16.vlgmr.msrb.gmra.mxu2 %v7895_v41  ;;  %v6793_v10 = vld [vmem:[%s10902_s2 + $0x164] sm:$0xf]  ;;  %v4746_v12 = vld [vmem:[%s10902_s2 + $0x170] sm:$0xf0]  ;;  %v5149_v14 = vor.u32 %v6893_v5, %v5146_v6  ;;  %v6780_v4 = vld [vmem:[%s10902_s2 + $0xf4] sm:$0xf0] }
  0x46   :  { %1575 = vmatpush.bf16.msra.mxu2 %v5069_v32  ;;  %1541 = vmatmul.bf16.vlgmr.msrb.gmra.mxu3 %v7665_v57  ;;  %v6825_v13 = vld [vmem:[%s10902_s2 + $0x264] sm:$0xf]  ;;  %v4874_v15 = vld [vmem:[%s10902_s2 + $0x270] sm:$0xf0]  ;;  %v4749_v20 = vor.u32 %v6793_v10, %v4746_v12 }
  0x47   :  { %1589 = vmatpush.bf16.msra.mxu3 %v5197_v36  ;;  %v6857_v16 = vld [vmem:[%s10902_s2 + $0x364] sm:$0xf]  ;;  %v5002_v17 = vld [vmem:[%s10902_s2 + $0x370] sm:$0xf0]  ;;  %v4877_v21 = vor.u32 %v6825_v13, %v4874_v15  ;;  %v4689_v13 = vor.u32 %v6780_v4, %v4688_v3 }
  0x48   :  { %1548 = vmatpush.bf16.msra.mxu0 %v4797_v45  ;;  %v6889_v18 = vld [vmem:[%s10902_s2 + $0x464] sm:$0xf]  ;;  %v5130_v19 = vld [vmem:[%s10902_s2 + $0x470] sm:$0xf0]  ;;  %v5005_v22 = vor.u32 %v6857_v16, %v5002_v17 }
  0x49   :  { %1562 = vmatpush.bf16.msra.mxu1 %v4925_v46  ;;  %v6789_v24 = vld [vmem:[%s10902_s2 + $0x144] sm:$0xf]  ;;  %v4730_v25 = vld [vmem:[%s10902_s2 + $0x150] sm:$0xf0]  ;;  %v5133_v27 = vor.u32 %v6889_v18, %v5130_v19  ;;  %v4672_v19 = vld [vmem:[%s10902_s2 + $0xc8] sm:$0xf] }
  0x4a   :  { %1576 = vmatpush.bf16.msra.mxu2 %v5053_v47  ;;  %v6821_v26 = vld [vmem:[%s10902_s2 + $0x244] sm:$0xf]  ;;  %v4858_v28 = vld [vmem:[%s10902_s2 + $0x250] sm:$0xf0]  ;;  %v4733_v33 = vor.u32 %v6789_v24, %v4730_v25 }
  0x4b   :  { %1590 = vmatpush.bf16.msra.mxu3 %v5181_v51  ;;  %v6853_v29 = vld [vmem:[%s10902_s2 + $0x344] sm:$0xf]  ;;  %v4986_v30 = vld [vmem:[%s10902_s2 + $0x350] sm:$0xf0]  ;;  %v4861_v34 = vor.u32 %v6821_v26, %v4858_v28 }
  0x4c   :  { %1549 = vmatpush.bf16.msra.mxu0 %v4781_v58  ;;  %v6885_v31 = vld [vmem:[%s10902_s2 + $0x444] sm:$0xf]  ;;  %v5114_v32 = vld [vmem:[%s10902_s2 + $0x450] sm:$0xf0]  ;;  %v4989_v35 = vor.u32 %v6853_v29, %v4986_v30 }
  0x4d   :  { %1563 = vmatpush.bf16.msra.mxu1 %v4909_v59  ;;  %v6785_v36 = vld [vmem:[%s10902_s2 + $0x124] sm:$0xf]  ;;  %v4714_v38 = vld [vmem:[%s10902_s2 + $0x130] sm:$0xf0]  ;;  %v5117_v40 = vor.u32 %v6885_v31, %v5114_v32  ;;  %v4656_v32 = vld [vmem:[%s10902_s2 + $0xa8] sm:$0xf] }
  0x4e   :  { %1577 = vmatpush.bf16.msra.mxu2 %v5037_v60  ;;  %v6817_v39 = vld [vmem:[%s10902_s2 + $0x224] sm:$0xf]  ;;  %v4842_v43 = vld [vmem:[%s10902_s2 + $0x230] sm:$0xf0]  ;;  %v4717_v48 = vor.u32 %v6785_v36, %v4714_v38 }
  0x4f   :  { %1591 = vmatpush.bf16.msra.mxu3 %v5165_v1  ;;  %v6849_v44 = vld [vmem:[%s10902_s2 + $0x324] sm:$0xf]  ;;  %v4970_v45 = vld [vmem:[%s10902_s2 + $0x330] sm:$0xf0]  ;;  %v4845_v51 = vor.u32 %v6817_v39, %v4842_v43 }
  0x50   :  { %1550 = vmatpush.bf16.msra.mxu0 %v4765_v7  ;;  %v6881_v46 = vld [vmem:[%s10902_s2 + $0x424] sm:$0xf]  ;;  %v5098_v47 = vld [vmem:[%s10902_s2 + $0x430] sm:$0xf0]  ;;  %v4973_v52 = vor.u32 %v6849_v44, %v4970_v45  ;;  %v4816_v7 = vld [vmem:[%s10902_s2 + $0x1e8] sm:$0xf] }
  0x51   :  { %1564 = vmatpush.bf16.msra.mxu1 %v4893_v8  ;;  %v6781_v49 = vld [vmem:[%s10902_s2 + $0x104] sm:$0xf]  ;;  %v4698_v50 = vld [vmem:[%s10902_s2 + $0x110] sm:$0xf0]  ;;  %v5101_v56 = vor.u32 %v6881_v46, %v5098_v47  ;;  %v6812_v8 = vld [vmem:[%s10902_s2 + $0x1f4] sm:$0xf0] }
  0x52   :  { %1578 = vmatpush.bf16.msra.mxu2 %v5021_v9  ;;  %v6813_v53 = vld [vmem:[%s10902_s2 + $0x204] sm:$0xf]  ;;  %v4826_v54 = vld [vmem:[%s10902_s2 + $0x210] sm:$0xf0]  ;;  %v4701_v1 = vor.u32 %v6781_v49, %v4698_v50  ;;  %v4817_v17 = vor.u32 %v6812_v8, %v4816_v7  ;;  %v4640_v47 = vld [vmem:[%s10902_s2 + $0x88] sm:$0xf] }
  0x53   :  { %1592 = vmatpush.bf16.msra.mxu3 %v5149_v14  ;;  %v6845_v55 = vld [vmem:[%s10902_s2 + $0x304] sm:$0xf]  ;;  %v4954_v58 = vld [vmem:[%s10902_s2 + $0x310] sm:$0xf0]  ;;  %v4829_v5 = vor.u32 %v6813_v53, %v4826_v54  ;;  %v4768_v49 = vld [vmem:[%s10902_s2 + $0x188] sm:$0xf] }
  0x54   :  { %1551 = vmatpush.bf16.msra.mxu0 %v4749_v20  ;;  %v6877_v59 = vld [vmem:[%s10902_s2 + $0x404] sm:$0xf]  ;;  %v5082_v60 = vld [vmem:[%s10902_s2 + $0x410] sm:$0xf0]  ;;  %v4957_v6 = vor.u32 %v6845_v55, %v4954_v58  ;;  %v6776_v20 = vld [vmem:[%s10902_s2 + $0xd4] sm:$0xf0] }
  0x55   :  { %1565 = vmatpush.bf16.msra.mxu1 %v4877_v21  ;;  %v6937_v61 = vld [vmem:[%s10902_s2 + $0x5e4] sm:$0xf]  ;;  %v5322_v62 = vld [vmem:[%s10902_s2 + $0x5f0] sm:$0xf0]  ;;  %v5085_v9 = vor.u32 %v6877_v59, %v5082_v60  ;;  %v4800_v21 = vld [vmem:[%s10902_s2 + $0x1c8] sm:$0xf]  ;;  %v4673_v26 = vor.u32 %v6776_v20, %v4672_v19 }
  0x56   :  { %1579 = vmatpush.bf16.msra.mxu2 %v5005_v22  ;;  %v6969_v63 = vld [vmem:[%s10902_s2 + $0x6e4] sm:$0xf]  ;;  %v5450_v2 = vld [vmem:[%s10902_s2 + $0x6f0] sm:$0xf0]  ;;  %v5325_v10 = vor.u32 %v6937_v61, %v5322_v62  ;;  %v6808_v22 = vld [vmem:[%s10902_s2 + $0x1d4] sm:$0xf0] }
  0x57   :  { %1593 = vmatpush.bf16.msra.mxu3 %v5133_v27  ;;  %v5453_v12 = vor.u32 %v6969_v63, %v5450_v2  ;;  %v6933_v14 = vld [vmem:[%s10902_s2 + $0x5c4] sm:$0xf]  ;;  %v5306_v15 = vld [vmem:[%s10902_s2 + $0x5d0] sm:$0xf0]  ;;  %v4801_v30 = vor.u32 %v6808_v22, %v4800_v21  ;;  %v6800_v50 = vld [vmem:[%s10902_s2 + $0x194] sm:$0xf0] }
  0x58   :  { %1552 = vmatpush.bf16.msra.mxu0 %v4733_v33  ;;  %v6965_v16 = vld [vmem:[%s10902_s2 + $0x6c4] sm:$0xf]  ;;  %v5434_v18 = vld [vmem:[%s10902_s2 + $0x6d0] sm:$0xf0]  ;;  %v5309_v24 = vor.u32 %v6933_v14, %v5306_v15  ;;  %v6772_v33 = vld [vmem:[%s10902_s2 + $0xb4] sm:$0xf0]  ;;  %v4769_v58 = vor.u32 %v6800_v50, %v4768_v49 }
  0x59   :  { %1566 = vmatpush.bf16.msra.mxu1 %v4861_v34  ;;  %v5437_v25 = vor.u32 %v6965_v16, %v5434_v18  ;;  %v6929_v27 = vld [vmem:[%s10902_s2 + $0x5a4] sm:$0xf]  ;;  %v5290_v28 = vld [vmem:[%s10902_s2 + $0x5b0] sm:$0xf0]  ;;  %v4784_v34 = vld [vmem:[%s10902_s2 + $0x1a8] sm:$0xf]  ;;  %v4657_v39 = vor.u32 %v6772_v33, %v4656_v32 }
  0x5a   :  { %1580 = vmatpush.bf16.msra.mxu2 %v4989_v35  ;;  %v6961_v29 = vld [vmem:[%s10902_s2 + $0x6a4] sm:$0xf]  ;;  %v5418_v31 = vld [vmem:[%s10902_s2 + $0x6b0] sm:$0xf0]  ;;  %v6804_v35 = vld [vmem:[%s10902_s2 + $0x1b4] sm:$0xf0]  ;;  %v5293_v36 = vor.u32 %v6929_v27, %v5290_v28 }
  0x5b   :  { %1594 = vmatpush.bf16.msra.mxu3 %v5117_v40  ;;  %v5421_v38 = vor.u32 %v6961_v29, %v5418_v31  ;;  %v6925_v40 = vld [vmem:[%s10902_s2 + $0x584] sm:$0xf]  ;;  %v5274_v43 = vld [vmem:[%s10902_s2 + $0x590] sm:$0xf0]  ;;  %v4785_v45 = vor.u32 %v6804_v35, %v4784_v34  ;;  %v4624_v60 = vld [vmem:[%s10902_s2 + $0x68] sm:$0xf] }
  0x5c   :  { %1553 = vmatpush.bf16.msra.mxu0 %v4717_v48  ;;  %v6957_v44 = vld [vmem:[%s10902_s2 + $0x684] sm:$0xf]  ;;  %v5402_v46 = vld [vmem:[%s10902_s2 + $0x690] sm:$0xf0]  ;;  %v6768_v48 = vld [vmem:[%s10902_s2 + $0x94] sm:$0xf0] }
  0x5d   :  { %1567 = vmatpush.bf16.msra.mxu1 %v4845_v51  ;;  %v5277_v51 = vor.u32 %v6925_v40, %v5274_v43  ;;  %v4641_v53 = vor.u32 %v6768_v48, %v4640_v47  ;;  %v6921_v54 = vld [vmem:[%s10902_s2 + $0x564] sm:$0xf]  ;;  %v5258_v55 = vld [vmem:[%s10902_s2 + $0x570] sm:$0xf0]  ;;  %v6764_v61 = vld [vmem:[%s10902_s2 + $0x74] sm:$0xf0] }
  0x5e   :  { %1581 = vmatpush.bf16.msra.mxu2 %v4973_v52  ;;  %v5405_v52 = vor.u32 %v6957_v44, %v5402_v46  ;;  %v5386_v59 = vld [vmem:[%s10902_s2 + $0x670] sm:$0xf0]  ;;  %v4752_v62 = vld [vmem:[%s10902_s2 + $0x168] sm:$0xf]  ;;  %v6796_v63 = vld [vmem:[%s10902_s2 + $0x174] sm:$0xf0]  ;;  %v4625_v3 = vor.u32 %v6764_v61, %v4624_v60 }
  0x5f   :  { %1595 = vmatpush.bf16.msra.mxu3 %v5101_v56  ;;  %v6953_v56 = vld [vmem:[%s10902_s2 + $0x664] sm:$0xf]  ;;  %v4753_v7 = vor.u32 %v6796_v63, %v4752_v62  ;;  %v5370_v8 = vld [vmem:[%s10902_s2 + $0x650] sm:$0xf0]  ;;  %v4592_v22 = vld [vmem:[%s10902_s2 + $0x28] sm:$0xf] }
  0x60   :  { %1554 = vmatpush.bf16.msra.mxu0 %v4701_v1  ;;  %v5261_v1 = vor.u32 %v6921_v54, %v5258_v55  ;;  %v5389_v2 = vor.u32 %v6953_v56, %v5386_v59  ;;  %v6917_v4 = vld [vmem:[%s10902_s2 + $0x544] sm:$0xf]  ;;  %v5226_v18 = vld [vmem:[%s10902_s2 + $0x530] sm:$0xf0]  ;;  %v4576_v34 = vld [vmem:[%s10902_s2 + $0x8] sm:$0xf] }
  0x61   :  { %1568 = vmatpush.bf16.msra.mxu1 %v4829_v5  ;;  %v5242_v5 = vld [vmem:[%s10902_s2 + $0x550] sm:$0xf0]  ;;  %v6945_v19 = vld [vmem:[%s10902_s2 + $0x624] sm:$0xf]  ;;  %v4944_v40 = vld [vmem:[%s10902_s2 + $0x2e8] sm:$0xf] }
  0x62   :  { %1582 = vmatpush.bf16.msra.mxu2 %v4957_v6  ;;  %v6949_v6 = vld [vmem:[%s10902_s2 + $0x644] sm:$0xf]  ;;  %v5245_v14 = vor.u32 %v6917_v4, %v5242_v5  ;;  %v5354_v21 = vld [vmem:[%s10902_s2 + $0x630] sm:$0xf0]  ;;  %v6844_v43 = vld [vmem:[%s10902_s2 + $0x2f4] sm:$0xf0] }
  0x63   :  { %1596 = vmatpush.bf16.msra.mxu3 %v5085_v9  ;;  %1555 = vmatmul.bf16.vlgmr.msra.gmra.mxu0 %v7707_v11  ;;  %v4608_v9 = vld [vmem:[%s10902_s2 + $0x48] sm:$0xf]  ;;  %v5373_v15 = vor.u32 %v6949_v6, %v5370_v8  ;;  %v6909_v28 = vld [vmem:[%s10902_s2 + $0x504] sm:$0xf]  ;;  %v5210_v29 = vld [vmem:[%s10902_s2 + $0x510] sm:$0xf0]  ;;  %v4945_v54 = vor.u32 %v6844_v43, %v4944_v40 }
  0x64   :  { %1603 = vmatpush.bf16.msrb.mxu0 %v5325_v10  ;;  %1569 = vmatmul.bf16.vlgmr.msra.gmra.mxu1 %v7679_v0  ;;  %v6760_v10 = vld [vmem:[%s10902_s2 + $0x54] sm:$0xf0]  ;;  %v6941_v32 = vld [vmem:[%s10902_s2 + $0x604] sm:$0xf]  ;;  %v5338_v33 = vld [vmem:[%s10902_s2 + $0x610] sm:$0xf0] }
  0x65   :  { %1617 = vmatpush.bf16.msrb.mxu1 %v5453_v12  ;;  %1583 = vmatmul.bf16.vlgmr.msra.gmra.mxu2 %v7734_v23  ;;  %v4736_v12 = vld [vmem:[%s10902_s2 + $0x148] sm:$0xf]  ;;  %v4609_v16 = vor.u32 %v6760_v10, %v4608_v9  ;;  %v6876_v46 = vld [vmem:[%s10902_s2 + $0x3f4] sm:$0xf0]  ;;  %v5341_v49 = vor.u32 %v6941_v32, %v5338_v33 }
  0x66   :  { %1631 = vmatpush.bf16.msrb.mxu2 %v4689_v13  ;;  %1597 = vmatmul.bf16.vlgmr.msra.gmra.mxu3 %v7884_v37  ;;  %v6792_v13 = vld [vmem:[%s10902_s2 + $0x154] sm:$0xf0]  ;;  %v5072_v44 = vld [vmem:[%s10902_s2 + $0x3e8] sm:$0xf] }
  0x67   :  { %1645 = vmatpush.bf16.msrb.mxu3 %v4817_v17  ;;  %v6913_v17 = vld [vmem:[%s10902_s2 + $0x524] sm:$0xf]  ;;  %v4737_v20 = vor.u32 %v6792_v13, %v4736_v12  ;;  %v5200_v47 = vld [vmem:[%s10902_s2 + $0x4e8] sm:$0xf]  ;;  %v6908_v48 = vld [vmem:[%s10902_s2 + $0x4f4] sm:$0xf0]  ;;  %v5073_v55 = vor.u32 %v6876_v46, %v5072_v44 }
  0x68   :  { %1604 = vmatpush.bf16.msrb.mxu0 %v5309_v24  ;;  %v6756_v24 = vld [vmem:[%s10902_s2 + $0x34] sm:$0xf0]  ;;  %v5229_v27 = vor.u32 %v6913_v17, %v5226_v18  ;;  %v5201_v56 = vor.u32 %v6908_v48, %v5200_v47  ;;  %v5056_v60 = vld [vmem:[%s10902_s2 + $0x3c8] sm:$0xf] }
  0x69   :  { %1618 = vmatpush.bf16.msrb.mxu1 %v5437_v25  ;;  %v4720_v25 = vld [vmem:[%s10902_s2 + $0x128] sm:$0xf]  ;;  %v4593_v31 = vor.u32 %v6756_v24, %v4592_v22  ;;  %v6840_v59 = vld [vmem:[%s10902_s2 + $0x2d4] sm:$0xf0] }
  0x6a   :  { %1632 = vmatpush.bf16.msrb.mxu2 %v4673_v26  ;;  %v6788_v26 = vld [vmem:[%s10902_s2 + $0x134] sm:$0xf0]  ;;  %v5184_v63 = vld [vmem:[%s10902_s2 + $0x4c8] sm:$0xf] }
  0x6b   :  { %1646 = vmatpush.bf16.msrb.mxu3 %v4801_v30  ;;  %v5357_v30 = vor.u32 %v6945_v19, %v5354_v21  ;;  %v4721_v35 = vor.u32 %v6788_v26, %v4720_v25  ;;  %v6872_v62 = vld [vmem:[%s10902_s2 + $0x3d4] sm:$0xf0]  ;;  %v5040_v9 = vld [vmem:[%s10902_s2 + $0x3a8] sm:$0xf] }
  0x6c   :  { %1605 = vmatpush.bf16.msrb.mxu0 %v5293_v36  ;;  %v6752_v36 = vld [vmem:[%s10902_s2 + $0x14] sm:$0xf0]  ;;  %v5057_v5 = vor.u32 %v6872_v62, %v5056_v60  ;;  %v5168_v13 = vld [vmem:[%s10902_s2 + $0x4a8] sm:$0xf] }
  0x6d   :  { %1619 = vmatpush.bf16.msrb.mxu1 %v5421_v38  ;;  %v4704_v38 = vld [vmem:[%s10902_s2 + $0x108] sm:$0xf]  ;;  %v4577_v50 = vor.u32 %v6752_v36, %v4576_v34  ;;  %v6836_v8 = vld [vmem:[%s10902_s2 + $0x2b4] sm:$0xf0] }
  0x6e   :  { %1633 = vmatpush.bf16.msrb.mxu2 %v4657_v39  ;;  %v6784_v39 = vld [vmem:[%s10902_s2 + $0x114] sm:$0xf0]  ;;  %v5024_v22 = vld [vmem:[%s10902_s2 + $0x388] sm:$0xf] }
  0x6f   :  { %1647 = vmatpush.bf16.msrb.mxu3 %v4785_v45  ;;  %v5213_v45 = vor.u32 %v6909_v28, %v5210_v29  ;;  %v6868_v12 = vld [vmem:[%s10902_s2 + $0x3b4] sm:$0xf0]  ;;  %v5152_v26 = vld [vmem:[%s10902_s2 + $0x488] sm:$0xf] }
  0x70   :  { %1606 = vmatpush.bf16.msrb.mxu0 %v5277_v51  ;;  %v5328_v51 = vld [vmem:[%s10902_s2 + $0x5e8] sm:$0xf]  ;;  %v5041_v18 = vor.u32 %v6868_v12, %v5040_v9  ;;  %v6832_v21 = vld [vmem:[%s10902_s2 + $0x294] sm:$0xf0] }
  0x71   :  { %1620 = vmatpush.bf16.msrb.mxu1 %v5405_v52  ;;  %v6940_v52 = vld [vmem:[%s10902_s2 + $0x5f4] sm:$0xf0]  ;;  %v5280_v28 = vld [vmem:[%s10902_s2 + $0x588] sm:$0xf] }
  0x72   :  { %1634 = vmatpush.bf16.msrb.mxu2 %v4641_v53  ;;  %v4705_v53 = vor.u32 %v6784_v39, %v4704_v38  ;;  %v5329_v61 = vor.u32 %v6940_v52, %v5328_v51  ;;  %v6864_v25 = vld [vmem:[%s10902_s2 + $0x394] sm:$0xf0]  ;;  %v4880_v33 = vld [vmem:[%s10902_s2 + $0x268] sm:$0xf] }
  0x73   :  { %1648 = vmatpush.bf16.msrb.mxu3 %v4769_v58  ;;  %v4928_v58 = vld [vmem:[%s10902_s2 + $0x2c8] sm:$0xf]  ;;  %v6928_v29 = vld [vmem:[%s10902_s2 + $0x594] sm:$0xf0] }
  0x74   :  { %1607 = vmatpush.bf16.msrb.mxu0 %v5261_v1  ;;  %v6904_v1 = vld [vmem:[%s10902_s2 + $0x4d4] sm:$0xf0]  ;;  %v4929_v4 = vor.u32 %v6840_v59, %v4928_v58  ;;  %v5281_v36 = vor.u32 %v6928_v29, %v5280_v28  ;;  %v5136_v39 = vld [vmem:[%s10902_s2 + $0x468] sm:$0xf] }
  0x75   :  { %1621 = vmatpush.bf16.msrb.mxu1 %v5389_v2  ;;  %v5312_v2 = vld [vmem:[%s10902_s2 + $0x5c8] sm:$0xf]  ;;  %v5185_v6 = vor.u32 %v6904_v1, %v5184_v63  ;;  %v6828_v34 = vld [vmem:[%s10902_s2 + $0x274] sm:$0xf0] }
  0x76   :  { %1635 = vmatpush.bf16.msrb.mxu2 %v4625_v3  ;;  %v6936_v3 = vld [vmem:[%s10902_s2 + $0x5d4] sm:$0xf0]  ;;  %v5264_v43 = vld [vmem:[%s10902_s2 + $0x568] sm:$0xf] }
  0x77   :  { %1649 = vmatpush.bf16.msrb.mxu3 %v4753_v7  ;;  %v4912_v7 = vld [vmem:[%s10902_s2 + $0x2a8] sm:$0xf]  ;;  %v5313_v10 = vor.u32 %v6936_v3, %v5312_v2  ;;  %v6860_v38 = vld [vmem:[%s10902_s2 + $0x374] sm:$0xf0] }
  0x78   :  { %1608 = vmatpush.bf16.msrb.mxu0 %v5245_v14  ;;  %v6900_v14 = vld [vmem:[%s10902_s2 + $0x4b4] sm:$0xf0]  ;;  %v4913_v17 = vor.u32 %v6836_v8, %v4912_v7  ;;  %v4864_v48 = vld [vmem:[%s10902_s2 + $0x248] sm:$0xf] }
  0x79   :  { %1622 = vmatpush.bf16.msrb.mxu1 %v5373_v15  ;;  %v5296_v15 = vld [vmem:[%s10902_s2 + $0x5a8] sm:$0xf]  ;;  %v5169_v19 = vor.u32 %v6900_v14, %v5168_v13  ;;  %v6892_v40 = vld [vmem:[%s10902_s2 + $0x474] sm:$0xf0] }
  0x7a   :  { %1636 = vmatpush.bf16.msrb.mxu2 %v4609_v16  ;;  %v6932_v16 = vld [vmem:[%s10902_s2 + $0x5b4] sm:$0xf0]  ;;  %v5137_v47 = vor.u32 %v6892_v40, %v5136_v39  ;;  %v4976_v63 = vld [vmem:[%s10902_s2 + $0x328] sm:$0xf]  ;;  %v6774_v39 = vld [vmem:[%s10902_s2 + $0xcc] sm:$0xf] }
  0x7b   :  { %1650 = vmatpush.bf16.msrb.mxu3 %v4737_v20  ;;  %v4896_v20 = vld [vmem:[%s10902_s2 + $0x288] sm:$0xf]  ;;  %v5297_v24 = vor.u32 %v6932_v16, %v5296_v15  ;;  %v6924_v44 = vld [vmem:[%s10902_s2 + $0x574] sm:$0xf0] }
  0x7c   :  { %1609 = vmatpush.bf16.msrb.mxu0 %v5229_v27  ;;  %v6896_v27 = vld [vmem:[%s10902_s2 + $0x494] sm:$0xf0]  ;;  %v5265_v51 = vor.u32 %v6924_v44, %v5264_v43  ;;  %v5104_v3 = vld [vmem:[%s10902_s2 + $0x428] sm:$0xf]  ;;  %v4674_v43 = vld [vmem:[%s10902_s2 + $0xd8] sm:$0xf0] }
  0x7d   :  { %1623 = vmatpush.bf16.msrb.mxu1 %v5357_v30  ;;  %v4897_v30 = vor.u32 %v6832_v21, %v4896_v20  ;;  %v5153_v32 = vor.u32 %v6896_v27, %v5152_v26  ;;  %v6856_v52 = vld [vmem:[%s10902_s2 + $0x354] sm:$0xf0]  ;;  %v4832_v8 = vld [vmem:[%s10902_s2 + $0x208] sm:$0xf]  ;;  %v6810_v26 = vld [vmem:[%s10902_s2 + $0x1ec] sm:$0xf] }
  0x7e   :  { %1637 = vmatpush.bf16.msrb.mxu2 %v4593_v31  ;;  %v5025_v31 = vor.u32 %v6864_v25, %v5024_v22  ;;  %v6820_v62 = vld [vmem:[%s10902_s2 + $0x234] sm:$0xf0]  ;;  %v4960_v13 = vld [vmem:[%s10902_s2 + $0x308] sm:$0xf]  ;;  %v6778_v22 = vld [vmem:[%s10902_s2 + $0xec] sm:$0xf] }
  0x7f   :  { %1651 = vmatpush.bf16.msrb.mxu3 %v4721_v35  ;;  %v5008_v35 = vld [vmem:[%s10902_s2 + $0x368] sm:$0xf]  ;;  %v6852_v2 = vld [vmem:[%s10902_s2 + $0x334] sm:$0xf0]  ;;  %v4690_v25 = vld [vmem:[%s10902_s2 + $0xf8] sm:$0xf0] }
  0x80   :  { %1610 = vmatpush.bf16.msrb.mxu0 %v5213_v45  ;;  %v4881_v45 = vor.u32 %v6828_v34, %v4880_v33  ;;  %v5009_v46 = vor.u32 %v6860_v38, %v5008_v35  ;;  %v6816_v9 = vld [vmem:[%s10902_s2 + $0x214] sm:$0xf0]  ;;  %v5088_v15 = vld [vmem:[%s10902_s2 + $0x408] sm:$0xf]  ;;  %v4818_v27 = vld [vmem:[%s10902_s2 + $0x1f8] sm:$0xf0]  ;;  %v4693_v34 = vor.u32 %v6778_v22, %v4690_v25 }
  0x81   :  { %1624 = vmatpush.bf16.msrb.mxu1 %v5341_v49  ;;  %v6824_v49 = vld [vmem:[%s10902_s2 + $0x254] sm:$0xf0]  ;;  %v5456_v20 = vld [vmem:[%s10902_s2 + $0x6e8] sm:$0xf]  ;;  %v4821_v35 = vor.u32 %v6810_v26, %v4818_v27  ;;  %v6806_v44 = vld [vmem:[%s10902_s2 + $0x1cc] sm:$0xf] }
  0x82   :  { %1638 = vmatpush.bf16.msrb.mxu2 %v4577_v50  ;;  %v4992_v50 = vld [vmem:[%s10902_s2 + $0x348] sm:$0xf]  ;;  %v4865_v58 = vor.u32 %v6824_v49, %v4864_v48  ;;  %v6848_v14 = vld [vmem:[%s10902_s2 + $0x314] sm:$0xf0]  ;;  %v4677_v49 = vor.u32 %v6774_v39, %v4674_v43  ;;  %v4882_v22 = vld [vmem:[%s10902_s2 + $0x278] sm:$0xf0] }
  0x83   :  { %1652 = vmatpush.bf16.msrb.mxu3 %v4705_v53  ;;  %1611 = vmatmul.bf16.vlgmr.msrb.gmra.mxu0 %v7897_v42  ;;  %v5120_v53 = vld [vmem:[%s10902_s2 + $0x448] sm:$0xf]  ;;  %v4993_v59 = vor.u32 %v6856_v52, %v4992_v50  ;;  %v6972_v21 = vld [vmem:[%s10902_s2 + $0x6f4] sm:$0xf0]  ;;  %v4961_v28 = vor.u32 %v6848_v14, %v4960_v13 }
  0x84   :  { %1659 = vmatpush.bf16.msra.mxu0 %v4945_v54  ;;  %1625 = vmatmul.bf16.vlgmr.msrb.gmra.mxu1 %v7895_v41  ;;  %v6888_v54 = vld [vmem:[%s10902_s2 + $0x454] sm:$0xf0]  ;;  %v5457_v33 = vor.u32 %v6972_v21, %v5456_v20  ;;  %v5392_v14 = vld [vmem:[%s10902_s2 + $0x668] sm:$0xf]  ;;  %v4754_v20 = vld [vmem:[%s10902_s2 + $0x178] sm:$0xf0] }
  0x85   :  { %1673 = vmatpush.bf16.msra.mxu1 %v5073_v55  ;;  %1639 = vmatmul.bf16.vlgmr.msrb.gmra.mxu2 %v7665_v57  ;;  %v5248_v55 = vld [vmem:[%s10902_s2 + $0x548] sm:$0xf]  ;;  %v5121_v60 = vor.u32 %v6888_v54, %v5120_v53  ;;  %v6968_v38 = vld [vmem:[%s10902_s2 + $0x6d4] sm:$0xf0]  ;;  %v6770_v53 = vld [vmem:[%s10902_s2 + $0xac] sm:$0xf] }
  0x86   :  { %1687 = vmatpush.bf16.msra.mxu2 %v5201_v56  ;;  %1653 = vmatmul.bf16.vlgmr.msrb.gmra.mxu3 %v7707_v11  ;;  %v6920_v56 = vld [vmem:[%s10902_s2 + $0x554] sm:$0xf0]  ;;  %v6826_v21 = vld [vmem:[%s10902_s2 + $0x26c] sm:$0xf]  ;;  %v5376_v27 = vld [vmem:[%s10902_s2 + $0x648] sm:$0xf] }
  0x87   :  { %1701 = vmatpush.bf16.msra.mxu3 %v5329_v61  ;;  %v4848_v61 = vld [vmem:[%s10902_s2 + $0x228] sm:$0xf]  ;;  %v5249_v1 = vor.u32 %v6920_v56, %v5248_v55  ;;  %v6964_v52 = vld [vmem:[%s10902_s2 + $0x6b4] sm:$0xf0]  ;;  %v4658_v55 = vld [vmem:[%s10902_s2 + $0xb8] sm:$0xf0] }
  0x88   :  { %1660 = vmatpush.bf16.msra.mxu0 %v4929_v4  ;;  %v6884_v4 = vld [vmem:[%s10902_s2 + $0x434] sm:$0xf0]  ;;  %v4849_v7 = vor.u32 %v6820_v62, %v4848_v61  ;;  %v6802_v56 = vld [vmem:[%s10902_s2 + $0x1ac] sm:$0xf]  ;;  %v4661_v62 = vor.u32 %v6770_v53, %v4658_v55 }
  0x89   :  { %1674 = vmatpush.bf16.msra.mxu1 %v5057_v5  ;;  %v5232_v5 = vld [vmem:[%s10902_s2 + $0x528] sm:$0xf]  ;;  %v5105_v12 = vor.u32 %v6884_v4, %v5104_v3  ;;  %v6766_v3 = vld [vmem:[%s10902_s2 + $0x8c] sm:$0xf]  ;;  %v6948_v43 = vld [vmem:[%s10902_s2 + $0x634] sm:$0xf0] }
  0x8a   :  { %1688 = vmatpush.bf16.msra.mxu2 %v5185_v6  ;;  %v6916_v6 = vld [vmem:[%s10902_s2 + $0x534] sm:$0xf0] }
  0x8b   :  { %1702 = vmatpush.bf16.msra.mxu3 %v5313_v10  ;;  %v4977_v10 = vor.u32 %v6852_v2, %v4976_v63  ;;  %v5233_v16 = vor.u32 %v6916_v6, %v5232_v5  ;;  %v6960_v2 = vld [vmem:[%s10902_s2 + $0x694] sm:$0xf0]  ;;  %v4642_v5 = vld [vmem:[%s10902_s2 + $0x98] sm:$0xf0]  ;;  %v6798_v6 = vld [vmem:[%s10902_s2 + $0x18c] sm:$0xf] }
  0x8c   :  { %1661 = vmatpush.bf16.msra.mxu0 %v4913_v17  ;;  %v6880_v17 = vld [vmem:[%s10902_s2 + $0x414] sm:$0xf0] }
  0x8d   :  { %1675 = vmatpush.bf16.msra.mxu1 %v5041_v18  ;;  %v5216_v18 = vld [vmem:[%s10902_s2 + $0x508] sm:$0xf]  ;;  %v5089_v29 = vor.u32 %v6880_v17, %v5088_v15  ;;  %v6956_v15 = vld [vmem:[%s10902_s2 + $0x674] sm:$0xf0] }
  0x8e   :  { %1689 = vmatpush.bf16.msra.mxu2 %v5169_v19  ;;  %v6912_v19 = vld [vmem:[%s10902_s2 + $0x514] sm:$0xf0] }
  0x8f   :  { %1703 = vmatpush.bf16.msra.mxu3 %v5297_v24  ;;  %v4833_v24 = vor.u32 %v6816_v9, %v4832_v8  ;;  %v6830_v8 = vld [vmem:[%s10902_s2 + $0x28c] sm:$0xf]  ;;  %v4898_v9 = vld [vmem:[%s10902_s2 + $0x298] sm:$0xf0]  ;;  %v6944_v53 = vld [vmem:[%s10902_s2 + $0x614] sm:$0xf0] }
  0x90   :  { %1662 = vmatpush.bf16.msra.mxu0 %v4897_v30  ;;  %v6842_v30 = vld [vmem:[%s10902_s2 + $0x2ec] sm:$0xf]  ;;  %v4901_v17 = vor.u32 %v6830_v8, %v4898_v9 }
  0x91   :  { %1676 = vmatpush.bf16.msra.mxu1 %v5025_v31  ;;  %v4946_v31 = vld [vmem:[%s10902_s2 + $0x2f8] sm:$0xf0] }
  0x92   :  { %1690 = vmatpush.bf16.msra.mxu2 %v5153_v32  ;;  %v5217_v32 = vor.u32 %v6912_v19, %v5216_v18  ;;  %v4949_v40 = vor.u32 %v6842_v30, %v4946_v31  ;;  %v4626_v18 = vld [vmem:[%s10902_s2 + $0x78] sm:$0xf0]  ;;  %v6794_v19 = vld [vmem:[%s10902_s2 + $0x16c] sm:$0xf]  ;;  %v4885_v30 = vor.u32 %v6826_v21, %v4882_v22 }
  0x93   :  { %1704 = vmatpush.bf16.msra.mxu3 %v5281_v36  ;;  %v5440_v36 = vld [vmem:[%s10902_s2 + $0x6c8] sm:$0xf]  ;;  %v4757_v26 = vor.u32 %v6794_v19, %v4754_v20  ;;  %v4610_v31 = vld [vmem:[%s10902_s2 + $0x58] sm:$0xf0]  ;;  %v6902_v19 = vld [vmem:[%s10902_s2 + $0x4cc] sm:$0xf] }
  0x94   :  { %1663 = vmatpush.bf16.msra.mxu0 %v4881_v45  ;;  %v4802_v45 = vld [vmem:[%s10902_s2 + $0x1d8] sm:$0xf0]  ;;  %v5441_v48 = vor.u32 %v6968_v38, %v5440_v36  ;;  %v6934_v22 = vld [vmem:[%s10902_s2 + $0x5cc] sm:$0xf] }
  0x95   :  { %1677 = vmatpush.bf16.msra.mxu1 %v5009_v46  ;;  %v6838_v46 = vld [vmem:[%s10902_s2 + $0x2cc] sm:$0xf]  ;;  %v4805_v50 = vor.u32 %v6806_v44, %v4802_v45  ;;  %v5186_v21 = vld [vmem:[%s10902_s2 + $0x4d8] sm:$0xf0] }
  0x96   :  { %1691 = vmatpush.bf16.msra.mxu2 %v5137_v47  ;;  %v4930_v47 = vld [vmem:[%s10902_s2 + $0x2d8] sm:$0xf0]  ;;  %v6754_v44 = vld [vmem:[%s10902_s2 + $0x2c] sm:$0xf] }
  0x97   :  { %1705 = vmatpush.bf16.msra.mxu3 %v5265_v51  ;;  %v5424_v51 = vld [vmem:[%s10902_s2 + $0x6a8] sm:$0xf]  ;;  %v4933_v54 = vor.u32 %v6838_v46, %v4930_v47  ;;  %v4594_v46 = vld [vmem:[%s10902_s2 + $0x38] sm:$0xf0]  ;;  %v6786_v47 = vld [vmem:[%s10902_s2 + $0x12c] sm:$0xf] }
  0x98   :  { %1664 = vmatpush.bf16.msra.mxu0 %v4865_v58  ;;  %v4786_v58 = vld [vmem:[%s10902_s2 + $0x1b8] sm:$0xf0]  ;;  %v5425_v61 = vor.u32 %v6964_v52, %v5424_v51  ;;  %v5344_v52 = vld [vmem:[%s10902_s2 + $0x608] sm:$0xf] }
  0x99   :  { %1678 = vmatpush.bf16.msra.mxu1 %v4993_v59  ;;  %v6834_v59 = vld [vmem:[%s10902_s2 + $0x2ac] sm:$0xf]  ;;  %v4789_v63 = vor.u32 %v6802_v56, %v4786_v58  ;;  %v4578_v58 = vld [vmem:[%s10902_s2 + $0x18] sm:$0xf0] }
  0x9a   :  { %1692 = vmatpush.bf16.msra.mxu2 %v5121_v60  ;;  %v4914_v60 = vld [vmem:[%s10902_s2 + $0x2b8] sm:$0xf0]  ;;  %v6750_v56 = vld [vmem:[%s10902_s2 + $0xc] sm:$0xf] }
  0x9b   :  { %1706 = vmatpush.bf16.msra.mxu3 %v5249_v1  ;;  %v5408_v1 = vld [vmem:[%s10902_s2 + $0x688] sm:$0xf]  ;;  %v4917_v4 = vor.u32 %v6834_v59, %v4914_v60  ;;  %v6782_v59 = vld [vmem:[%s10902_s2 + $0x10c] sm:$0xf]  ;;  %v4581_v8 = vor.u32 %v6750_v56, %v4578_v58 }
  0x9c   :  { %1665 = vmatpush.bf16.msra.mxu0 %v4849_v7  ;;  %v4770_v7 = vld [vmem:[%s10902_s2 + $0x198] sm:$0xf0]  ;;  %v6890_v56 = vld [vmem:[%s10902_s2 + $0x46c] sm:$0xf] }
  0x9d   :  { %1679 = vmatpush.bf16.msra.mxu1 %v4977_v10  ;;  %v5409_v10 = vor.u32 %v6960_v2, %v5408_v1  ;;  %v4773_v13 = vor.u32 %v6798_v6, %v4770_v7  ;;  %v6874_v1 = vld [vmem:[%s10902_s2 + $0x3ec] sm:$0xf]  ;;  %v5074_v2 = vld [vmem:[%s10902_s2 + $0x3f8] sm:$0xf0] }
  0x9e   :  { %1693 = vmatpush.bf16.msra.mxu2 %v5105_v12  ;;  %v4645_v12 = vor.u32 %v6766_v3, %v4642_v5  ;;  %v6906_v3 = vld [vmem:[%s10902_s2 + $0x4ec] sm:$0xf]  ;;  %v5202_v5 = vld [vmem:[%s10902_s2 + $0x4f8] sm:$0xf0] }
  0x9f   :  { %1707 = vmatpush.bf16.msra.mxu3 %v5233_v16  ;;  %v6762_v16 = vld [vmem:[%s10902_s2 + $0x6c] sm:$0xf]  ;;  %v5330_v7 = vld [vmem:[%s10902_s2 + $0x5f8] sm:$0xf0] }
  0xa0   :  { %1666 = vmatpush.bf16.msra.mxu0 %v4833_v24  ;;  %v5393_v24 = vor.u32 %v6956_v15, %v5392_v14  ;;  %v4629_v25 = vor.u32 %v6762_v16, %v4626_v18  ;;  %v6938_v6 = vld [vmem:[%s10902_s2 + $0x5ec] sm:$0xf]  ;;  %v5077_v14 = vor.u32 %v6874_v1, %v5074_v2  ;;  %v5205_v15 = vor.u32 %v6906_v3, %v5202_v5  ;;  %v5058_v18 = vld [vmem:[%s10902_s2 + $0x3d8] sm:$0xf0] }
  0xa1   :  { %1680 = vmatpush.bf16.msra.mxu1 %v4961_v28  ;;  %v6952_v28 = vld [vmem:[%s10902_s2 + $0x654] sm:$0xf0]  ;;  %v5333_v16 = vor.u32 %v6938_v6, %v5330_v7  ;;  %v5394_v1 = vld [vmem:[%s10902_s2 + $0x678] sm:$0xf0]  ;;  %v6854_v6 = vld [vmem:[%s10902_s2 + $0x34c] sm:$0xf] }
  0xa2   :  { %1694 = vmatpush.bf16.msra.mxu2 %v5089_v29  ;;  %v6758_v29 = vld [vmem:[%s10902_s2 + $0x4c] sm:$0xf]  ;;  %v5377_v36 = vor.u32 %v6952_v28, %v5376_v27  ;;  %v5189_v28 = vor.u32 %v6902_v19, %v5186_v21  ;;  %v4994_v7 = vld [vmem:[%s10902_s2 + $0x358] sm:$0xf0] }
  0xa3   :  { %1708 = vmatpush.bf16.msra.mxu3 %v5217_v32  ;;  %1667 = vmatmul.bf16.vlgmr.msra.gmra.mxu0 %v7679_v0  ;;  %v6790_v32 = vld [vmem:[%s10902_s2 + $0x14c] sm:$0xf]  ;;  %v4613_v38 = vor.u32 %v6758_v29, %v4610_v31  ;;  %v5042_v31 = vld [vmem:[%s10902_s2 + $0x3b8] sm:$0xf0] }
  0xa4   :  { %1715 = vmatpush.bf16.msrb.mxu0 %v5457_v33  ;;  %1681 = vmatmul.bf16.vlgmr.msra.gmra.mxu1 %v7734_v23  ;;  %v4738_v33 = vld [vmem:[%s10902_s2 + $0x158] sm:$0xf0]  ;;  %v6850_v19 = vld [vmem:[%s10902_s2 + $0x32c] sm:$0xf] }
  0xa5   :  { %1729 = vmatpush.bf16.msrb.mxu1 %v4693_v34  ;;  %1695 = vmatmul.bf16.vlgmr.msra.gmra.mxu2 %v7884_v37  ;;  %v6822_v34 = vld [vmem:[%s10902_s2 + $0x24c] sm:$0xf]  ;;  %v4741_v39 = vor.u32 %v6790_v32, %v4738_v33 }
  0xa6   :  { %1743 = vmatpush.bf16.msrb.mxu2 %v4821_v35  ;;  %1709 = vmatmul.bf16.vlgmr.msra.gmra.mxu3 %v7897_v42  ;;  %v4866_v35 = vld [vmem:[%s10902_s2 + $0x258] sm:$0xf0]  ;;  %v6898_v32 = vld [vmem:[%s10902_s2 + $0x4ac] sm:$0xf] }
  0xa7   :  { %1757 = vmatpush.bf16.msrb.mxu3 %v4949_v40  ;;  %v5360_v40 = vld [vmem:[%s10902_s2 + $0x628] sm:$0xf]  ;;  %v4869_v45 = vor.u32 %v6822_v34, %v4866_v35  ;;  %v5170_v34 = vld [vmem:[%s10902_s2 + $0x4b8] sm:$0xf0]  ;;  %v6930_v35 = vld [vmem:[%s10902_s2 + $0x5ac] sm:$0xf] }
  0xa8   :  { %1716 = vmatpush.bf16.msrb.mxu0 %v5441_v48  ;;  %v4722_v48 = vld [vmem:[%s10902_s2 + $0x138] sm:$0xf0]  ;;  %v5361_v51 = vor.u32 %v6948_v43, %v5360_v40  ;;  %v5173_v43 = vor.u32 %v6898_v32, %v5170_v34  ;;  %v6882_v21 = vld [vmem:[%s10902_s2 + $0x42c] sm:$0xf] }
  0xa9   :  { %1730 = vmatpush.bf16.msrb.mxu1 %v4677_v49  ;;  %v6818_v49 = vld [vmem:[%s10902_s2 + $0x22c] sm:$0xf]  ;;  %v4725_v55 = vor.u32 %v6786_v47, %v4722_v48  ;;  %v5282_v48 = vld [vmem:[%s10902_s2 + $0x598] sm:$0xf0] }
  0xaa   :  { %1744 = vmatpush.bf16.msrb.mxu2 %v4805_v50  ;;  %v4850_v50 = vld [vmem:[%s10902_s2 + $0x238] sm:$0xf0]  ;;  %v6926_v47 = vld [vmem:[%s10902_s2 + $0x58c] sm:$0xf] }
  0xab   :  { %1758 = vmatpush.bf16.msrb.mxu3 %v4933_v54  ;;  %v4597_v54 = vor.u32 %v6754_v44, %v4594_v46  ;;  %v4853_v60 = vor.u32 %v6818_v49, %v4850_v50  ;;  %v6958_v49 = vld [vmem:[%s10902_s2 + $0x68c] sm:$0xf]  ;;  %v5410_v50 = vld [vmem:[%s10902_s2 + $0x698] sm:$0xf0]  ;;  %v8767_v2 = vpop.f32.mrf.mxu1 }
  0xac   :  { %1717 = vmatpush.bf16.msrb.mxu0 %v5425_v61  ;;  %v4706_v61 = vld [vmem:[%s10902_s2 + $0x118] sm:$0xf0]  ;;  %v5413_v58 = vor.u32 %v6958_v49, %v5410_v50  ;;  %v6846_v32 = vld [vmem:[%s10902_s2 + $0x30c] sm:$0xf]  ;;  %v5584_v49 = vld [vmem:[%s10905_s4 + $0xf0] sm:$0xf] }
  0xad   :  { %1731 = vmatpush.bf16.msrb.mxu1 %v4661_v62  ;;  %v6814_v62 = vld [vmem:[%s10902_s2 + $0x20c] sm:$0xf]  ;;  %v4709_v9 = vor.u32 %v6782_v59, %v4706_v61  ;;  %v5138_v59 = vld [vmem:[%s10902_s2 + $0x478] sm:$0xf0]  ;;  %v7004_v50 = vld [vmem:[%s10905_s4 + $0xf4] sm:$0xf0] }
  0xae   :  { %1745 = vmatpush.bf16.msrb.mxu2 %v4789_v63  ;;  %v4834_v63 = vld [vmem:[%s10902_s2 + $0x218] sm:$0xf0] }
  0xaf   :  { %1759 = vmatpush.bf16.msrb.mxu3 %v4917_v4  ;;  %v5345_v4 = vor.u32 %v6944_v53, %v5344_v52  ;;  %v5285_v53 = vor.u32 %v6926_v47, %v5282_v48  ;;  %v5266_v61 = vld [vmem:[%s10902_s2 + $0x578] sm:$0xf0]  ;;  %v6988_v47 = vld [vmem:[%s10905_s4 + $0x74] sm:$0xf0] }
  0xb0   :  { %1718 = vmatpush.bf16.msrb.mxu0 %v5409_v10  ;;  %v6970_v10 = vld [vmem:[%s10902_s2 + $0x6ec] sm:$0xf] }
  0xb1   :  { %1732 = vmatpush.bf16.msrb.mxu1 %v4645_v12  ;;  %v5458_v12 = vld [vmem:[%s10902_s2 + $0x6f8] sm:$0xf0] }
  0xb2   :  { %1746 = vmatpush.bf16.msrb.mxu2 %v4773_v13  ;;  %v4837_v13 = vor.u32 %v6814_v62, %v4834_v63  ;;  %v5461_v20 = vor.u32 %v6970_v10, %v5458_v12  ;;  %v8759_v62 = vpop.f32.mrf.mxu0  ;;  %v6954_v63 = vld [vmem:[%s10902_s2 + $0x66c] sm:$0xf]  ;;  %v5122_v10 = vld [vmem:[%s10902_s2 + $0x458] sm:$0xf0] }
  0xb3   :  { %1760 = vmatpush.bf16.msrb.mxu3 %v4901_v17  ;;  %v6870_v17 = vld [vmem:[%s10902_s2 + $0x3cc] sm:$0xf] }
  0xb4   :  { %1719 = vmatpush.bf16.msrb.mxu0 %v5393_v24  ;;  %v5314_v24 = vld [vmem:[%s10902_s2 + $0x5d8] sm:$0xf0]  ;;  %v5061_v27 = vor.u32 %v6870_v17, %v5058_v18  ;;  %v6918_v12 = vld [vmem:[%s10902_s2 + $0x54c] sm:$0xf] }
  0xb5   :  { %1733 = vmatpush.bf16.msrb.mxu1 %v4629_v25  ;;  %v6966_v25 = vld [vmem:[%s10902_s2 + $0x6cc] sm:$0xf]  ;;  %v5317_v29 = vor.u32 %v6934_v22, %v5314_v24  ;;  %v8802_v22 = vpop.f32.mrf.mxu2 }
  0xb6   :  { %1747 = vmatpush.bf16.msrb.mxu2 %v4757_v26  ;;  %v5442_v26 = vld [vmem:[%s10902_s2 + $0x6d8] sm:$0xf0] }
  0xb7   :  { %1761 = vmatpush.bf16.msrb.mxu3 %v4885_v30  ;;  %v6866_v30 = vld [vmem:[%s10902_s2 + $0x3ac] sm:$0xf]  ;;  %v5445_v33 = vor.u32 %v6966_v25, %v5442_v26  ;;  %v5106_v25 = vld [vmem:[%s10902_s2 + $0x438] sm:$0xf0] }
  0xb8   :  { %1720 = vmatpush.bf16.msrb.mxu0 %v5377_v36  ;;  %v5298_v36 = vld [vmem:[%s10902_s2 + $0x5b8] sm:$0xf0]  ;;  %v5045_v40 = vor.u32 %v6866_v30, %v5042_v31  ;;  %v6914_v26 = vld [vmem:[%s10902_s2 + $0x52c] sm:$0xf]  ;;  %v8822_v30 = vld [vmem:[%s10904_s3] sm:$0xf]  ;;  %v5109_v34 = vor.u32 %v6882_v21, %v5106_v25 }
  0xb9   :  { %1734 = vmatpush.bf16.msrb.mxu1 %v4613_v38  ;;  %v6962_v38 = vld [vmem:[%s10902_s2 + $0x6ac] sm:$0xf]  ;;  %v5301_v44 = vor.u32 %v6930_v35, %v5298_v36  ;;  %v4962_v36 = vld [vmem:[%s10902_s2 + $0x318] sm:$0xf0]  ;;  %v6980_v21 = vld [vmem:[%s10905_s4 + $0x34] sm:$0xf0] }
  0xba   :  { %1748 = vmatpush.bf16.msrb.mxu2 %v4741_v39  ;;  %v5426_v39 = vld [vmem:[%s10902_s2 + $0x6b8] sm:$0xf0]  ;;  %v4965_v48 = vor.u32 %v6846_v32, %v4962_v36  ;;  %v5552_v25 = vld [vmem:[%s10905_s4 + $0xb0] sm:$0xf]  ;;  %v5544_v36 = vld [vmem:[%s10905_s4 + $0xa0] sm:$0xf] }
  0xbb   :  { %1762 = vmatpush.bf16.msrb.mxu3 %v4869_v45  ;;  %v5026_v45 = vld [vmem:[%s10902_s2 + $0x398] sm:$0xf0]  ;;  %v5429_v46 = vor.u32 %v6962_v38, %v5426_v39  ;;  %v6878_v38 = vld [vmem:[%s10902_s2 + $0x40c] sm:$0xf] }
  0xbc   :  { %1721 = vmatpush.bf16.msrb.mxu0 %v5361_v51  ;;  %v5090_v39 = vld [vmem:[%s10902_s2 + $0x418] sm:$0xf0] }
  0xbd   :  { %1735 = vmatpush.bf16.msrb.mxu1 %v4597_v54  ;;  %v6858_v54 = vld [vmem:[%s10902_s2 + $0x36c] sm:$0xf] }
  0xbe   :  { %1749 = vmatpush.bf16.msrb.mxu2 %v4725_v55  ;;  %v5010_v55 = vld [vmem:[%s10902_s2 + $0x378] sm:$0xf0] }
  0xbf   :  { %1763 = vmatpush.bf16.msrb.mxu3 %v4853_v60  ;;  %v6922_v60 = vld [vmem:[%s10902_s2 + $0x56c] sm:$0xf]  ;;  %v5013_v3 = vor.u32 %v6858_v54, %v5010_v55 }
  0xc0   :  { %1722 = vmatpush.bf16.msrb.mxu0 %v5345_v4  ;;  %v5141_v4 = vor.u32 %v6890_v56, %v5138_v59  ;;  %v5269_v5 = vor.u32 %v6922_v60, %v5266_v61  ;;  %v5512_v56 = vld [vmem:[%s10905_s4 + $0x60] sm:$0xf]  ;;  %v5585_v59 = vor.u32 %v7004_v50, %v5584_v49  ;;  %v1474_v60 = vpop.f32.mrf.mxu2  ;;  %v272_v50 = vperm.slane %v8822_v30, 1 }
  0xc1   :  { %1736 = vmatpush.bf16.msrb.mxu1 %v4581_v8  ;;  %v6886_v8 = vld [vmem:[%s10902_s2 + $0x44c] sm:$0xf]  ;;  %v5576_v61 = vld [vmem:[%s10905_s4 + $0xe0] sm:$0xf] }
  0xc2   :  { %1750 = vmatpush.bf16.msrb.mxu2 %v4709_v9  ;;  %v5397_v9 = vor.u32 %v6954_v63, %v5394_v1  ;;  %v5125_v17 = vor.u32 %v6886_v8, %v5122_v10  ;;  %v7002_v63 = vld [vmem:[%s10905_s4 + $0xe4] sm:$0xf0] }
  0xc3   :  { %1764 = vmatpush.bf16.msrb.mxu3 %v4837_v13  ;;  %1723 = vmatmul.bf16.vlgmr.msrb.gmra.mxu0 %v7895_v41  ;;  %v5250_v13 = vld [vmem:[%s10902_s2 + $0x558] sm:$0xf0]  ;;  %v5577_v8 = vor.u32 %v7002_v63, %v5576_v61  ;;  %v5528_v61 = vld [vmem:[%s10905_s4 + $0x80] sm:$0xf]  ;;  %v6990_v63 = vld [vmem:[%s10905_s4 + $0x84] sm:$0xf0] }
  0xc4   :  { %1771 = vmatpush.bf16.msra.mxu0 %v5077_v14  ;;  %1737 = vmatmul.bf16.vlgmr.msrb.gmra.mxu1 %v7665_v57  ;;  %v5154_v57 = vld [vmem:[%s10902_s2 + $0x498] sm:$0xf0]  ;;  %v6950_v14 = vld [vmem:[%s10902_s2 + $0x64c] sm:$0xf]  ;;  %v5253_v18 = vor.u32 %v6918_v12, %v5250_v13 }
  0xc5   :  { %1785 = vmatpush.bf16.msra.mxu1 %v5205_v15  ;;  %1751 = vmatmul.bf16.vlgmr.msrb.gmra.mxu2 %v7707_v11  ;;  %v6862_v11 = vld [vmem:[%s10902_s2 + $0x38c] sm:$0xf]  ;;  %v5378_v15 = vld [vmem:[%s10902_s2 + $0x658] sm:$0xf0] }
  0xc6   :  { %1799 = vmatpush.bf16.msra.mxu2 %v5333_v16  ;;  %1765 = vmatmul.bf16.vlgmr.msrb.gmra.mxu3 %v7679_v0  ;;  %v6894_v0 = vld [vmem:[%s10902_s2 + $0x48c] sm:$0xf]  ;;  %v5029_v51 = vor.u32 %v6862_v11, %v5026_v45  ;;  %v4997_v16 = vor.u32 %v6854_v6, %v4994_v7  ;;  %v5381_v24 = vor.u32 %v6950_v14, %v5378_v15  ;;  %v5218_v11 = vld [vmem:[%s10902_s2 + $0x518] sm:$0xf0]  ;;  %v5504_v6 = vld [vmem:[%s10905_s4 + $0x50] sm:$0xf] }
  0xc7   :  { %1813 = vmatpush.bf16.msra.mxu3 %v5461_v20  ;;  %v5157_v52 = vor.u32 %v6894_v0, %v5154_v57  ;;  %v4978_v20 = vld [vmem:[%s10902_s2 + $0x338] sm:$0xf0]  ;;  %v6942_v45 = vld [vmem:[%s10902_s2 + $0x60c] sm:$0xf]  ;;  %v8845_v0 = vpop.f32.mrf.mxu3  ;;  %v5520_v57 = vld [vmem:[%s10905_s4 + $0x70] sm:$0xf] }
  0xc8   :  { %1772 = vmatpush.bf16.msra.mxu0 %v5061_v27  ;;  %v5234_v27 = vld [vmem:[%s10902_s2 + $0x538] sm:$0xf0]  ;;  %v4981_v31 = vor.u32 %v6850_v19, %v4978_v20  ;;  %v5521_v55 = vor.u32 %v6988_v47, %v5520_v57  ;;  %v6984_v7 = vld [vmem:[%s10905_s4 + $0x54] sm:$0xf0]  ;;  %v5488_v20 = vld [vmem:[%s10905_s4 + $0x30] sm:$0xf] }
  0xc9   :  { %1786 = vmatpush.bf16.msra.mxu1 %v5189_v28  ;;  %v6946_v28 = vld [vmem:[%s10902_s2 + $0x62c] sm:$0xf]  ;;  %v5237_v35 = vor.u32 %v6914_v26, %v5234_v27  ;;  %v5505_v14 = vor.u32 %v6984_v7, %v5504_v6  ;;  %v5489_v32 = vor.u32 %v6980_v21, %v5488_v20  ;;  %v6992_v57 = vld [vmem:[%s10905_s4 + $0x94] sm:$0xf0] }
  0xca   :  { %1800 = vmatpush.bf16.msra.mxu2 %v5317_v29  ;;  %v5362_v29 = vld [vmem:[%s10902_s2 + $0x638] sm:$0xf0] }
  0xcb   :  { %1814 = vmatpush.bf16.msra.mxu3 %v5445_v33  ;;  %v1446_v33 = vpop.f32.mrf.mxu0 }
  0xcc   :  { %1773 = vmatpush.bf16.msra.mxu0 %v5045_v40  ;;  %v1460_v40 = vpop.f32.mrf.mxu1 }
  0xcd   :  { %1787 = vmatpush.bf16.msra.mxu1 %v5173_v43  ;;  %v5365_v43 = vor.u32 %v6946_v28, %v5362_v29 }
  0xce   :  { %1801 = vmatpush.bf16.msra.mxu2 %v5301_v44  ;;  %v6910_v44 = vld [vmem:[%s10902_s2 + $0x50c] sm:$0xf] }
  0xcf   :  { %1815 = vmatpush.bf16.msra.mxu3 %v5429_v46  ;;  %v5346_v46 = vld [vmem:[%s10902_s2 + $0x618] sm:$0xf0]  ;;  %v1488_v13 = vpop.f32.mrf.mxu3 }
  0xd0   :  { %1774 = vmatpush.bf16.msra.mxu0 %v5029_v51  ;;  %v271_v51 = vperm.slane %v8822_v30, 0  ;;  %v5349_v54 = vor.u32 %v6942_v45, %v5346_v46  ;;  %v5536_v46 = vld [vmem:[%s10905_s4 + $0x90] sm:$0xf] }
  0xd1   :  { %1788 = vmatpush.bf16.msra.mxu1 %v5157_v52  ;;  %v5093_v52 = vor.u32 %v6878_v38, %v5090_v39  ;;  %v6994_v38 = vld [vmem:[%s10905_s4 + $0xa4] sm:$0xf0] }
  0xd2   :  { %1802 = vmatpush.bf16.msra.mxu2 %v5285_v53  ;;  %v5221_v53 = vor.u32 %v6910_v44, %v5218_v11  ;;  %v1445_v1 = vadd.f32 %v8759_v62, %v271_v51  ;;  %v5472_v44 = vld [vmem:[%s10905_s4 + $0x10] sm:$0xf]  ;;  %v6976_v11 = vld [vmem:[%s10905_s4 + $0x14] sm:$0xf0]  ;;  %v5545_v45 = vor.u32 %v6994_v38, %v5544_v36 }
  0xd3   :  { %1816 = vmatpush.bf16.msra.mxu3 %v5413_v58  ;;  %v6986_v58 = vld [vmem:[%s10905_s4 + $0x64] sm:$0xf0] }
  0xd4   :  { %1775 = vmatpush.bf16.msra.mxu0 %v5013_v3  ;;  %v1447_v3 = vadd.f32 %v1446_v33, %v271_v51  ;;  %v1514_v62 = vpop.f32.mrf.mxu1  ;;  %v1459_v10 = vadd.f32 %v8767_v2, %v1445_v1  ;;  %v5560_v2 = vld [vmem:[%s10905_s4 + $0xc0] sm:$0xf] }
  0xd5   :  { %1789 = vmatpush.bf16.msra.mxu1 %v5141_v4  ;;  %v5513_v4 = vor.u32 %v6986_v58, %v5512_v56  ;;  %v5480_v33 = vld [vmem:[%s10905_s4 + $0x20] sm:$0xf]  ;;  %v6974_v56 = vld [vmem:[%s10905_s4 + $0x4] sm:$0xf0]  ;;  %v6987_v58 = vld [vmem:[%s10905_s4 + $0x74] sm:$0xf] }
  0xd6   :  { %1803 = vmatpush.bf16.msra.mxu2 %v5269_v5  ;;  %v1500_v5 = vpop.f32.mrf.mxu0  ;;  %v1461_v12 = vadd.f32 %v1460_v40, %v1447_v3  ;;  %v7003_v3 = vld [vmem:[%s10905_s4 + $0xf4] sm:$0xf] }
  0xd7   :  { %1817 = vmatpush.bf16.msra.mxu3 %v5397_v9  ;;  %v5568_v9 = vld [vmem:[%s10905_s4 + $0xd0] sm:$0xf]  ;;  %v1542_v29 = vpop.f32.mrf.mxu3 }
  0xd8   :  { %1776 = vmatpush.bf16.msra.mxu0 %v4997_v16  ;;  %v1473_v16 = vadd.f32 %v8802_v22, %v1459_v10  ;;  %v6996_v22 = vld [vmem:[%s10905_s4 + $0xb4] sm:$0xf0] }
  0xd9   :  { %1790 = vmatpush.bf16.msra.mxu1 %v5125_v17  ;;  %v1475_v17 = vadd.f32 %v1474_v60, %v1461_v12  ;;  %v5522_v60 = vld [vmem:[%s10905_s4 + $0x78] sm:$0xf0] }
  0xda   :  { %1804 = vmatpush.bf16.msra.mxu2 %v5253_v18  ;;  %v1528_v18 = vpop.f32.mrf.mxu2  ;;  %v1487_v26 = vadd.f32 %v8845_v0, %v1473_v16 }
  0xdb   :  { %1818 = vmatpush.bf16.msra.mxu3 %v5381_v24  ;;  %v1489_v27 = vadd.f32 %v1488_v13, %v1475_v17 }
  0xdc   :  { %1777 = vmatpush.bf16.msra.mxu0 %v4981_v31  ;;  %v1516_v31 = vpop.f32.mrf.mxu1  ;;  %v1501_v39 = vadd.f32 %v1500_v5, %v1487_v26  ;;  %v1543_v5 = vadd.f32 %v1542_v29, %v272_v50  ;;  %v5498_v29 = vld [vmem:[%s10905_s4 + $0x48] sm:$0xf0] }
  0xdd   :  { %1791 = vmatpush.bf16.msra.mxu1 %v5109_v34  ;;  %v6978_v34 = vld [vmem:[%s10905_s4 + $0x24] sm:$0xf0] }
  0xde   :  { %1805 = vmatpush.bf16.msra.mxu2 %v5237_v35  ;;  %v1502_v28 = vpop.f32.mrf.mxu0  ;;  %v5553_v35 = vor.u32 %v6996_v22, %v5552_v25  ;;  %v1515_v47 = vadd.f32 %v1514_v62, %v1501_v39  ;;  %v5529_v62 = vor.u32 %v6990_v63, %v5528_v61  ;;  %v5570_v25 = vld [vmem:[%s10905_s4 + $0xd8] sm:$0xf0]  ;;  %v5546_v61 = vld [vmem:[%s10905_s4 + $0xa8] sm:$0xf0]  ;;  %v5632_v63 = vld [vmem:[%s10905_s4 + $0x150] sm:$0xf] }
  0xdf   :  { %1819 = vmatpush.bf16.msra.mxu3 %v5365_v43  ;;  %v1503_v40 = vadd.f32 %v1502_v28, %v1489_v27  ;;  %v5481_v43 = vor.u32 %v6978_v34, %v5480_v33  ;;  %v6981_v28 = vld [vmem:[%s10905_s4 + $0x44] sm:$0xf]  ;;  %v5562_v33 = vld [vmem:[%s10905_s4 + $0xc8] sm:$0xf0]  ;;  %v5648_v34 = vld [vmem:[%s10905_s4 + $0x170] sm:$0xf] }
  0xe0   :  { %1778 = vmatpush.bf16.msra.mxu0 %v4965_v48  ;;  %v1529_v1 = vadd.f32 %v1528_v18, %v1515_v47  ;;  %v6983_v18 = vld [vmem:[%s10905_s4 + $0x54] sm:$0xf]  ;;  %v7018_v47 = vld [vmem:[%s10905_s4 + $0x164] sm:$0xf0] }
  0xe1   :  { %1792 = vmatpush.bf16.msra.mxu1 %v5093_v52  ;;  %v1517_v48 = vadd.f32 %v1516_v31, %v1503_v40  ;;  %v5473_v52 = vor.u32 %v6976_v11, %v5472_v44  ;;  %v6979_v44 = vld [vmem:[%s10905_s4 + $0x34] sm:$0xf] }
  0xe2   :  { %1806 = vmatpush.bf16.msra.mxu2 %v5221_v53  ;;  %v1530_v0 = vpop.f32.mrf.mxu2  ;;  %v1827_v12 = vmax.f32 %v1529_v1, 0.0  ;;  %v7016_v1 = vld [vmem:[%s10905_s4 + $0x154] sm:$0xf0] }
  0xe3   :  { %1820 = vmatpush.bf16.msra.mxu3 %v5349_v54  ;;  %1779 = vmatmul.bf16.vlgmr.msra.gmra.mxu0 %v7734_v23  ;;  %v7000_v23 = vld [vmem:[%s10905_s4 + $0xd4] sm:$0xf0]  ;;  %v1531_v53 = vadd.f32 %v1530_v0, %v1517_v48  ;;  %v1544_v54 = vpop.f32.mrf.mxu3  ;;  %v5490_v0 = vld [vmem:[%s10905_s4 + $0x38] sm:$0xf0]  ;;  %v6995_v48 = vld [vmem:[%s10905_s4 + $0xb4] sm:$0xf] }
  0xe4   :  { %2229 = vmatpush.bf16.msrb.mxu0 %v5521_v55  ;;  %1793 = vmatmul.bf16.vlgmr.msra.gmra.mxu1 %v7884_v37  ;;  %v5496_v37 = vld [vmem:[%s10905_s4 + $0x40] sm:$0xf]  ;;  %v5569_v15 = vor.u32 %v7000_v23, %v5568_v9  ;;  %v1570_v51 = vpop.f32.mrf.mxu1  ;;  %v6985_v9 = vld [vmem:[%s10905_s4 + $0x64] sm:$0xf]  ;;  %v5514_v23 = vld [vmem:[%s10905_s4 + $0x68] sm:$0xf0]  ;;  %v1545_v16 = vadd.f32 %v1544_v54, %v272_v50  ;;  %v5493_v54 = vor.u32 %v6979_v44, %v5490_v0 }
  0xe5   :  { %2243 = vmatpush.bf16.msrb.mxu1 %v5585_v59  ;;  %1807 = vmatmul.bf16.vlgmr.msra.gmra.mxu2 %v7897_v42  ;;  %v6982_v42 = vld [vmem:[%s10905_s4 + $0x44] sm:$0xf0]  ;;  %v5464_v55 = vld [vmem:[%s10905_s4] sm:$0xf]  ;;  %v5537_v59 = vor.u32 %v6992_v57, %v5536_v46  ;;  %v1831_v7 = vmax.f32 %v1531_v53, 0.0 }
  0xe6   :  { %1821 = vmatmul.bf16.vlgmr.msra.gmra.mxu3 %v7895_v41  ;;  %v6998_v41 = vld [vmem:[%s10905_s4 + $0xc4] sm:$0xf0]  ;;  %v5497_v19 = vor.u32 %v6982_v42, %v5496_v37  ;;  %v1556_v49 = vpop.f32.mrf.mxu0  ;;  %v5465_v6 = vor.u32 %v6974_v56, %v5464_v55  ;;  %v5578_v37 = vld [vmem:[%s10905_s4 + $0xe8] sm:$0xf0]  ;;  %v5640_v57 = vld [vmem:[%s10905_s4 + $0x160] sm:$0xf] }
  0xe7   :  { %v5561_v24 = vor.u32 %v6998_v41, %v5560_v2  ;;  %v1557_v42 = vadd.f32 %v1556_v49, %v1543_v5  ;;  %v5517_v41 = vor.u32 %v6985_v9, %v5514_v23  ;;  %v5554_v49 = vld [vmem:[%s10905_s4 + $0xb8] sm:$0xf0]  ;;  %v5641_v50 = vor.u32 %v7018_v47, %v5640_v57  ;;  %v6977_v56 = vld [vmem:[%s10905_s4 + $0x24] sm:$0xf]  ;;  %v5712_v47 = vld [vmem:[%s10905_s4 + $0x1f0] sm:$0xf] }
  0xe8   :  { %2230 = vmatpush.bf16.msrb.mxu0 %v5513_v4  ;;  %v5586_v4 = vld [vmem:[%s10905_s4 + $0xf8] sm:$0xf0]  ;;  %v7017_v0 = vld [vmem:[%s10905_s4 + $0x164] sm:$0xf] }
  0xe9   :  { %2244 = vmatpush.bf16.msrb.mxu1 %v5577_v8  ;;  %v5525_v8 = vor.u32 %v6987_v58, %v5522_v60  ;;  %v5589_v10 = vor.u32 %v7003_v3, %v5586_v4  ;;  %v1571_v22 = vadd.f32 %v1570_v51, %v1557_v42  ;;  %v5482_v58 = vld [vmem:[%s10905_s4 + $0x28] sm:$0xf0]  ;;  %v6993_v60 = vld [vmem:[%s10905_s4 + $0xa4] sm:$0xf]  ;;  %v5633_v4 = vor.u32 %v7016_v1, %v5632_v63  ;;  %v5474_v23 = vld [vmem:[%s10905_s4 + $0x18] sm:$0xf0] }
  0xea   :  { %v1584_v13 = vpop.f32.mrf.mxu2  ;;  %v6991_v42 = vld [vmem:[%s10905_s4 + $0x94] sm:$0xf]  ;;  %v5650_v44 = vld [vmem:[%s10905_s4 + $0x178] sm:$0xf0]  ;;  %v5696_v1 = vld [vmem:[%s10905_s4 + $0x1d0] sm:$0xf] }
  0xeb   :  { %v1598_v21 = vpop.f32.mrf.mxu3  ;;  %v1585_v36 = vadd.f32 %v1584_v13, %v1571_v22  ;;  %v7014_v13 = vld [vmem:[%s10905_s4 + $0x144] sm:$0xf0]  ;;  %v6989_v22 = vld [vmem:[%s10905_s4 + $0x84] sm:$0xf] }
  0xec   :  { %2231 = vmatpush.bf16.msrb.mxu0 %v5505_v14  ;;  %v7001_v14 = vld [vmem:[%s10905_s4 + $0xe4] sm:$0xf]  ;;  %v1572_v17 = vpop.f32.mrf.mxu1 }
  0xed   :  { %2245 = vmatpush.bf16.msrb.mxu1 %v5569_v15  ;;  %v8980_v15 = vpack.c.bf16 %v1831_v7, %v1827_v12  ;;  %v5581_v20 = vor.u32 %v7001_v14, %v5578_v37  ;;  %v1599_v51 = vadd.f32 %v1598_v21, %v1585_v36  ;;  %v6975_v7 = vld [vmem:[%s10905_s4 + $0x14] sm:$0xf]  ;;  %v5624_v12 = vld [vmem:[%s10905_s4 + $0x140] sm:$0xf]  ;;  %v5616_v21 = vld [vmem:[%s10905_s4 + $0x130] sm:$0xf] }
  0xee   :  { %v1558_v2 = vpop.f32.mrf.mxu0  ;;  %v5625_v14 = vor.u32 %v7014_v13, %v5624_v12  ;;  %v5610_v12 = vld [vmem:[%s10905_s4 + $0x128] sm:$0xf0] }
  0xef   :  { %v1559_v27 = vadd.f32 %v1558_v2, %v1545_v16  ;;  %v5538_v2 = vld [vmem:[%s10905_s4 + $0x98] sm:$0xf0] }
  0xf0   :  { %2232 = vmatpush.bf16.msrb.mxu0 %v5497_v19  ;;  %v5506_v19 = vld [vmem:[%s10905_s4 + $0x58] sm:$0xf0] }
  0xf1   :  { %2246 = vmatpush.bf16.msrb.mxu1 %v5561_v24  ;;  %v6999_v24 = vld [vmem:[%s10905_s4 + $0xd4] sm:$0xf]  ;;  %v5509_v26 = vor.u32 %v6983_v18, %v5506_v19  ;;  %v1573_v11 = vadd.f32 %v1572_v17, %v1559_v27  ;;  %v6973_v18 = vld [vmem:[%s10905_s4 + $0x4] sm:$0xf]  ;;  %v5466_v19 = vld [vmem:[%s10905_s4 + $0x8] sm:$0xf0] }
  0xf2   :  { %v5573_v31 = vor.u32 %v6999_v24, %v5570_v25  ;;  %v1586_v39 = vpop.f32.mrf.mxu2  ;;  %v7012_v24 = vld [vmem:[%s10905_s4 + $0x134] sm:$0xf0] }
  0xf3   :  { %v1600_v53 = vpop.f32.mrf.mxu3  ;;  %v5617_v27 = vor.u32 %v7012_v24, %v5616_v21  ;;  %v5672_v24 = vld [vmem:[%s10905_s4 + $0x1a0] sm:$0xf] }
  0xf4   :  { %2233 = vmatpush.bf16.msrb.mxu0 %v5489_v32  ;;  %v6997_v32 = vld [vmem:[%s10905_s4 + $0xc4] sm:$0xf] }
  0xf5   :  { %2247 = vmatpush.bf16.msrb.mxu1 %v5553_v35  ;;  %v7020_v35 = vld [vmem:[%s10905_s4 + $0x174] sm:$0xf0]  ;;  %v5565_v46 = vor.u32 %v6997_v32, %v5562_v33 }
  0xf6   :  { %v5649_v38 = vor.u32 %v7020_v35, %v5648_v34  ;;  %v5600_v34 = vld [vmem:[%s10905_s4 + $0x110] sm:$0xf]  ;;  %v7008_v35 = vld [vmem:[%s10905_s4 + $0x114] sm:$0xf0] }
  0xf7   :  { %v5601_v36 = vor.u32 %v7008_v35, %v5600_v34 }
  0xf8   :  { %2234 = vmatpush.bf16.msrb.mxu0 %v5481_v43  ;;  %v5501_v43 = vor.u32 %v6981_v28, %v5498_v29  ;;  %2257 = vmatpush.bf16.msrb.mxu2 %v5649_v38  ;;  %v5469_v28 = vor.u32 %v6973_v18, %v5466_v19  ;;  %v5608_v29 = vld [vmem:[%s10905_s4 + $0x120] sm:$0xf] }
  0xf9   :  { %2248 = vmatpush.bf16.msrb.mxu1 %v5545_v45  ;;  %v5592_v38 = vld [vmem:[%s10905_s4 + $0x100] sm:$0xf] }
  0xfc   :  { %2235 = vmatpush.bf16.msrb.mxu0 %v5473_v52  ;;  %v1587_v52 = vadd.f32 %v1586_v39, %v1573_v11  ;;  %2258 = vmatpush.bf16.msrb.mxu2 %v5641_v50  ;;  %v7006_v39 = vld [vmem:[%s10905_s4 + $0x104] sm:$0xf0] }
  0xfd   :  { %2249 = vmatpush.bf16.msrb.mxu1 %v5537_v59  ;;  %v5557_v59 = vor.u32 %v6995_v48, %v5554_v49  ;;  %v7036_v48 = vld [vmem:[%s10905_s4 + $0x1f4] sm:$0xf0]  ;;  %v7015_v49 = vld [vmem:[%s10905_s4 + $0x154] sm:$0xf] }
  0xfe   :  { %v1601_v3 = vadd.f32 %v1600_v53, %v1587_v52  ;;  %v5713_v50 = vor.u32 %v7036_v48, %v5712_v47  ;;  %v5704_v53 = vld [vmem:[%s10905_s4 + $0x1e0] sm:$0xf]  ;;  %v7035_v48 = vld [vmem:[%s10905_s4 + $0x1f4] sm:$0xf] }
 0x100   :  { %2236 = vmatpush.bf16.msrb.mxu0 %v5465_v6  ;;  %v1612_v40 = vpop.f32.mrf.mxu0  ;;  %v5485_v6 = vor.u32 %v6977_v56, %v5482_v58  ;;  %2259 = vmatpush.bf16.msrb.mxu2 %v5633_v4  ;;  %v7011_v4 = vld [vmem:[%s10905_s4 + $0x134] sm:$0xf] }
 0x101   :  { %2250 = vmatpush.bf16.msrb.mxu1 %v5529_v62  ;;  %v1626_v45 = vpop.f32.mrf.mxu1  ;;  %v1613_v55 = vadd.f32 %v1612_v40, %v1599_v51  ;;  %v5593_v40 = vor.u32 %v7006_v39, %v5592_v38  ;;  %v5634_v51 = vld [vmem:[%s10905_s4 + $0x158] sm:$0xf0]  ;;  %2271 = vmatpush.bf16.msrb.mxu3 %v5713_v50  ;;  %v5664_v38 = vld [vmem:[%s10905_s4 + $0x190] sm:$0xf]  ;;  %v7024_v39 = vld [vmem:[%s10905_s4 + $0x194] sm:$0xf0] }
 0x102   :  { %v5637_v52 = vor.u32 %v7015_v49, %v5634_v51  ;;  %v5714_v49 = vld [vmem:[%s10905_s4 + $0x1f8] sm:$0xf0] }
 0x103   :  { %2237 = vmatmul.bf16.vlgmr.msrb.gmra.mxu0 %v8980_v15  ;;  %v5717_v51 = vor.u32 %v7035_v48, %v5714_v49  ;;  %v5832_v48 = vld [vmem:[%s10906_s6 + $0xe0] sm:$0xf]  ;;  %v7067_v49 = vld [vmem:[%s10906_s6 + $0xec] sm:$0xf0] }
 0x104   :  { %2285 = vmatpush.bf16.msra.mxu0 %v5525_v8  ;;  %v1627_v8 = vadd.f32 %v1626_v45, %v1613_v55  ;;  %2260 = vmatpush.bf16.msrb.mxu2 %v5625_v14  ;;  %v7013_v55 = vld [vmem:[%s10905_s4 + $0x144] sm:$0xf] }
 0x105   :  { %2299 = vmatpush.bf16.msra.mxu1 %v5589_v10  ;;  %v5549_v10 = vor.u32 %v6993_v60, %v5546_v61  ;;  %v273_v60 = vperm.slane %v8822_v30, 2 }
 0x106   :  { %v1828_v16 = vmax.f32 %v1627_v8, 0.0  ;;  %v5688_v8 = vld [vmem:[%s10905_s4 + $0x1c0] sm:$0xf] }
 0x108   :  { %2286 = vmatpush.bf16.msra.mxu0 %v5517_v41  ;;  %v1614_v5 = vpop.f32.mrf.mxu0  ;;  %v5477_v41 = vor.u32 %v6975_v7, %v5474_v23  ;;  %2261 = vmatpush.bf16.msrb.mxu2 %v5617_v27  ;;  %v1640_v45 = vpop.f32.mrf.mxu2  ;;  %v5618_v7 = vld [vmem:[%s10905_s4 + $0x138] sm:$0xf0]  ;;  %v5594_v27 = vld [vmem:[%s10905_s4 + $0x108] sm:$0xf0] }
 0x109   :  { %2300 = vmatpush.bf16.msra.mxu1 %v5581_v20  ;;  %v1615_v62 = vadd.f32 %v1614_v5, %v1601_v3  ;;  %v1628_v9 = vpop.f32.mrf.mxu1  ;;  %v5541_v20 = vor.u32 %v6991_v42, %v5538_v2  ;;  %v1654_v57 = vpop.f32.mrf.mxu3  ;;  %v7032_v3 = vld [vmem:[%s10905_s4 + $0x1d4] sm:$0xf0]  ;;  %v5621_v23 = vor.u32 %v7011_v4, %v5618_v7  ;;  %v5690_v7 = vld [vmem:[%s10905_s4 + $0x1c8] sm:$0xf0] }
 0x10a   :  { %v7028_v42 = vld [vmem:[%s10905_s4 + $0x1b4] sm:$0xf0] }
 0x10b   :  { %v1629_v37 = vadd.f32 %v1628_v9, %v1615_v62  ;;  %v7030_v62 = vld [vmem:[%s10905_s4 + $0x1c4] sm:$0xf0]  ;;  %v1641_v9 = vadd.f32 %v1640_v45, %v273_v60 }
 0x10c   :  { %2287 = vmatpush.bf16.msra.mxu0 %v5509_v26  ;;  %v5530_v26 = vld [vmem:[%s10905_s4 + $0x88] sm:$0xf0]  ;;  %v5689_v13 = vor.u32 %v7030_v62, %v5688_v8 }
 0x10d   :  { %2301 = vmatpush.bf16.msra.mxu1 %v5573_v31  ;;  %v1832_v17 = vmax.f32 %v1629_v37, 0.0  ;;  %v7010_v31 = vld [vmem:[%s10905_s4 + $0x124] sm:$0xf0]  ;;  %v5533_v33 = vor.u32 %v6989_v22, %v5530_v26  ;;  %v5680_v37 = vld [vmem:[%s10905_s4 + $0x1b0] sm:$0xf] }
 0x10e   :  { %v5609_v32 = vor.u32 %v7010_v31, %v5608_v29  ;;  %v7005_v26 = vld [vmem:[%s10905_s4 + $0x104] sm:$0xf] }
 0x10f   :  { %v1836_v25 = vpack.c.bf16 %v1832_v17, %v1828_v16  ;;  %v5602_v16 = vld [vmem:[%s10905_s4 + $0x118] sm:$0xf0]  ;;  %v1655_v17 = vadd.f32 %v1654_v57, %v1641_v9 }
 0x110   :  { %2288 = vmatpush.bf16.msra.mxu0 %v5501_v43  ;;  %2262 = vmatpush.bf16.msrb.mxu2 %v5609_v32  ;;  %v7019_v43 = vld [vmem:[%s10905_s4 + $0x174] sm:$0xf]  ;;  %v1642_v56 = vpop.f32.mrf.mxu2 }
 0x111   :  { %2302 = vmatpush.bf16.msra.mxu1 %v5565_v46  ;;  %v5653_v11 = vor.u32 %v7019_v43, %v5650_v44  ;;  %v1656_v5 = vpop.f32.mrf.mxu3  ;;  %v1643_v18 = vadd.f32 %v1642_v56, %v273_v60  ;;  %v5665_v44 = vor.u32 %v7024_v39, %v5664_v38  ;;  %v5706_v56 = vld [vmem:[%s10905_s4 + $0x1e8] sm:$0xf0] }
 0x112   :  { %2251 = vmatmul.bf16.vlgmr.msrb.gmra.mxu1 %v1836_v25 }
 0x114   :  { %2289 = vmatpush.bf16.msra.mxu0 %v5493_v54  ;;  %2263 = vmatpush.bf16.msrb.mxu2 %v5601_v36  ;;  %v7034_v54 = vld [vmem:[%s10905_s4 + $0x1e4] sm:$0xf0] }
 0x115   :  { %2303 = vmatpush.bf16.msra.mxu1 %v5557_v59  ;;  %v5705_v58 = vor.u32 %v7034_v54, %v5704_v53  ;;  %v5626_v59 = vld [vmem:[%s10905_s4 + $0x148] sm:$0xf0] }
 0x116   :  { %v5629_v61 = vor.u32 %v7013_v55, %v5626_v59  ;;  %v7033_v55 = vld [vmem:[%s10905_s4 + $0x1e4] sm:$0xf] }
 0x117   :  { %2272 = vmatpush.bf16.msrb.mxu3 %v5705_v58  ;;  %v5709_v59 = vor.u32 %v7033_v55, %v5706_v56 }
 0x118   :  { %2290 = vmatpush.bf16.msra.mxu0 %v5485_v6  ;;  %2264 = vmatpush.bf16.msrb.mxu2 %v5593_v40  ;;  %v5697_v6 = vor.u32 %v7032_v3, %v5696_v1  ;;  %v5698_v1 = vld [vmem:[%s10905_s4 + $0x1d8] sm:$0xf0] }
 0x119   :  { %2304 = vmatpush.bf16.msra.mxu1 %v5549_v10  ;;  %v7009_v10 = vld [vmem:[%s10905_s4 + $0x124] sm:$0xf] }
 0x11a   :  { %v5613_v14 = vor.u32 %v7009_v10, %v5610_v12  ;;  %v5682_v10 = vld [vmem:[%s10905_s4 + $0x1b8] sm:$0xf0]  ;;  %v274_v12 = vperm.slane %v8822_v30, 3 }
 0x11b   :  { %2273 = vmatpush.bf16.msrb.mxu3 %v5697_v6  ;;  %v7029_v6 = vld [vmem:[%s10905_s4 + $0x1c4] sm:$0xf]  ;;  %v5666_v30 = vld [vmem:[%s10905_s4 + $0x198] sm:$0xf0] }
 0x11c   :  { %2291 = vmatpush.bf16.msra.mxu0 %v5477_v41  ;;  %2313 = vmatpush.bf16.msra.mxu2 %v5653_v11  ;;  %v7007_v41 = vld [vmem:[%s10905_s4 + $0x114] sm:$0xf]  ;;  %v5693_v8 = vor.u32 %v7029_v6, %v5690_v7  ;;  %v7064_v6 = vld [vmem:[%s10906_s6 + $0xd4] sm:$0xf0] }
 0x11d   :  { %2305 = vmatpush.bf16.msra.mxu1 %v5541_v20  ;;  %v5681_v20 = vor.u32 %v7028_v42, %v5680_v37  ;;  %v5605_v21 = vor.u32 %v7007_v41, %v5602_v16  ;;  %v5674_v37 = vld [vmem:[%s10905_s4 + $0x1a8] sm:$0xf0] }
 0x11f   :  { %2274 = vmatpush.bf16.msrb.mxu3 %v5689_v13 }
 0x120   :  { %2292 = vmatpush.bf16.msra.mxu0 %v5469_v28  ;;  %v1668_v63 = vpop.f32.mrf.mxu0  ;;  %v1657_v28 = vadd.f32 %v1656_v5, %v1643_v18  ;;  %v7021_v18 = vld [vmem:[%s10905_s4 + $0x184] sm:$0xf] }
 0x121   :  { %2306 = vmatpush.bf16.msra.mxu1 %v5533_v33  ;;  %v1682_v2 = vpop.f32.mrf.mxu1  ;;  %v1669_v29 = vadd.f32 %v1668_v63, %v1655_v17  ;;  %v5597_v33 = vor.u32 %v7005_v26, %v5594_v27  ;;  %v7031_v63 = vld [vmem:[%s10905_s4 + $0x1d4] sm:$0xf] }
 0x122   :  { %v5701_v4 = vor.u32 %v7031_v63, %v5698_v1  ;;  %v7023_v17 = vld [vmem:[%s10905_s4 + $0x194] sm:$0xf]  ;;  %v7063_v63 = vld [vmem:[%s10906_s6 + $0xcc] sm:$0xf0]  ;;  %v7061_v1 = vld [vmem:[%s10906_s6 + $0xc4] sm:$0xf] }
 0x123   :  { %2293 = vmatmul.bf16.vlgmr.msra.gmra.mxu0 %v8980_v15  ;;  %v5642_v15 = vld [vmem:[%s10905_s4 + $0x168] sm:$0xf0]  ;;  %2275 = vmatpush.bf16.msrb.mxu3 %v5681_v20  ;;  %v1683_v34 = vadd.f32 %v1682_v2, %v1669_v29 }
 0x124   :  { %v5645_v46 = vor.u32 %v7017_v0, %v5642_v15  ;;  %2307 = vmatmul.bf16.vlgmr.msra.gmra.mxu1 %v1836_v25  ;;  %v7026_v25 = vld [vmem:[%s10905_s4 + $0x1a4] sm:$0xf0]  ;;  %v5656_v15 = vld [vmem:[%s10905_s4 + $0x180] sm:$0xf] }
 0x125   :  { %v5673_v32 = vor.u32 %v7026_v25, %v5672_v24  ;;  %v5669_v25 = vor.u32 %v7023_v17, %v5666_v30  ;;  %v7060_v17 = vld [vmem:[%s10906_s6 + $0xb4] sm:$0xf0] }
 0x126   :  { %2314 = vmatpush.bf16.msra.mxu2 %v5645_v46  ;;  %v7022_v46 = vld [vmem:[%s10905_s4 + $0x184] sm:$0xf0] }
 0x127   :  { %2276 = vmatpush.bf16.msrb.mxu3 %v5673_v32  ;;  %v5657_v47 = vor.u32 %v7022_v46, %v5656_v15 }
 0x128   :  { %v1696_v19 = vpop.f32.mrf.mxu2  ;;  %v1670_v22 = vpop.f32.mrf.mxu0 }
 0x129   :  { %v1710_v31 = vpop.f32.mrf.mxu3  ;;  %v1671_v35 = vadd.f32 %v1670_v22, %v1657_v28  ;;  %v1684_v36 = vpop.f32.mrf.mxu1  ;;  %v1697_v11 = vadd.f32 %v1696_v19, %v1683_v34  ;;  %v5658_v22 = vld [vmem:[%s10905_s4 + $0x188] sm:$0xf0] }
 0x12a   :  { %2315 = vmatpush.bf16.msra.mxu2 %v5637_v52  ;;  %v5661_v26 = vor.u32 %v7021_v18, %v5658_v22  ;;  %v5784_v22 = vld [vmem:[%s10906_s6 + $0x80] sm:$0xf] }
 0x12b   :  { %v1685_v45 = vadd.f32 %v1684_v36, %v1671_v35  ;;  %2277 = vmatpush.bf16.msrb.mxu3 %v5665_v44  ;;  %v1711_v50 = vadd.f32 %v1710_v31, %v1697_v11 }
 0x12e   :  { %2316 = vmatpush.bf16.msra.mxu2 %v5629_v61 }
 0x12f   :  { %2278 = vmatpush.bf16.msrb.mxu3 %v5657_v47 }
 0x130   :  { %v1698_v40 = vpop.f32.mrf.mxu2 }
 0x131   :  { %v1699_v0 = vadd.f32 %v1698_v40, %v1685_v45  ;;  %v1712_v57 = vpop.f32.mrf.mxu3 }
 0x132   :  { %2317 = vmatpush.bf16.msra.mxu2 %v5621_v23  ;;  %v7027_v23 = vld [vmem:[%s10905_s4 + $0x1b4] sm:$0xf] }
 0x133   :  { %v1713_v52 = vadd.f32 %v1712_v57, %v1699_v0  ;;  %2327 = vmatpush.bf16.msra.mxu3 %v5717_v51  ;;  %v5685_v13 = vor.u32 %v7027_v23, %v5682_v10  ;;  %v5833_v51 = vor.u32 %v7067_v49, %v5832_v48  ;;  %v9301_v23 = vld [vmem:[%s10907_s5] sm:$0x3]  ;;  %v7050_v48 = vld [vmem:[%s10906_s6 + $0x6c] sm:$0xf]  ;;  %v5778_v49 = vld [vmem:[%s10906_s6 + $0x78] sm:$0xf0] }
 0x135   :  { %2556 = vmatpush.bf16.msrb.mxu0 %v5833_v51 }
 0x136   :  { %2318 = vmatpush.bf16.msra.mxu2 %v5613_v14  ;;  %v7025_v14 = vld [vmem:[%s10905_s4 + $0x1a4] sm:$0xf] }
 0x137   :  { %2328 = vmatpush.bf16.msra.mxu3 %v5709_v59  ;;  %v5677_v42 = vor.u32 %v7025_v14, %v5674_v37  ;;  %v5842_v59 = vld [vmem:[%s10906_s6 + $0xf8] sm:$0xf0]  ;;  %v7057_v14 = vld [vmem:[%s10906_s6 + $0xa4] sm:$0xf] }
 0x13a   :  { %2319 = vmatpush.bf16.msra.mxu2 %v5605_v21 }
 0x13b   :  { %2329 = vmatpush.bf16.msra.mxu3 %v5701_v4  ;;  %v5818_v4 = vld [vmem:[%s10906_s6 + $0xd0] sm:$0xf0] }
 0x13c   :  { %v5821_v7 = vor.u32 %v7061_v1, %v5818_v4  ;;  %v7048_v4 = vld [vmem:[%s10906_s6 + $0x54] sm:$0xf0] }
 0x13e   :  { %2320 = vmatpush.bf16.msra.mxu2 %v5597_v33 }
 0x13f   :  { %2330 = vmatpush.bf16.msra.mxu3 %v5693_v8 }
 0x140   :  { %v1724_v43 = vpop.f32.mrf.mxu0 }
 0x141   :  { %v1725_v53 = vadd.f32 %v1724_v43, %v1711_v50  ;;  %v1738_v5 = vpop.f32.mrf.mxu1  ;;  %v7065_v50 = vld [vmem:[%s10906_s6 + $0xe4] sm:$0xf] }
 0x142   :  { %v1739_v41 = vadd.f32 %v1738_v5, %v274_v12  ;;  %v5824_v5 = vld [vmem:[%s10906_s6 + $0xc8] sm:$0xf] }
 0x143   :  { %v1829_v60 = vmax.f32 %v1725_v53, 0.0  ;;  %2331 = vmatpush.bf16.msra.mxu3 %v5685_v13  ;;  %v5840_v53 = vld [vmem:[%s10906_s6 + $0xe8] sm:$0xf]  ;;  %v5825_v8 = vor.u32 %v7064_v6, %v5824_v5  ;;  %v7059_v13 = vld [vmem:[%s10906_s6 + $0xac] sm:$0xf0] }
 0x144   :  { %v7046_v5 = vld [vmem:[%s10906_s6 + $0x4c] sm:$0xf]  ;;  %v5762_v6 = vld [vmem:[%s10906_s6 + $0x58] sm:$0xf0] }
 0x147   :  { %2332 = vmatpush.bf16.msra.mxu3 %v5677_v42 }
 0x148   :  { %v1726_v54 = vpop.f32.mrf.mxu0  ;;  %v1752_v62 = vpop.f32.mrf.mxu2 }
 0x149   :  { %v1727_v58 = vadd.f32 %v1726_v54, %v1713_v52  ;;  %v1766_v9 = vpop.f32.mrf.mxu3  ;;  %v1740_v2 = vpop.f32.mrf.mxu1  ;;  %v1753_v19 = vadd.f32 %v1752_v62, %v1739_v41  ;;  %v5834_v52 = vld [vmem:[%s10906_s6 + $0xf0] sm:$0xf0]  ;;  %v7068_v54 = vld [vmem:[%s10906_s6 + $0xf4] sm:$0xf0]  ;;  %v7062_v62 = vld [vmem:[%s10906_s6 + $0xcc] sm:$0xf] }
 0x14a   :  { %v1741_v20 = vadd.f32 %v1740_v2, %v274_v12  ;;  %v5837_v55 = vor.u32 %v7065_v50, %v5834_v52  ;;  %v5841_v56 = vor.u32 %v7068_v54, %v5840_v53  ;;  %v5800_v12 = vld [vmem:[%s10906_s6 + $0xa0] sm:$0xf]  ;;  %v5802_v41 = vld [vmem:[%s10906_s6 + $0xb0] sm:$0xf0]  ;;  %v5781_v52 = vor.u32 %v7050_v48, %v5778_v49 }
 0x14b   :  { %v1833_v61 = vmax.f32 %v1727_v58, 0.0  ;;  %2333 = vmatpush.bf16.msra.mxu3 %v5669_v25  ;;  %v1767_v28 = vadd.f32 %v1766_v9, %v1753_v19  ;;  %v7066_v58 = vld [vmem:[%s10906_s6 + $0xec] sm:$0xf]  ;;  %v5826_v9 = vld [vmem:[%s10906_s6 + $0xd8] sm:$0xf0]  ;;  %v5801_v2 = vor.u32 %v7059_v13, %v5800_v12  ;;  %v5805_v30 = vor.u32 %v7057_v14, %v5802_v41 }
 0x14c   :  { %2570 = vmatpush.bf16.msrb.mxu1 %v5837_v55  ;;  %v5829_v10 = vor.u32 %v7062_v62, %v5826_v9  ;;  %v7058_v19 = vld [vmem:[%s10906_s6 + $0xac] sm:$0xf]  ;;  %v1905_v25 = vperm.slane %v9301_v23, 0  ;;  %v5752_v54 = vld [vmem:[%s10906_s6 + $0x40] sm:$0xf] }
 0x14d   :  { %v1837_v3 = vpack.c.bf16 %v1833_v61, %v1829_v60  ;;  %v5845_v60 = vor.u32 %v7066_v58, %v5842_v59  ;;  %v5816_v61 = vld [vmem:[%s10906_s6 + $0xc0] sm:$0xf]  ;;  %v7047_v55 = vld [vmem:[%s10906_s6 + $0x4c] sm:$0xf0]  ;;  %v7041_v12 = vld [vmem:[%s10906_s6 + $0x24] sm:$0xf] }
 0x14e   :  { %v5753_v59 = vor.u32 %v7047_v55, %v5752_v54  ;;  %v5736_v9 = vld [vmem:[%s10906_s6 + $0x20] sm:$0xf]  ;;  %v5738_v14 = vld [vmem:[%s10906_s6 + $0x30] sm:$0xf0] }
 0x14f   :  { %2265 = vmatmul.bf16.vlgmr.msrb.gmra.mxu2 %v1837_v3  ;;  %2334 = vmatpush.bf16.msra.mxu3 %v5661_v26  ;;  %v7055_v26 = vld [vmem:[%s10906_s6 + $0x8c] sm:$0xf0] }
 0x150   :  { %v1754_v16 = vpop.f32.mrf.mxu2  ;;  %2584 = vmatpush.bf16.msrb.mxu2 %v5841_v56  ;;  %2571 = vmatpush.bf16.msrb.mxu1 %v5821_v7 }
 0x151   :  { %v1768_v21 = vpop.f32.mrf.mxu3  ;;  %v1755_v29 = vadd.f32 %v1754_v16, %v1741_v20  ;;  %v5808_v16 = vld [vmem:[%s10906_s6 + $0xa8] sm:$0xf]  ;;  %v5810_v20 = vld [vmem:[%s10906_s6 + $0xb8] sm:$0xf0] }
 0x152   :  { %v5809_v18 = vor.u32 %v7060_v17, %v5808_v16  ;;  %v5741_v16 = vor.u32 %v7041_v12, %v5738_v14  ;;  %v6688_v14 = vld [vmem:[%s10909_s8 + $0x690] sm:$0xf] }
 0x153   :  { %v1769_v33 = vadd.f32 %v1768_v21, %v1755_v29  ;;  %v5786_v29 = vld [vmem:[%s10906_s6 + $0x90] sm:$0xf0] }
 0x154   :  { %2585 = vmatpush.bf16.msrb.mxu2 %v5825_v8  ;;  %2572 = vmatpush.bf16.msrb.mxu1 %v5805_v30  ;;  %v5765_v8 = vor.u32 %v7046_v5, %v5762_v6  ;;  %v7042_v30 = vld [vmem:[%s10906_s6 + $0x2c] sm:$0xf]  ;;  %v7107_v5 = vld [vmem:[%s10909_s8 + $0x130] sm:$0xf0]  ;;  %v6212_v6 = vld [vmem:[%s10909_s8 + $0x2d8] sm:$0xf] }
 0x158   :  { %2586 = vmatpush.bf16.msrb.mxu2 %v5809_v18  ;;  %v5746_v18 = vld [vmem:[%s10906_s6 + $0x38] sm:$0xf0] }
 0x15f   :  { %2321 = vmatmul.bf16.vlgmr.msra.gmra.mxu2 %v1837_v3  ;;  %v5817_v3 = vor.u32 %v7063_v63, %v5816_v61  ;;  %v5754_v61 = vld [vmem:[%s10906_s6 + $0x50] sm:$0xf0]  ;;  %v5760_v63 = vld [vmem:[%s10906_s6 + $0x48] sm:$0xf] }
 0x160   :  { %v1780_v24 = vpop.f32.mrf.mxu0  ;;  %v5761_v7 = vor.u32 %v7048_v4, %v5760_v63  ;;  %v5988_v4 = vld [vmem:[%s10909_s8 + $0x118] sm:$0xf] }
 0x161   :  { %v1794_v27 = vpop.f32.mrf.mxu1  ;;  %v1781_v31 = vadd.f32 %v1780_v24, %v1767_v28  ;;  %2557 = vmatpush.bf16.msrb.mxu0 %v5817_v3  ;;  %v5813_v24 = vor.u32 %v7058_v19, %v5810_v20  ;;  %v7053_v28 = vld [vmem:[%s10906_s6 + $0x84] sm:$0xf]  ;;  %v5749_v20 = vor.u32 %v7042_v30, %v5746_v18  ;;  %v6184_v18 = vld [vmem:[%s10909_s8 + $0x2a0] sm:$0xf] }
 0x163   :  { %v1795_v36 = vadd.f32 %v1794_v27, %v1781_v31  ;;  %v5785_v27 = vor.u32 %v7055_v26, %v5784_v22  ;;  %v5792_v31 = vld [vmem:[%s10906_s6 + $0x88] sm:$0xf] }
 0x165   :  { %2558 = vmatpush.bf16.msrb.mxu0 %v5801_v2  ;;  %v1906_v2 = vperm.slane %v9301_v23, 1  ;;  %v5989_v23 = vor.u32 %v7107_v5, %v5988_v4  ;;  %v2347_v5 = vld [vmem:[%s10910_s1] sm:$0xff] }
 0x168   :  { %v1808_v32 = vpop.f32.mrf.mxu2  ;;  %v1782_v35 = vpop.f32.mrf.mxu0 }
 0x169   :  { %v1822_v34 = vpop.f32.mrf.mxu3  ;;  %v1783_v38 = vadd.f32 %v1782_v35, %v1769_v33  ;;  %v1809_v39 = vadd.f32 %v1808_v32, %v1795_v36  ;;  %v1796_v40 = vpop.f32.mrf.mxu1  ;;  %v5789_v32 = vor.u32 %v7053_v28, %v5786_v29  ;;  %v7056_v33 = vld [vmem:[%s10906_s6 + $0x94] sm:$0xf0]  ;;  %v5794_v35 = vld [vmem:[%s10906_s6 + $0x98] sm:$0xf0]  ;;  %2559 = vmatpush.bf16.msrb.mxu0 %v5785_v27  ;;  %v5722_v27 = vld [vmem:[%s10906_s6 + $0x10] sm:$0xf0] }
 0x16a   :  { %v5793_v36 = vor.u32 %v7056_v33, %v5792_v31  ;;  %v5728_v28 = vld [vmem:[%s10906_s6 + $0x8] sm:$0xf]  ;;  %v7040_v29 = vld [vmem:[%s10906_s6 + $0x14] sm:$0xf0] }
 0x16b   :  { %v1797_v43 = vadd.f32 %v1796_v40, %v1783_v38  ;;  %v1823_v11 = vadd.f32 %v1822_v34, %v1809_v39  ;;  %v7054_v34 = vld [vmem:[%s10906_s6 + $0x8c] sm:$0xf]  ;;  %2573 = vmatpush.bf16.msrb.mxu1 %v5789_v32  ;;  %v5768_v40 = vld [vmem:[%s10906_s6 + $0x60] sm:$0xf] }
 0x16c   :  { %v5797_v38 = vor.u32 %v7054_v34, %v5794_v35  ;;  %2587 = vmatpush.bf16.msrb.mxu2 %v5793_v36  ;;  %v5729_v34 = vor.u32 %v7040_v29, %v5728_v28  ;;  %v7038_v35 = vld [vmem:[%s10906_s6 + $0xc] sm:$0xf]  ;;  %v5730_v36 = vld [vmem:[%s10906_s6 + $0x18] sm:$0xf0] }
 0x16d   :  { %v1830_v46 = vmax.f32 %v1823_v11, 0.0 }
 0x170   :  { %v1810_v44 = vpop.f32.mrf.mxu2 }
 0x171   :  { %v1811_v45 = vadd.f32 %v1810_v44, %v1797_v43  ;;  %v1824_v0 = vpop.f32.mrf.mxu3  ;;  %v7051_v43 = vld [vmem:[%s10906_s6 + $0x6c] sm:$0xf0]  ;;  %v7049_v44 = vld [vmem:[%s10906_s6 + $0x64] sm:$0xf] }
 0x172   :  { %v5769_v11 = vor.u32 %v7051_v43, %v5768_v40 }
 0x173   :  { %v1825_v15 = vadd.f32 %v1824_v0, %v1811_v45  ;;  %v5770_v45 = vld [vmem:[%s10906_s6 + $0x70] sm:$0xf0]  ;;  %v5776_v0 = vld [vmem:[%s10906_s6 + $0x68] sm:$0xf] }
 0x174   :  { %2560 = vmatpush.bf16.msrb.mxu0 %v5769_v11  ;;  %v6044_v11 = vld [vmem:[%s10909_s8 + $0x188] sm:$0xf] }
 0x175   :  { %v1834_v57 = vmax.f32 %v1825_v15, 0.0  ;;  %v7052_v15 = vld [vmem:[%s10906_s6 + $0x74] sm:$0xf0] }
 0x177   :  { %v1838_v47 = vpack.c.bf16 %v1834_v57, %v1830_v46  ;;  %v5773_v57 = vor.u32 %v7049_v44, %v5770_v45  ;;  %v7121_v45 = vld [vmem:[%s10909_s8 + $0x1a0] sm:$0xf0] }
 0x178   :  { %2561 = vmatpush.bf16.msrb.mxu0 %v5753_v59  ;;  %v7289_v59 = vld [vmem:[%s10909_s8 + $0x6e0] sm:$0xf0] }
 0x179   :  { %2279 = vmatmul.bf16.vlgmr.msrb.gmra.mxu3 %v1838_v47  ;;  %2574 = vmatpush.bf16.msrb.mxu1 %v5773_v57  ;;  %v6016_v57 = vld [vmem:[%s10909_s8 + $0x150] sm:$0xf] }
 0x17a   :  { %2598 = vmatpush.bf16.msrb.mxu3 %v5845_v60  ;;  %v7045_v60 = vld [vmem:[%s10906_s6 + $0x44] sm:$0xf] }
 0x17b   :  { %v5757_v3 = vor.u32 %v7045_v60, %v5754_v61 }
 0x17d   :  { %2575 = vmatpush.bf16.msrb.mxu1 %v5757_v3 }
 0x17e   :  { %2599 = vmatpush.bf16.msrb.mxu3 %v5829_v10  ;;  %v7043_v10 = vld [vmem:[%s10906_s6 + $0x2c] sm:$0xf0] }
 0x17f   :  { %v5737_v13 = vor.u32 %v7043_v10, %v5736_v9  ;;  %v7226_v9 = vld [vmem:[%s10909_s8 + $0x4e8] sm:$0xf0] }
 0x180   :  { %v2238_v37 = vpop.f32.mrf.mxu0 }
 0x181   :  { %v2239_v39 = vadd.f32 %v2238_v37, %v1905_v25  ;;  %v5744_v37 = vld [vmem:[%s10906_s6 + $0x28] sm:$0xf]  ;;  %2562 = vmatpush.bf16.msrb.mxu0 %v5737_v13  ;;  %2576 = vmatpush.bf16.msrb.mxu1 %v5741_v16  ;;  %v7100_v16 = vld [vmem:[%s10909_s8 + $0xf8] sm:$0xf0] }
 0x182   :  { %2600 = vmatpush.bf16.msrb.mxu3 %v5813_v24  ;;  %v7039_v24 = vld [vmem:[%s10906_s6 + $0xc] sm:$0xf0] }
 0x186   :  { %2601 = vmatpush.bf16.msrb.mxu3 %v5797_v38 }
 0x188   :  { %v2240_v50 = vpop.f32.mrf.mxu0 }
 0x189   :  { %2335 = vmatmul.bf16.vlgmr.msra.gmra.mxu3 %v1838_v47  ;;  %v5777_v47 = vor.u32 %v7052_v15, %v5776_v0  ;;  %v2241_v62 = vadd.f32 %v2240_v50, %v1905_v25  ;;  %v7037_v25 = vld [vmem:[%s10906_s6 + $0x4] sm:$0xf]  ;;  %v6268_v0 = vld [vmem:[%s10909_s8 + $0x348] sm:$0xf]  ;;  %v6045_v15 = vor.u32 %v7121_v45, %v6044_v11  ;;  %v6240_v50 = vld [vmem:[%s10909_s8 + $0x310] sm:$0xf] }
 0x18a   :  { %2602 = vmatpush.bf16.msrb.mxu3 %v5781_v52  ;;  %v5725_v33 = vor.u32 %v7037_v25, %v5722_v27  ;;  %v6492_v52 = vld [vmem:[%s10909_s8 + $0x508] sm:$0xf]  ;;  %v7275_v25 = vld [vmem:[%s10909_s8 + $0x670] sm:$0xf0]  ;;  %v7149_v11 = vld [vmem:[%s10909_s8 + $0x280] sm:$0xf0] }
 0x18b   :  { %2588 = vmatpush.bf16.msrb.mxu2 %v5777_v47  ;;  %v7114_v47 = vld [vmem:[%s10909_s8 + $0x168] sm:$0xf0] }
 0x18c   :  { %2577 = vmatpush.bf16.msrb.mxu1 %v5725_v33  ;;  %v6017_v55 = vor.u32 %v7114_v47, %v6016_v57  ;;  %v6408_v33 = vld [vmem:[%s10909_s8 + $0x460] sm:$0xf]  ;;  %v7205_v47 = vld [vmem:[%s10909_s8 + $0x440] sm:$0xf0] }
 0x18e   :  { %2603 = vmatpush.bf16.msrb.mxu3 %v5765_v8  ;;  %v7163_v8 = vld [vmem:[%s10909_s8 + $0x2f0] sm:$0xf0] }
 0x18f   :  { %v2252_v42 = vpop.f32.mrf.mxu1  ;;  %2589 = vmatpush.bf16.msrb.mxu2 %v5761_v7  ;;  %v6213_v30 = vor.u32 %v7163_v8, %v6212_v6  ;;  %v7079_v8 = vld [vmem:[%s10909_s8 + $0x50] sm:$0xf0] }
 0x190   :  { %v2253_v46 = vadd.f32 %v2252_v42, %v2239_v39  ;;  %v7044_v42 = vld [vmem:[%s10906_s6 + $0x34] sm:$0xf0]  ;;  %v5733_v39 = vor.u32 %v7038_v35, %v5730_v36 }
 0x191   :  { %v5745_v17 = vor.u32 %v7044_v42, %v5744_v37  ;;  %v7282_v37 = vld [vmem:[%s10909_s8 + $0x6a8] sm:$0xf0] }
 0x192   :  { %2604 = vmatpush.bf16.msrb.mxu3 %v5749_v20  ;;  %v6436_v20 = vld [vmem:[%s10909_s8 + $0x498] sm:$0xf] }
 0x193   :  { %2590 = vmatpush.bf16.msrb.mxu2 %v5745_v17 }
 0x196   :  { %2605 = vmatpush.bf16.msrb.mxu3 %v5733_v39  ;;  %v7093_v39 = vld [vmem:[%s10909_s8 + $0xc0] sm:$0xf0] }
 0x197   :  { %v2254_v51 = vpop.f32.mrf.mxu1  ;;  %2591 = vmatpush.bf16.msrb.mxu2 %v5729_v34  ;;  %v7212_v34 = vld [vmem:[%s10909_s8 + $0x478] sm:$0xf0] }
 0x198   :  { %v2255_v41 = vadd.f32 %v2254_v51, %v2241_v62  ;;  %v7170_v51 = vld [vmem:[%s10909_s8 + $0x328] sm:$0xf0]  ;;  %v6464_v62 = vld [vmem:[%s10909_s8 + $0x4d0] sm:$0xf] }
 0x199   :  { %v6241_v61 = vor.u32 %v7170_v51, %v6240_v50  ;;  %v6465_v13 = vor.u32 %v7226_v9, %v6464_v62  ;;  %v6100_v62 = vld [vmem:[%s10909_s8 + $0x1f8] sm:$0xf]  ;;  %v7135_v9 = vld [vmem:[%s10909_s8 + $0x210] sm:$0xf0] }
 0x1a0   :  { %v2294_v19 = vpop.f32.mrf.mxu0 }
 0x1a1   :  { %v2308_v31 = vpop.f32.mrf.mxu1  ;;  %v2295_v43 = vadd.f32 %v2294_v19, %v1906_v2  ;;  %v7156_v19 = vld [vmem:[%s10909_s8 + $0x2b8] sm:$0xf0] }
 0x1a2   :  { %v6185_v36 = vor.u32 %v7156_v19, %v6184_v18  ;;  %v7072_v19 = vld [vmem:[%s10909_s8 + $0x18] sm:$0xf0] }
 0x1a3   :  { %v2309_v44 = vadd.f32 %v2308_v31, %v2295_v43  ;;  %v7268_v43 = vld [vmem:[%s10909_s8 + $0x638] sm:$0xf0] }
 0x1a9   :  { %v2310_v7 = vpop.f32.mrf.mxu1 }
 0x1d2   :  { %v2266_v21 = vpop.f32.mrf.mxu2 }
 0x1d3   :  { %v2267_v53 = vadd.f32 %v2266_v21, %v2253_v46  ;;  %v5720_v21 = vld [vmem:[%s10906_s6] sm:$0xf]  ;;  %v7177_v46 = vld [vmem:[%s10909_s8 + $0x360] sm:$0xf0] }
 0x1d4   :  { %v5721_v26 = vor.u32 %v7039_v24, %v5720_v21  ;;  %v6269_v49 = vor.u32 %v7177_v46, %v6268_v0  ;;  %v7219_v21 = vld [vmem:[%s10909_s8 + $0x4b0] sm:$0xf0]  ;;  %v6660_v24 = vld [vmem:[%s10909_s8 + $0x658] sm:$0xf]  ;;  %v6409_v0 = vor.u32 %v7212_v34, %v6408_v33  ;;  %v6380_v46 = vld [vmem:[%s10909_s8 + $0x428] sm:$0xf] }
 0x1d5   :  { %v6437_v27 = vor.u32 %v7219_v21, %v6436_v20  ;;  %v6661_v28 = vor.u32 %v7275_v25, %v6660_v24  ;;  %v6072_v20 = vld [vmem:[%s10909_s8 + $0x1c0] sm:$0xf]  ;;  %v7128_v21 = vld [vmem:[%s10909_s8 + $0x1d8] sm:$0xf0]  ;;  %v7118_v24 = vld [vmem:[%s10909_s8 + $0x18c] sm:$0xf] }
 0x1d6   :  { %2563 = vmatpush.bf16.msrb.mxu0 %v5721_v26  ;;  %4062 = vmatpush.bf16.msra.mxu1 %v6269_v49  ;;  %v7261_v49 = vld [vmem:[%s10909_s8 + $0x600] sm:$0xf0]  ;;  %v6046_v25 = vld [vmem:[%s10909_s8 + $0x1a4] sm:$0xf0]  ;;  %v7184_v33 = vld [vmem:[%s10909_s8 + $0x398] sm:$0xf0] }
 0x1d7   :  { %v7230_v34 = vld [vmem:[%s10909_s8 + $0x50c] sm:$0xf] }
 0x1da   :  { %v2268_v56 = vpop.f32.mrf.mxu2  ;;  %4048 = vmatpush.bf16.msra.mxu0 %v6045_v15  ;;  %4063 = vmatpush.bf16.msra.mxu1 %v6241_v61  ;;  %v7198_v61 = vld [vmem:[%s10909_s8 + $0x408] sm:$0xf0] }
 0x1db   :  { %v2269_v22 = vadd.f32 %v2268_v56, %v2255_v41  ;;  %v7233_v56 = vld [vmem:[%s10909_s8 + $0x520] sm:$0xf0]  ;;  %v5960_v41 = vld [vmem:[%s10909_s8 + $0xe0] sm:$0xf] }
 0x1dc   :  { %v6493_v63 = vor.u32 %v7233_v56, %v6492_v52  ;;  %v5961_v31 = vor.u32 %v7100_v16, %v5960_v41  ;;  %v5904_v52 = vld [vmem:[%s10909_s8 + $0x70] sm:$0xf]  ;;  %v6381_v56 = vor.u32 %v7205_v47, %v6380_v46  ;;  %v7247_v41 = vld [vmem:[%s10909_s8 + $0x590] sm:$0xf0] }
 0x1dd   :  { %v7167_v46 = vld [vmem:[%s10909_s8 + $0x314] sm:$0xf] }
 0x1de   :  { %4076 = vmatpush.bf16.msra.mxu2 %v6493_v63  ;;  %4049 = vmatpush.bf16.msra.mxu0 %v6017_v55  ;;  %v7142_v55 = vld [vmem:[%s10909_s8 + $0x248] sm:$0xf0]  ;;  %v6576_v63 = vld [vmem:[%s10909_s8 + $0x5b0] sm:$0xf] }
 0x1df   :  { %4064 = vmatpush.bf16.msra.mxu1 %v6213_v30  ;;  %v5848_v30 = vld [vmem:[%s10909_s8] sm:$0xf] }
 0x1e2   :  { %v2322_v40 = vpop.f32.mrf.mxu2  ;;  %4077 = vmatpush.bf16.msra.mxu2 %v6465_v13  ;;  %4050 = vmatpush.bf16.msra.mxu0 %v5989_v23  ;;  %v7191_v23 = vld [vmem:[%s10909_s8 + $0x3d0] sm:$0xf0] }
 0x1e3   :  { %v2323_v48 = vadd.f32 %v2322_v40, %v2309_v44  ;;  %v6632_v40 = vld [vmem:[%s10909_s8 + $0x620] sm:$0xf]  ;;  %v6156_v44 = vld [vmem:[%s10909_s8 + $0x268] sm:$0xf]  ;;  %4065 = vmatpush.bf16.msra.mxu1 %v6185_v36  ;;  %v5849_v36 = vor.u32 %v7072_v19, %v5848_v30  ;;  %v7209_v19 = vld [vmem:[%s10909_s8 + $0x464] sm:$0xf] }
 0x1e4   :  { %v6633_v15 = vor.u32 %v7268_v43, %v6632_v40  ;;  %v6157_v51 = vor.u32 %v7149_v11, %v6156_v44  ;;  %v6494_v40 = vld [vmem:[%s10909_s8 + $0x524] sm:$0xf0]  ;;  %v7286_v43 = vld [vmem:[%s10909_s8 + $0x6cc] sm:$0xf]  ;;  %v6049_v11 = vor.u32 %v7118_v24, %v6046_v25  ;;  %v6634_v25 = vld [vmem:[%s10909_s8 + $0x63c] sm:$0xf0] }
 0x1e5   :  { %v6718_v44 = vld [vmem:[%s10909_s8 + $0x6e4] sm:$0xf0] }
 0x1e6   :  { %4078 = vmatpush.bf16.msra.mxu2 %v6437_v27  ;;  %4051 = vmatpush.bf16.msra.mxu0 %v5961_v31  ;;  %v6270_v31 = vld [vmem:[%s10909_s8 + $0x364] sm:$0xf0] }
 0x1e7   :  { %4066 = vmatpush.bf16.msra.mxu1 %v6157_v51  ;;  %v7223_v51 = vld [vmem:[%s10909_s8 + $0x4d4] sm:$0xf]  ;;  %v6158_v30 = vld [vmem:[%s10909_s8 + $0x284] sm:$0xf0] }
 0x1ea   :  { %v2324_v42 = vpop.f32.mrf.mxu2  ;;  %4079 = vmatpush.bf16.msra.mxu2 %v6409_v0  ;;  %v7111_v0 = vld [vmem:[%s10909_s8 + $0x154] sm:$0xf] }
 0x1ee   :  { %4080 = vmatpush.bf16.msra.mxu2 %v6381_v56 }
 0x1fc   :  { %v2280_v58 = vpop.f32.mrf.mxu3 }
 0x1fd   :  { %v9391_v1 = vadd.f32 %v2280_v58, %v2267_v53  ;;  %v2296_v53 = vpop.f32.mrf.mxu0  ;;  %v6716_v58 = vld [vmem:[%s10909_s8 + $0x6c8] sm:$0xf] }
 0x1fe   :  { %v6717_v3 = vor.u32 %v7289_v59, %v6716_v58  ;;  %v2297_v10 = vadd.f32 %v2296_v53, %v1906_v2  ;;  %v6689_v2 = vor.u32 %v7282_v37, %v6688_v14  ;;  %v7086_v53 = vld [vmem:[%s10909_s8 + $0x88] sm:$0xf0]  ;;  %v6352_v59 = vld [vmem:[%s10909_s8 + $0x3f0] sm:$0xf]  ;;  %v6324_v14 = vld [vmem:[%s10909_s8 + $0x3b8] sm:$0xf] }
 0x1ff   :  { %4526 = vst [vmem:[%s10908_s11] sm:$0xff] %v9391_v1 }
 0x200   :  { %4090 = vmatpush.bf16.msra.mxu3 %v6717_v3  ;;  %v2311_v17 = vadd.f32 %v2310_v7, %v2297_v10  ;;  %v7254_v3 = vld [vmem:[%s10909_s8 + $0x5c8] sm:$0xf0]  ;;  %v5876_v7 = vld [vmem:[%s10909_s8 + $0x38] sm:$0xf] }
 0x201   :  { %v2348_v10 = vld [vmem:[%s10910_s1 + $0x8] sm:$0xff]  ;;  %v6577_v13 = vor.u32 %v7254_v3, %v6576_v63 }
 0x204   :  { %v2282_v32 = vpop.f32.mrf.mxu3  ;;  %4091 = vmatpush.bf16.msra.mxu3 %v6689_v2  ;;  %v6548_v2 = vld [vmem:[%s10909_s8 + $0x578] sm:$0xf] }
 0x205   :  { %v9455_v38 = vadd.f32 %v2282_v32, %v2269_v22  ;;  %v2325_v22 = vadd.f32 %v2324_v42, %v2311_v17  ;;  %v5932_v32 = vld [vmem:[%s10909_s8 + $0xa8] sm:$0xf]  ;;  %v5877_v42 = vor.u32 %v7079_v8, %v5876_v7  ;;  %v6101_v17 = vor.u32 %v7135_v9, %v6100_v62  ;;  %v5962_v7 = vld [vmem:[%s10909_s8 + $0xfc] sm:$0xf0]  ;;  %v7153_v8 = vld [vmem:[%s10909_s8 + $0x2a4] sm:$0xf] }
 0x206   :  { %v5933_v57 = vor.u32 %v7093_v39, %v5932_v32  ;;  %v6549_v27 = vor.u32 %v7247_v41, %v6548_v2  ;;  %v6296_v32 = vld [vmem:[%s10909_s8 + $0x380] sm:$0xf]  ;;  %v6073_v39 = vor.u32 %v7128_v21, %v6072_v20  ;;  %v7090_v2 = vld [vmem:[%s10909_s8 + $0xac] sm:$0xf]  ;;  %v5934_v41 = vld [vmem:[%s10909_s8 + $0xc4] sm:$0xf0] }
 0x207   :  { %4528 = vst [vmem:[%s10908_s11 + $0x10] sm:$0xff] %v9455_v38  ;;  %v6297_v47 = vor.u32 %v7184_v33, %v6296_v32  ;;  %v6186_v62 = vld [vmem:[%s10909_s8 + $0x2bc] sm:$0xf0]  ;;  %v7265_v21 = vld [vmem:[%s10909_s8 + $0x624] sm:$0xf] }
 0x208   :  { %4092 = vmatpush.bf16.msra.mxu3 %v6661_v28  ;;  %4052 = vmatpush.bf16.msra.mxu0 %v5933_v57  ;;  %v6242_v57 = vld [vmem:[%s10909_s8 + $0x32c] sm:$0xf0]  ;;  %v6410_v20 = vld [vmem:[%s10909_s8 + $0x47c] sm:$0xf0]  ;;  %v7202_v33 = vld [vmem:[%s10909_s8 + $0x42c] sm:$0xf] }
 0x209   :  { %v6245_v56 = vor.u32 %v7167_v46, %v6242_v57  ;;  %v6413_v24 = vor.u32 %v7209_v19, %v6410_v20  ;;  %v7251_v46 = vld [vmem:[%s10909_s8 + $0x5b4] sm:$0xf]  ;;  %v7178_v19 = vld [vmem:[%s10909_s8 + $0x368] sm:$0xf0] }
 0x20c   :  { %v2336_v54 = vpop.f32.mrf.mxu3  ;;  %4093 = vmatpush.bf16.msra.mxu3 %v6633_v15  ;;  %v6018_v15 = vld [vmem:[%s10909_s8 + $0x16c] sm:$0xf0] }
 0x20d   :  { %v2337_v60 = vadd.f32 %v2336_v54, %v2323_v48  ;;  %v6604_v48 = vld [vmem:[%s10909_s8 + $0x5e8] sm:$0xf]  ;;  %v6128_v54 = vld [vmem:[%s10909_s8 + $0x230] sm:$0xf] }
 0x20e   :  { %v6605_v58 = vor.u32 %v7261_v49, %v6604_v48  ;;  %v6129_v6 = vor.u32 %v7142_v55, %v6128_v54  ;;  %v6497_v49 = vor.u32 %v7230_v34, %v6494_v40  ;;  %v6690_v54 = vld [vmem:[%s10909_s8 + $0x6ac] sm:$0xf0]  ;;  %v6021_v55 = vor.u32 %v7111_v0, %v6018_v15  ;;  %v7258_v34 = vld [vmem:[%s10909_s8 + $0x5ec] sm:$0xf]  ;;  %v5878_v40 = vld [vmem:[%s10909_s8 + $0x54] sm:$0xf0] }
 0x20f   :  { %v2341_v12 = vmul.f32 0.5, %v2337_v60  ;;  %4527 = vst [vmem:[%s10908_s11 + $0x8] sm:$0xff] %v2337_v60  ;;  %v5905_v60 = vor.u32 %v7086_v53, %v5904_v52  ;;  %v6466_v52 = vld [vmem:[%s10909_s8 + $0x4ec] sm:$0xf0]  ;;  %v7279_v53 = vld [vmem:[%s10909_s8 + $0x694] sm:$0xf] }
 0x210   :  { %4094 = vmatpush.bf16.msra.mxu3 %v6605_v58  ;;  %4067 = vmatpush.bf16.msra.mxu1 %v6129_v6  ;;  %v7104_v58 = vld [vmem:[%s10909_s8 + $0x11c] sm:$0xf]  ;;  %v6469_v63 = vor.u32 %v7223_v51, %v6466_v52  ;;  %v6693_v3 = vor.u32 %v7279_v53, %v6690_v54  ;;  %v7097_v6 = vld [vmem:[%s10909_s8 + $0xe4] sm:$0xf]  ;;  %v7195_v0 = vld [vmem:[%s10909_s8 + $0x3f4] sm:$0xf] }
 0x211   :  { %v2343_v26 = vmul.f32 1.442695, %v2341_v12  ;;  %v6353_v12 = vor.u32 %v7198_v61, %v6352_v59  ;;  %4053 = vmatpush.bf16.msra.mxu0 %v5905_v60  ;;  %v5990_v59 = vld [vmem:[%s10909_s8 + $0x134] sm:$0xf0]  ;;  %v7160_v60 = vld [vmem:[%s10909_s8 + $0x2dc] sm:$0xf]  ;;  %v5965_v9 = vor.u32 %v7097_v6, %v5962_v7 }
 0x212   :  { %v6214_v61 = vld [vmem:[%s10909_s8 + $0x2f4] sm:$0xf0]  ;;  %v6354_v15 = vld [vmem:[%s10909_s8 + $0x40c] sm:$0xf0]  ;;  %v7125_v51 = vld [vmem:[%s10909_s8 + $0x1c4] sm:$0xf] }
 0x213   :  { %7293 = vpow2.f32 %v2343_v26  ;;  %4081 = vmatpush.bf16.msra.mxu2 %v6353_v12  ;;  %v6325_v26 = vor.u32 %v7191_v23, %v6324_v14  ;;  %v7216_v12 = vld [vmem:[%s10909_s8 + $0x49c] sm:$0xf]  ;;  %v6357_v57 = vor.u32 %v7195_v0, %v6354_v15  ;;  %v6074_v53 = vld [vmem:[%s10909_s8 + $0x1dc] sm:$0xf0] }
 0x214   :  { %v2338_v29 = vpop.f32.mrf.mxu3  ;;  %4095 = vmatpush.bf16.msra.mxu3 %v6577_v13  ;;  %4068 = vmatpush.bf16.msra.mxu1 %v6101_v17  ;;  %v6438_v13 = vld [vmem:[%s10909_s8 + $0x4b4] sm:$0xf0]  ;;  %v7272_v14 = vld [vmem:[%s10909_s8 + $0x65c] sm:$0xf]  ;;  %v7146_v17 = vld [vmem:[%s10909_s8 + $0x26c] sm:$0xf]  ;;  %v6077_v54 = vor.u32 %v7125_v51, %v6074_v53 }
 0x215   :  { %v2339_v35 = vadd.f32 %v2338_v29, %v2325_v22  ;;  %v7174_v22 = vld [vmem:[%s10909_s8 + $0x34c] sm:$0xf]  ;;  %4054 = vmatpush.bf16.msra.mxu0 %v5877_v42  ;;  %v6662_v42 = vld [vmem:[%s10909_s8 + $0x674] sm:$0xf0]  ;;  %v6522_v6 = vld [vmem:[%s10909_s8 + $0x55c] sm:$0xf0] }
 0x216   :  { %v6665_v23 = vor.u32 %v7272_v14, %v6662_v42 }
 0x217   :  { %v2342_v45 = vmul.f32 0.5, %v2339_v35  ;;  %4529 = vst [vmem:[%s10908_s11 + $0x18] sm:$0xff] %v2339_v35  ;;  %4082 = vmatpush.bf16.msra.mxu2 %v6325_v26  ;;  %v7083_v26 = vld [vmem:[%s10909_s8 + $0x74] sm:$0xf] }
 0x218   :  { %4096 = vmatpush.bf16.msra.mxu3 %v6549_v27  ;;  %4069 = vmatpush.bf16.msra.mxu1 %v6073_v39  ;;  %v5906_v27 = vld [vmem:[%s10909_s8 + $0x8c] sm:$0xf0]  ;;  %v7076_v39 = vld [vmem:[%s10909_s8 + $0x3c] sm:$0xf] }
 0x219   :  { %v2345_v50 = vmul.f32 1.442695, %v2342_v45  ;;  %v7294_v4 = vpop.eup %7293  ;;  %v6273_v45 = vor.u32 %v7174_v22, %v6270_v31  ;;  %4055 = vmatpush.bf16.msra.mxu0 %v5849_v36  ;;  %v6637_v22 = vor.u32 %v7265_v21, %v6634_v25  ;;  %v6130_v31 = vld [vmem:[%s10909_s8 + $0x24c] sm:$0xf0] }
 0x21a   :  { %v2349_v37 = vmul.f32 %v7294_v4, %v2347_v5  ;;  %v5993_v4 = vor.u32 %v7104_v58, %v5990_v59  ;;  %v6217_v5 = vor.u32 %v7160_v60, %v6214_v61  ;;  %v7244_v58 = vld [vmem:[%s10909_s8 + $0x57c] sm:$0xf]  ;;  %v6550_v59 = vld [vmem:[%s10909_s8 + $0x594] sm:$0xf0] }
 0x21b   :  { %7295 = vpow2.f32 %v2345_v50  ;;  %v6721_v50 = vor.u32 %v7286_v43, %v6718_v44  ;;  %4083 = vmatpush.bf16.msra.mxu2 %v6297_v47  ;;  %v7132_v43 = vld [vmem:[%s10909_s8 + $0x1fc] sm:$0xf]  ;;  %v5881_v44 = vor.u32 %v7076_v39, %v5878_v40  ;;  %v6578_v47 = vld [vmem:[%s10909_s8 + $0x5cc] sm:$0xf0]  ;;  %v6553_v61 = vor.u32 %v7244_v58, %v6550_v59  ;;  %v6472_v58 = vld [vmem:[%s10909_s8 + $0x4d8] sm:$0xf] }
 0x21c   :  { %v2351_v28 = vadd.f32 %v2349_v37, %v9391_v1  ;;  %v6520_v1 = vld [vmem:[%s10909_s8 + $0x540] sm:$0xf]  ;;  %v6441_v37 = vor.u32 %v7216_v12, %v6438_v13  ;;  %v7227_v59 = vld [vmem:[%s10909_s8 + $0x4f0] sm:$0xf0] }
 0x221   :  { %v7296_v16 = vpop.eup %7295 }
 0x222   :  { %v2350_v18 = vmul.f32 %v7296_v16, %v2348_v10  ;;  %v6189_v10 = vor.u32 %v7153_v8, %v6186_v62  ;;  %v5937_v16 = vor.u32 %v7090_v2, %v5934_v41  ;;  %v2386_v8 = vld [vmem:[%s10911_s7] sm:$0xf]  ;;  %v6052_v41 = vld [vmem:[%s10909_s8 + $0x190] sm:$0xf] }
 0x223   :  { %v2389_v12 = vperm.slane %v2386_v8, 1  ;;  %v2390_v20 = vperm.slane %v2386_v8, 2  ;;  %v2391_v21 = vperm.slane %v2386_v8, 3 }
 0x224   :  { %v2352_v29 = vadd.f32 %v2350_v18, %v9455_v38  ;;  %v7240_v38 = vld [vmem:[%s10909_s8 + $0x558] sm:$0xf0]  ;;  %v6161_v18 = vor.u32 %v7146_v17, %v6158_v30  ;;  %v7122_v30 = vld [vmem:[%s10909_s8 + $0x1a8] sm:$0xf0] }
 0x225   :  { %v6521_v48 = vor.u32 %v7240_v38, %v6520_v1  ;;  %v6382_v1 = vld [vmem:[%s10909_s8 + $0x444] sm:$0xf0] }
 0x226   :  { %v2353_v35 = vpack.c.bf16 %v2352_v29, %v2351_v28  ;;  %v7139_v28 = vld [vmem:[%s10909_s8 + $0x234] sm:$0xf]  ;;  %v5909_v29 = vor.u32 %v7083_v26, %v5906_v27  ;;  %v6385_v38 = vor.u32 %v7202_v33, %v6382_v1  ;;  %v6053_v27 = vor.u32 %v7122_v30, %v6052_v41  ;;  %v6248_v1 = vld [vmem:[%s10909_s8 + $0x318] sm:$0xf]  ;;  %v6164_v41 = vld [vmem:[%s10909_s8 + $0x270] sm:$0xf] }
 0x227   :  { %4097 = vmatpush.bf16.msra.mxu3 %v6521_v48  ;;  %v6133_v32 = vor.u32 %v7139_v28, %v6130_v31  ;;  %v6581_v48 = vor.u32 %v7251_v46, %v6578_v47  ;;  %v7115_v31 = vld [vmem:[%s10909_s8 + $0x170] sm:$0xf0]  ;;  %v7290_v46 = vld [vmem:[%s10909_s8 + $0x6e8] sm:$0xf0]  ;;  %v7108_v47 = vld [vmem:[%s10909_s8 + $0x138] sm:$0xf0] }
 0x228   :  { %2564 = vmatmul.bf16.vlgmr.msrb.gmra.mxu0 %v2353_v35  ;;  %2578 = vmatmul.bf16.vlgmr.msrb.gmra.mxu1 %v2353_v35 }
 0x229   :  { %2592 = vmatmul.bf16.vlgmr.msrb.gmra.mxu2 %v2353_v35  ;;  %2606 = vmatmul.bf16.vlgmr.msrb.gmra.mxu3 %v2353_v35  ;;  %v6606_v35 = vld [vmem:[%s10909_s8 + $0x604] sm:$0xf0] }
 0x22a   :  { %4104 = vmatpush.bf16.msrb.mxu0 %v6049_v11  ;;  %4118 = vmatpush.bf16.msrb.mxu1 %v6273_v45  ;;  %v6609_v36 = vor.u32 %v7258_v34, %v6606_v35  ;;  %v6102_v11 = vld [vmem:[%s10909_s8 + $0x214] sm:$0xf0] }
 0x22b   :  { %4132 = vmatpush.bf16.msrb.mxu2 %v6497_v49  ;;  %4146 = vmatpush.bf16.msrb.mxu3 %v6721_v50  ;;  %v6105_v45 = vor.u32 %v7132_v43, %v6102_v11  ;;  %v7069_v49 = vld [vmem:[%s10909_s8 + $0x4] sm:$0xf]  ;;  %v5850_v50 = vld [vmem:[%s10909_s8 + $0x1c] sm:$0xf0]  ;;  %v6500_v43 = vld [vmem:[%s10909_s8 + $0x510] sm:$0xf] }
 0x22c   :  { %v5853_v52 = vor.u32 %v7069_v49, %v5850_v50  ;;  %v6724_v11 = vld [vmem:[%s10909_s8 + $0x6d0] sm:$0xf]  ;;  %v7164_v49 = vld [vmem:[%s10909_s8 + $0x2f8] sm:$0xf0] }
 0x22e   :  { %4105 = vmatpush.bf16.msrb.mxu0 %v6021_v55  ;;  %4119 = vmatpush.bf16.msrb.mxu1 %v6245_v56  ;;  %v7188_v55 = vld [vmem:[%s10909_s8 + $0x3bc] sm:$0xf]  ;;  %v6326_v56 = vld [vmem:[%s10909_s8 + $0x3d4] sm:$0xf0] }
 0x22f   :  { %4133 = vmatpush.bf16.msrb.mxu2 %v6469_v63  ;;  %4147 = vmatpush.bf16.msrb.mxu3 %v6693_v3  ;;  %v6329_v60 = vor.u32 %v7188_v55, %v6326_v56  ;;  %v7181_v63 = vld [vmem:[%s10909_s8 + $0x384] sm:$0xf]  ;;  %v6298_v3 = vld [vmem:[%s10909_s8 + $0x39c] sm:$0xf0]  ;;  %v6725_v55 = vor.u32 %v7290_v46, %v6724_v11  ;;  %v7136_v11 = vld [vmem:[%s10909_s8 + $0x218] sm:$0xf0] }
 0x230   :  { %v7199_v46 = vld [vmem:[%s10909_s8 + $0x410] sm:$0xf0] }
 0x232   :  { %4106 = vmatpush.bf16.msrb.mxu0 %v5993_v4  ;;  %4120 = vmatpush.bf16.msrb.mxu1 %v6217_v5  ;;  %v6301_v4 = vor.u32 %v7181_v63, %v6298_v3  ;;  %v7237_v5 = vld [vmem:[%s10909_s8 + $0x544] sm:$0xf]  ;;  %v6696_v3 = vld [vmem:[%s10909_s8 + $0x698] sm:$0xf] }
 0x233   :  { %4134 = vmatpush.bf16.msrb.mxu2 %v6441_v37  ;;  %4148 = vmatpush.bf16.msrb.mxu3 %v6665_v23  ;;  %v6525_v7 = vor.u32 %v7237_v5, %v6522_v6  ;;  %v5968_v5 = vld [vmem:[%s10909_s8 + $0xe8] sm:$0xf]  ;;  %v7101_v6 = vld [vmem:[%s10909_s8 + $0x100] sm:$0xf0] }
 0x236   :  { %4107 = vmatpush.bf16.msrb.mxu0 %v5965_v9  ;;  %4121 = vmatpush.bf16.msrb.mxu1 %v6189_v10  ;;  %v2388_v10 = vperm.slane %v2386_v8, 0  ;;  %v7157_v8 = vld [vmem:[%s10909_s8 + $0x2c0] sm:$0xf0] }
 0x237   :  { %4135 = vmatpush.bf16.msrb.mxu2 %v6413_v24  ;;  %4149 = vmatpush.bf16.msrb.mxu3 %v6637_v22 }
 0x23a   :  { %4108 = vmatpush.bf16.msrb.mxu0 %v5937_v16  ;;  %4122 = vmatpush.bf16.msrb.mxu1 %v6161_v18  ;;  %v6276_v18 = vld [vmem:[%s10909_s8 + $0x350] sm:$0xf] }
 0x23b   :  { %4136 = vmatpush.bf16.msrb.mxu2 %v6385_v38  ;;  %4150 = vmatpush.bf16.msrb.mxu3 %v6609_v36  ;;  %v6277_v28 = vor.u32 %v7178_v19, %v6276_v18  ;;  %v7171_v38 = vld [vmem:[%s10909_s8 + $0x330] sm:$0xf0]  ;;  %v6416_v18 = vld [vmem:[%s10909_s8 + $0x468] sm:$0xf]  ;;  %v7213_v19 = vld [vmem:[%s10909_s8 + $0x480] sm:$0xf0] }
 0x23c   :  { %v6249_v15 = vor.u32 %v7171_v38, %v6248_v1  ;;  %v6388_v1 = vld [vmem:[%s10909_s8 + $0x430] sm:$0xf]  ;;  %v7206_v38 = vld [vmem:[%s10909_s8 + $0x448] sm:$0xf0] }
 0x23e   :  { %4109 = vmatpush.bf16.msrb.mxu0 %v5909_v29  ;;  %4123 = vmatpush.bf16.msrb.mxu1 %v6133_v32  ;;  %v6024_v29 = vld [vmem:[%s10909_s8 + $0x158] sm:$0xf] }
 0x23f   :  { %4137 = vmatpush.bf16.msrb.mxu2 %v6357_v57  ;;  %4151 = vmatpush.bf16.msrb.mxu3 %v6581_v48  ;;  %v6025_v40 = vor.u32 %v7115_v31, %v6024_v29  ;;  %v5996_v57 = vld [vmem:[%s10909_s8 + $0x120] sm:$0xf]  ;;  %v6417_v29 = vor.u32 %v7213_v19, %v6416_v18  ;;  %v7287_v18 = vld [vmem:[%s10909_s8 + $0x6d4] sm:$0xf]  ;;  %v6726_v19 = vld [vmem:[%s10909_s8 + $0x6ec] sm:$0xf0] }
 0x240   :  { %v6220_v48 = vld [vmem:[%s10909_s8 + $0x2e0] sm:$0xf]  ;;  %v5997_v56 = vor.u32 %v7108_v47, %v5996_v57  ;;  %v6584_v57 = vld [vmem:[%s10909_s8 + $0x5b8] sm:$0xf]  ;;  %v7255_v47 = vld [vmem:[%s10909_s8 + $0x5d0] sm:$0xf0] }
 0x241   :  { %v6221_v63 = vor.u32 %v7164_v49, %v6220_v48 }
 0x242   :  { %4110 = vmatpush.bf16.msrb.mxu0 %v5881_v44  ;;  %4124 = vmatpush.bf16.msrb.mxu1 %v6105_v45  ;;  %v7234_v44 = vld [vmem:[%s10909_s8 + $0x528] sm:$0xf0] }
 0x243   :  { %4138 = vmatpush.bf16.msrb.mxu2 %v6329_v60  ;;  %4152 = vmatpush.bf16.msrb.mxu3 %v6553_v61 }
 0x246   :  { %4111 = vmatpush.bf16.msrb.mxu0 %v5853_v52  ;;  %4125 = vmatpush.bf16.msrb.mxu1 %v6077_v54  ;;  %v6501_v54 = vor.u32 %v7234_v44, %v6500_v43  ;;  %v7080_v43 = vld [vmem:[%s10909_s8 + $0x58] sm:$0xf0]  ;;  %v6108_v44 = vld [vmem:[%s10909_s8 + $0x200] sm:$0xf] }
 0x247   :  { %4139 = vmatpush.bf16.msrb.mxu2 %v6301_v4  ;;  %4153 = vmatpush.bf16.msrb.mxu3 %v6525_v7  ;;  %v7283_v4 = vld [vmem:[%s10909_s8 + $0x6b0] sm:$0xf0]  ;;  %v6192_v7 = vld [vmem:[%s10909_s8 + $0x2a8] sm:$0xf]  ;;  %v6109_v49 = vor.u32 %v7136_v11, %v6108_v44  ;;  %v7154_v44 = vld [vmem:[%s10909_s8 + $0x2ac] sm:$0xf] }
 0x248   :  { %v6194_v11 = vld [vmem:[%s10909_s8 + $0x2c4] sm:$0xf0] }
 0x2a5   :  { %v2565_v62 = vpop.f32.mrf.mxu0  ;;  %v2579_v9 = vpop.f32.mrf.mxu1 }
 0x2a6   :  { %v2566_v13 = vadd.f32 %v2565_v62, %v2388_v10  ;;  %v2580_v14 = vadd.f32 %v2579_v9, %v2389_v12  ;;  %v6473_v62 = vor.u32 %v7227_v59, %v6472_v58  ;;  %v6697_v9 = vor.u32 %v7283_v4, %v6696_v3  ;;  %v7175_v59 = vld [vmem:[%s10909_s8 + $0x354] sm:$0xf]  ;;  %v6332_v3 = vld [vmem:[%s10909_s8 + $0x3c0] sm:$0xf]  ;;  %v7192_v4 = vld [vmem:[%s10909_s8 + $0x3d8] sm:$0xf0] }
 0x2a7   :  { %v6585_v58 = vor.u32 %v7255_v47, %v6584_v57  ;;  %v7273_v57 = vld [vmem:[%s10909_s8 + $0x664] sm:$0xf]  ;;  %v6670_v47 = vld [vmem:[%s10909_s8 + $0x67c] sm:$0xf0] }
 0x2a8   :  { %v2612_v24 = vmax.f32 %v2566_v13, 0.0  ;;  %v2613_v25 = vmax.f32 %v2580_v14, 0.0  ;;  %v6193_v13 = vor.u32 %v7157_v8, %v6192_v7  ;;  %v7220_v14 = vld [vmem:[%s10909_s8 + $0x4b8] sm:$0xf0] }
 0x2ac   :  { %v2593_v37 = vpop.f32.mrf.mxu2  ;;  %v2607_v42 = vpop.f32.mrf.mxu3 }
 0x2ad   :  { %v2567_v23 = vpop.f32.mrf.mxu0  ;;  %v2581_v2 = vpop.f32.mrf.mxu1  ;;  %v2594_v34 = vadd.f32 %v2593_v37, %v2390_v20  ;;  %v2608_v35 = vadd.f32 %v2607_v42, %v2391_v21  ;;  %v6668_v37 = vld [vmem:[%s10909_s8 + $0x660] sm:$0xf]  ;;  %v7276_v42 = vld [vmem:[%s10909_s8 + $0x678] sm:$0xf0] }
 0x2ae   :  { %v2568_v16 = vadd.f32 %v2567_v23, %v2388_v10  ;;  %v2582_v17 = vadd.f32 %v2581_v2, %v2389_v12  ;;  %v6444_v10 = vld [vmem:[%s10909_s8 + $0x4a0] sm:$0xf]  ;;  %v5969_v12 = vor.u32 %v7101_v6, %v5968_v5  ;;  %v5940_v23 = vld [vmem:[%s10909_s8 + $0xb0] sm:$0xf]  ;;  %v7094_v2 = vld [vmem:[%s10909_s8 + $0xc8] sm:$0xf0]  ;;  %v6669_v30 = vor.u32 %v7276_v42, %v6668_v37 }
 0x2af   :  { %v2614_v50 = vmax.f32 %v2594_v34, 0.0  ;;  %v2615_v51 = vmax.f32 %v2608_v35, 0.0  ;;  %v6612_v34 = vld [vmem:[%s10909_s8 + $0x5f0] sm:$0xf]  ;;  %v7262_v35 = vld [vmem:[%s10909_s8 + $0x608] sm:$0xf0] }
 0x2b0   :  { %v2616_v22 = vmax.f32 %v2568_v16, 0.0  ;;  %v2617_v26 = vmax.f32 %v2582_v17, 0.0  ;;  %v7150_v16 = vld [vmem:[%s10909_s8 + $0x288] sm:$0xf0]  ;;  %v6445_v17 = vor.u32 %v7220_v14, %v6444_v10  ;;  %v6556_v5 = vld [vmem:[%s10909_s8 + $0x580] sm:$0xf]  ;;  %v6333_v14 = vor.u32 %v7192_v4, %v6332_v3 }
 0x2b1   :  { %v7248_v6 = vld [vmem:[%s10909_s8 + $0x598] sm:$0xf0]  ;;  %v6250_v42 = vld [vmem:[%s10909_s8 + $0x334] sm:$0xf0] }
 0x2b2   :  { %v9884_v32 = vpack.c.bf16 %v2616_v22, %v2612_v24  ;;  %v9886_v33 = vpack.c.bf16 %v2617_v26, %v2613_v25  ;;  %v5941_v24 = vor.u32 %v7094_v2, %v5940_v23  ;;  %v6165_v25 = vor.u32 %v7150_v16, %v6164_v41  ;;  %v5912_v22 = vld [vmem:[%s10909_s8 + $0x78] sm:$0xf]  ;;  %v7087_v26 = vld [vmem:[%s10909_s8 + $0x90] sm:$0xf0]  ;;  %v7112_v10 = vld [vmem:[%s10909_s8 + $0x15c] sm:$0xf] }
 0x2b3   :  { %v6557_v37 = vor.u32 %v7248_v6, %v6556_v5  ;;  %v6304_v23 = vld [vmem:[%s10909_s8 + $0x388] sm:$0xf]  ;;  %v7185_v2 = vld [vmem:[%s10909_s8 + $0x3a0] sm:$0xf0]  ;;  %v7084_v5 = vld [vmem:[%s10909_s8 + $0x7c] sm:$0xf] }
 0x2b4   :  { %v2595_v36 = vpop.f32.mrf.mxu2  ;;  %v2609_v39 = vpop.f32.mrf.mxu3  ;;  %4056 = vmatmul.bf16.vlgmr.msra.gmra.mxu0 %v9884_v32  ;;  %4070 = vmatmul.bf16.vlgmr.msra.gmra.mxu1 %v9886_v33  ;;  %v6528_v41 = vld [vmem:[%s10909_s8 + $0x548] sm:$0xf]  ;;  %v7241_v16 = vld [vmem:[%s10909_s8 + $0x560] sm:$0xf0]  ;;  %v5914_v6 = vld [vmem:[%s10909_s8 + $0x94] sm:$0xf0] }
 0x2b5   :  { %v2596_v45 = vadd.f32 %v2595_v36, %v2390_v20  ;;  %v2610_v0 = vadd.f32 %v2609_v39, %v2391_v21  ;;  %4160 = vmatpush.bf16.msra.mxu0 %v6053_v27  ;;  %4174 = vmatpush.bf16.msra.mxu1 %v6277_v28  ;;  %v6640_v20 = vld [vmem:[%s10909_s8 + $0x628] sm:$0xf]  ;;  %v7269_v21 = vld [vmem:[%s10909_s8 + $0x640] sm:$0xf0]  ;;  %v6136_v27 = vld [vmem:[%s10909_s8 + $0x238] sm:$0xf]  ;;  %v5913_v36 = vor.u32 %v7087_v26, %v5912_v22 }
 0x2b6   :  { %v7143_v28 = vld [vmem:[%s10909_s8 + $0x250] sm:$0xf0]  ;;  %v6641_v31 = vor.u32 %v7269_v21, %v6640_v20  ;;  %v6529_v22 = vor.u32 %v7241_v16, %v6528_v41  ;;  %v5998_v26 = vld [vmem:[%s10909_s8 + $0x13c] sm:$0xf0]  ;;  %v7133_v41 = vld [vmem:[%s10909_s8 + $0x204] sm:$0xf] }
 0x2b7   :  { %v2618_v52 = vmax.f32 %v2596_v45, 0.0  ;;  %v2619_v53 = vmax.f32 %v2610_v0, 0.0  ;;  %v6137_v39 = vor.u32 %v7143_v28, %v6136_v27  ;;  %v6389_v45 = vor.u32 %v7206_v38, %v6388_v1  ;;  %v7161_v27 = vld [vmem:[%s10909_s8 + $0x2e4] sm:$0xf]  ;;  %v6222_v28 = vld [vmem:[%s10909_s8 + $0x2fc] sm:$0xf0] }
 0x2b8   :  { %v6613_v0 = vor.u32 %v7262_v35, %v6612_v34  ;;  %v7224_v1 = vld [vmem:[%s10909_s8 + $0x4dc] sm:$0xf]  ;;  %v6474_v38 = vld [vmem:[%s10909_s8 + $0x4f4] sm:$0xf0]  ;;  %v6110_v16 = vld [vmem:[%s10909_s8 + $0x21c] sm:$0xf0] }
 0x2b9   :  { %v9926_v60 = vpack.c.bf16 %v2618_v52, %v2614_v50  ;;  %v9928_v61 = vpack.c.bf16 %v2619_v53, %v2615_v51  ;;  %4161 = vmatpush.bf16.msra.mxu0 %v6025_v40  ;;  %4175 = vmatpush.bf16.msra.mxu1 %v6249_v15  ;;  %v5884_v40 = vld [vmem:[%s10909_s8 + $0x40] sm:$0xf]  ;;  %v6360_v15 = vld [vmem:[%s10909_s8 + $0x3f8] sm:$0xf]  ;;  %v5856_v50 = vld [vmem:[%s10909_s8 + $0x8] sm:$0xf] }
 0x2ba   :  { %v5885_v48 = vor.u32 %v7080_v43, %v5884_v40  ;;  %v7073_v51 = vld [vmem:[%s10909_s8 + $0x20] sm:$0xf0]  ;;  %v6080_v52 = vld [vmem:[%s10909_s8 + $0x1c8] sm:$0xf]  ;;  %v7280_v34 = vld [vmem:[%s10909_s8 + $0x69c] sm:$0xf] }
 0x2bb   :  { %4084 = vmatmul.bf16.vlgmr.msra.gmra.mxu2 %v9926_v60  ;;  %4098 = vmatmul.bf16.vlgmr.msra.gmra.mxu3 %v9928_v61  ;;  %v7129_v53 = vld [vmem:[%s10909_s8 + $0x1e0] sm:$0xf0]  ;;  %v5857_v7 = vor.u32 %v7073_v51, %v5856_v50  ;;  %v6698_v35 = vld [vmem:[%s10909_s8 + $0x6b4] sm:$0xf0]  ;;  %v7098_v40 = vld [vmem:[%s10909_s8 + $0xec] sm:$0xf] }
 0x2bc   :  { %4188 = vmatpush.bf16.msra.mxu2 %v6501_v54  ;;  %4202 = vmatpush.bf16.msra.mxu3 %v6725_v55  ;;  %v7119_v54 = vld [vmem:[%s10909_s8 + $0x194] sm:$0xf]  ;;  %v6054_v55 = vld [vmem:[%s10909_s8 + $0x1ac] sm:$0xf0]  ;;  %v6081_v8 = vor.u32 %v7129_v53, %v6080_v52  ;;  %v5970_v43 = vld [vmem:[%s10909_s8 + $0x104] sm:$0xf0] }
 0x2bd   :  { %4162 = vmatpush.bf16.msra.mxu0 %v5997_v56  ;;  %4176 = vmatpush.bf16.msra.mxu1 %v6221_v63  ;;  %v6361_v56 = vor.u32 %v7199_v46, %v6360_v15  ;;  %v6278_v63 = vld [vmem:[%s10909_s8 + $0x36c] sm:$0xf0]  ;;  %v7217_v15 = vld [vmem:[%s10909_s8 + $0x4a4] sm:$0xf]  ;;  %v6446_v46 = vld [vmem:[%s10909_s8 + $0x4bc] sm:$0xf0] }
 0x2be   :  { %v7091_v50 = vld [vmem:[%s10909_s8 + $0xb4] sm:$0xf]  ;;  %v5942_v51 = vld [vmem:[%s10909_s8 + $0xcc] sm:$0xf0] }
 0x2bf   :  { %v7147_v52 = vld [vmem:[%s10909_s8 + $0x274] sm:$0xf]  ;;  %v6166_v53 = vld [vmem:[%s10909_s8 + $0x28c] sm:$0xf0]  ;;  %v5945_v3 = vor.u32 %v7091_v50, %v5942_v51  ;;  %v7182_v50 = vld [vmem:[%s10909_s8 + $0x38c] sm:$0xf] }
 0x2c0   :  { %4189 = vmatpush.bf16.msra.mxu2 %v6473_v62  ;;  %4203 = vmatpush.bf16.msra.mxu3 %v6697_v9  ;;  %v6057_v62 = vor.u32 %v7119_v54, %v6054_v55  ;;  %v6281_v9 = vor.u32 %v7175_v59, %v6278_v63  ;;  %v6449_v54 = vor.u32 %v7217_v15, %v6446_v46  ;;  %v7266_v59 = vld [vmem:[%s10909_s8 + $0x62c] sm:$0xf]  ;;  %v6642_v63 = vld [vmem:[%s10909_s8 + $0x644] sm:$0xf0]  ;;  %v6032_v15 = vld [vmem:[%s10909_s8 + $0x160] sm:$0xf] }
 0x2c1   :  { %4163 = vmatpush.bf16.msra.mxu0 %v5969_v12  ;;  %4177 = vmatpush.bf16.msra.mxu1 %v6193_v13  ;;  %v6026_v12 = vld [vmem:[%s10909_s8 + $0x174] sm:$0xf0]  ;;  %v7168_v13 = vld [vmem:[%s10909_s8 + $0x31c] sm:$0xf]  ;;  %v6673_v55 = vor.u32 %v7273_v57, %v6670_v47  ;;  %v6169_v4 = vor.u32 %v7147_v52, %v6166_v53  ;;  %v6256_v57 = vld [vmem:[%s10909_s8 + $0x320] sm:$0xf] }
 0x2c2   :  { %v6029_v20 = vor.u32 %v7112_v10, %v6026_v12  ;;  %v6253_v21 = vor.u32 %v7168_v13, %v6250_v42  ;;  %v7203_v10 = vld [vmem:[%s10909_s8 + $0x434] sm:$0xf]  ;;  %v6390_v12 = vld [vmem:[%s10909_s8 + $0x44c] sm:$0xf0]  ;;  %v7116_v46 = vld [vmem:[%s10909_s8 + $0x178] sm:$0xf0] }
 0x2c3   :  { %v7259_v13 = vld [vmem:[%s10909_s8 + $0x5f4] sm:$0xf]  ;;  %v6306_v51 = vld [vmem:[%s10909_s8 + $0x3a4] sm:$0xf0]  ;;  %v7238_v52 = vld [vmem:[%s10909_s8 + $0x54c] sm:$0xf] }
 0x2c4   :  { %4190 = vmatpush.bf16.msra.mxu2 %v6445_v17  ;;  %4204 = vmatpush.bf16.msra.mxu3 %v6669_v30  ;;  %v7231_v17 = vld [vmem:[%s10909_s8 + $0x514] sm:$0xf]  ;;  %v6502_v30 = vld [vmem:[%s10909_s8 + $0x52c] sm:$0xf0]  ;;  %v6530_v53 = vld [vmem:[%s10909_s8 + $0x564] sm:$0xf0] }
 0x2c5   :  { %4112 = vmatmul.bf16.vlgmr.msrb.gmra.mxu0 %v9884_v32  ;;  %4126 = vmatmul.bf16.vlgmr.msrb.gmra.mxu1 %v9886_v33 }
 0x2c6   :  { %4164 = vmatpush.bf16.msra.mxu0 %v5941_v24  ;;  %4178 = vmatpush.bf16.msra.mxu1 %v6165_v25  ;;  %v7105_v24 = vld [vmem:[%s10909_s8 + $0x124] sm:$0xf]  ;;  %v6305_v25 = vor.u32 %v7185_v2, %v6304_v23  ;;  %v5886_v2 = vld [vmem:[%s10909_s8 + $0x5c] sm:$0xf0] }
 0x2c7   :  { %v7077_v23 = vld [vmem:[%s10909_s8 + $0x44] sm:$0xf] }
 0x2c8   :  { %4191 = vmatpush.bf16.msra.mxu2 %v6417_v29  ;;  %4205 = vmatpush.bf16.msra.mxu3 %v6641_v31  ;;  %v6505_v29 = vor.u32 %v7231_v17, %v6502_v30  ;;  %v6729_v31 = vor.u32 %v7287_v18, %v6726_v19  ;;  %v6393_v17 = vor.u32 %v7203_v10, %v6390_v12  ;;  %v7196_v18 = vld [vmem:[%s10909_s8 + $0x3fc] sm:$0xf]  ;;  %v6362_v19 = vld [vmem:[%s10909_s8 + $0x414] sm:$0xf0]  ;;  %v6480_v10 = vld [vmem:[%s10909_s8 + $0x4e0] sm:$0xf] }
 0x2c9   :  { %v7228_v12 = vld [vmem:[%s10909_s8 + $0x4f8] sm:$0xf0] }
 0x2ca   :  { %4165 = vmatpush.bf16.msra.mxu0 %v5913_v36  ;;  %4179 = vmatpush.bf16.msra.mxu1 %v6137_v39  ;;  %v6001_v36 = vor.u32 %v7105_v24, %v5998_v26  ;;  %v6225_v39 = vor.u32 %v7161_v27, %v6222_v28  ;;  %v5889_v24 = vor.u32 %v7077_v23, %v5886_v2  ;;  %v5858_v26 = vld [vmem:[%s10909_s8 + $0x24] sm:$0xf0]  ;;  %v7126_v27 = vld [vmem:[%s10909_s8 + $0x1cc] sm:$0xf]  ;;  %v5976_v23 = vld [vmem:[%s10909_s8 + $0xf0] sm:$0xf] }
 0x2cb   :  { %4140 = vmatmul.bf16.vlgmr.msrb.gmra.mxu2 %v9926_v60  ;;  %4154 = vmatmul.bf16.vlgmr.msrb.gmra.mxu3 %v9928_v61  ;;  %v6082_v28 = vld [vmem:[%s10909_s8 + $0x1e4] sm:$0xf0]  ;;  %v7102_v2 = vld [vmem:[%s10909_s8 + $0x108] sm:$0xf0] }
 0x2cc   :  { %4192 = vmatpush.bf16.msra.mxu2 %v6389_v45  ;;  %4206 = vmatpush.bf16.msra.mxu3 %v6613_v0  ;;  %v6477_v45 = vor.u32 %v7224_v1, %v6474_v38  ;;  %v6701_v0 = vor.u32 %v7280_v34, %v6698_v35  ;;  %v6365_v1 = vor.u32 %v7196_v18, %v6362_v19  ;;  %v6284_v34 = vld [vmem:[%s10909_s8 + $0x358] sm:$0xf]  ;;  %v7179_v35 = vld [vmem:[%s10909_s8 + $0x370] sm:$0xf0]  ;;  %v6452_v18 = vld [vmem:[%s10909_s8 + $0x4a8] sm:$0xf] }
 0x2cd   :  { %v7221_v19 = vld [vmem:[%s10909_s8 + $0x4c0] sm:$0xf0] }
 0x2ce   :  { %4166 = vmatpush.bf16.msra.mxu0 %v5885_v48  ;;  %4180 = vmatpush.bf16.msra.mxu1 %v6109_v49  ;;  %v5973_v48 = vor.u32 %v7098_v40, %v5970_v43  ;;  %v6197_v49 = vor.u32 %v7154_v44, %v6194_v11  ;;  %v7245_v40 = vld [vmem:[%s10909_s8 + $0x584] sm:$0xf]  ;;  %v6558_v43 = vld [vmem:[%s10909_s8 + $0x59c] sm:$0xf0]  ;;  %v6085_v11 = vor.u32 %v7126_v27, %v6082_v28 }
 0x2cf   :  { %v6453_v27 = vor.u32 %v7221_v19, %v6452_v18  ;;  %v7113_v18 = vld [vmem:[%s10909_s8 + $0x164] sm:$0xf]  ;;  %v6034_v19 = vld [vmem:[%s10909_s8 + $0x17c] sm:$0xf0] }
 0x2d0   :  { %4193 = vmatpush.bf16.msra.mxu2 %v6361_v56  ;;  %4207 = vmatpush.bf16.msra.mxu3 %v6585_v58  ;;  %v7210_v56 = vld [vmem:[%s10909_s8 + $0x46c] sm:$0xf]  ;;  %v6418_v58 = vld [vmem:[%s10909_s8 + $0x484] sm:$0xf0] }
 0x2d2   :  { %4167 = vmatpush.bf16.msra.mxu0 %v5857_v7  ;;  %4181 = vmatpush.bf16.msra.mxu1 %v6081_v8  ;;  %v7140_v7 = vld [vmem:[%s10909_s8 + $0x23c] sm:$0xf]  ;;  %v6138_v8 = vld [vmem:[%s10909_s8 + $0x254] sm:$0xf0] }
 0x2d3   :  { %v6141_v42 = vor.u32 %v7140_v7, %v6138_v8 }
 0x2d4   :  { %4194 = vmatpush.bf16.msra.mxu2 %v6333_v14  ;;  %4208 = vmatpush.bf16.msra.mxu3 %v6557_v37  ;;  %v6614_v14 = vld [vmem:[%s10909_s8 + $0x60c] sm:$0xf0]  ;;  %v5917_v37 = vor.u32 %v7084_v5, %v5914_v6  ;;  %v6004_v5 = vld [vmem:[%s10909_s8 + $0x128] sm:$0xf]  ;;  %v7109_v6 = vld [vmem:[%s10909_s8 + $0x140] sm:$0xf0] }
 0x2d5   :  { %4168 = vmatmul.bf16.vlgmr.msra.gmra.mxu0 %v9884_v32  ;;  %4182 = vmatmul.bf16.vlgmr.msra.gmra.mxu1 %v9886_v33  ;;  %v6617_v30 = vor.u32 %v7259_v13, %v6614_v14  ;;  %v6704_v13 = vld [vmem:[%s10909_s8 + $0x6a0] sm:$0xf]  ;;  %v7284_v14 = vld [vmem:[%s10909_s8 + $0x6b8] sm:$0xf0] }
 0x2d6   :  { %4216 = vmatpush.bf16.msrb.mxu0 %v6057_v62  ;;  %4230 = vmatpush.bf16.msrb.mxu1 %v6281_v9  ;;  %v6421_v62 = vor.u32 %v7210_v56, %v6418_v58  ;;  %v6645_v9 = vor.u32 %v7266_v59, %v6642_v63  ;;  %v6732_v56 = vld [vmem:[%s10909_s8 + $0x6d8] sm:$0xf]  ;;  %v7291_v58 = vld [vmem:[%s10909_s8 + $0x6f0] sm:$0xf0]  ;;  %v6033_v59 = vor.u32 %v7116_v46, %v6032_v15 }
 0x2d7   :  { %v6733_v8 = vor.u32 %v7291_v58, %v6732_v56  ;;  %v6396_v15 = vld [vmem:[%s10909_s8 + $0x438] sm:$0xf]  ;;  %v7207_v46 = vld [vmem:[%s10909_s8 + $0x450] sm:$0xf0]  ;;  %v6368_v56 = vld [vmem:[%s10909_s8 + $0x400] sm:$0xf] }
 0x2d8   :  { %4195 = vmatpush.bf16.msra.mxu2 %v6305_v25  ;;  %4209 = vmatpush.bf16.msra.mxu3 %v6529_v22  ;;  %v6113_v25 = vor.u32 %v7133_v41, %v6110_v16  ;;  %v7070_v22 = vld [vmem:[%s10909_s8 + $0xc] sm:$0xf]  ;;  %v6481_v41 = vor.u32 %v7228_v12, %v6480_v10  ;;  %v6705_v16 = vor.u32 %v7284_v14, %v6704_v13  ;;  %v7200_v58 = vld [vmem:[%s10909_s8 + $0x418] sm:$0xf0]  ;;  %v6062_v12 = vld [vmem:[%s10909_s8 + $0x1b4] sm:$0xf0] }
 0x2d9   :  { %v5861_v44 = vor.u32 %v7070_v22, %v5858_v26  ;;  %v5948_v22 = vld [vmem:[%s10909_s8 + $0xb8] sm:$0xf]  ;;  %v7095_v26 = vld [vmem:[%s10909_s8 + $0xd0] sm:$0xf0]  ;;  %v7120_v10 = vld [vmem:[%s10909_s8 + $0x19c] sm:$0xf] }
 0x2da   :  { %4217 = vmatpush.bf16.msrb.mxu0 %v6029_v20  ;;  %4231 = vmatpush.bf16.msrb.mxu1 %v6253_v21  ;;  %v7252_v20 = vld [vmem:[%s10909_s8 + $0x5bc] sm:$0xf]  ;;  %v6586_v21 = vld [vmem:[%s10909_s8 + $0x5d4] sm:$0xf0] }
 0x2db   :  { %4196 = vmatmul.bf16.vlgmr.msra.gmra.mxu2 %v9926_v60  ;;  %4210 = vmatmul.bf16.vlgmr.msra.gmra.mxu3 %v9928_v61  ;;  %v6589_v38 = vor.u32 %v7252_v20, %v6586_v21  ;;  %v6676_v20 = vld [vmem:[%s10909_s8 + $0x668] sm:$0xf]  ;;  %v7277_v21 = vld [vmem:[%s10909_s8 + $0x680] sm:$0xf0]  ;;  %v7176_v13 = vld [vmem:[%s10909_s8 + $0x35c] sm:$0xf] }
 0x2dc   :  { %4244 = vmatpush.bf16.msrb.mxu2 %v6505_v29  ;;  %4258 = vmatpush.bf16.msrb.mxu3 %v6729_v31  ;;  %v6060_v29 = vld [vmem:[%s10909_s8 + $0x198] sm:$0xf]  ;;  %v7123_v31 = vld [vmem:[%s10909_s8 + $0x1b0] sm:$0xf0]  ;;  %v6677_v28 = vor.u32 %v7277_v21, %v6676_v20  ;;  %v7169_v20 = vld [vmem:[%s10909_s8 + $0x324] sm:$0xf] }
 0x2dd   :  { %v6286_v14 = vld [vmem:[%s10909_s8 + $0x374] sm:$0xf0] }
 0x2de   :  { %4218 = vmatpush.bf16.msrb.mxu0 %v6001_v36  ;;  %4232 = vmatpush.bf16.msrb.mxu1 %v6225_v39  ;;  %v7189_v36 = vld [vmem:[%s10909_s8 + $0x3c4] sm:$0xf]  ;;  %v6334_v39 = vld [vmem:[%s10909_s8 + $0x3dc] sm:$0xf0] }
 0x2df   :  { %v6337_v47 = vor.u32 %v7189_v36, %v6334_v39  ;;  %v5949_v36 = vor.u32 %v7095_v26, %v5948_v22  ;;  %v6312_v22 = vld [vmem:[%s10909_s8 + $0x390] sm:$0xf]  ;;  %v7186_v26 = vld [vmem:[%s10909_s8 + $0x3a8] sm:$0xf0] }
 0x2e0   :  { %4245 = vmatpush.bf16.msrb.mxu2 %v6477_v45  ;;  %4259 = vmatpush.bf16.msrb.mxu3 %v6701_v0  ;;  %v6061_v45 = vor.u32 %v7123_v31, %v6060_v29  ;;  %v6285_v0 = vor.u32 %v7179_v35, %v6284_v34  ;;  %v6172_v29 = vld [vmem:[%s10909_s8 + $0x278] sm:$0xf]  ;;  %v7151_v31 = vld [vmem:[%s10909_s8 + $0x290] sm:$0xf0]  ;;  %v6648_v34 = vld [vmem:[%s10909_s8 + $0x630] sm:$0xf] }
 0x2e1   :  { %v7270_v35 = vld [vmem:[%s10909_s8 + $0x648] sm:$0xf0]  ;;  %v6173_v39 = vor.u32 %v7151_v31, %v6172_v29  ;;  %v7232_v29 = vld [vmem:[%s10909_s8 + $0x51c] sm:$0xf]  ;;  %v6510_v31 = vld [vmem:[%s10909_s8 + $0x534] sm:$0xf0] }
 0x2e2   :  { %4219 = vmatpush.bf16.msrb.mxu0 %v5973_v48  ;;  %4233 = vmatpush.bf16.msrb.mxu1 %v6197_v49  ;;  %v6561_v48 = vor.u32 %v7245_v40, %v6558_v43  ;;  %v7172_v49 = vld [vmem:[%s10909_s8 + $0x338] sm:$0xf0]  ;;  %v5920_v40 = vld [vmem:[%s10909_s8 + $0x80] sm:$0xf] }
 0x2e3   :  { %v6257_v63 = vor.u32 %v7172_v49, %v6256_v57  ;;  %v7088_v43 = vld [vmem:[%s10909_s8 + $0x98] sm:$0xf0]  ;;  %v6620_v57 = vld [vmem:[%s10909_s8 + $0x5f8] sm:$0xf] }
 0x2e4   :  { %4246 = vmatpush.bf16.msrb.mxu2 %v6449_v54  ;;  %4260 = vmatpush.bf16.msrb.mxu3 %v6673_v55  ;;  %v6508_v54 = vld [vmem:[%s10909_s8 + $0x518] sm:$0xf]  ;;  %v7235_v55 = vld [vmem:[%s10909_s8 + $0x530] sm:$0xf0] }
 0x2e5   :  { %v6509_v7 = vor.u32 %v7235_v55, %v6508_v54  ;;  %v6116_v54 = vld [vmem:[%s10909_s8 + $0x208] sm:$0xf]  ;;  %v7137_v55 = vld [vmem:[%s10909_s8 + $0x220] sm:$0xf0] }
 0x2e6   :  { %4220 = vmatpush.bf16.msrb.mxu0 %v5945_v3  ;;  %4234 = vmatpush.bf16.msrb.mxu1 %v6169_v4  ;;  %v6309_v3 = vor.u32 %v7182_v50, %v6306_v51  ;;  %v6533_v4 = vor.u32 %v7238_v52, %v6530_v53  ;;  %v5892_v50 = vld [vmem:[%s10909_s8 + $0x48] sm:$0xf]  ;;  %v7081_v51 = vld [vmem:[%s10909_s8 + $0x60] sm:$0xf0]  ;;  %v6397_v52 = vor.u32 %v7207_v46, %v6396_v15  ;;  %v6482_v46 = vld [vmem:[%s10909_s8 + $0x4fc] sm:$0xf0] }
 0x2e7   :  { %v7225_v15 = vld [vmem:[%s10909_s8 + $0x4e4] sm:$0xf] }
 0x2e8   :  { %4247 = vmatpush.bf16.msrb.mxu2 %v6421_v62  ;;  %4261 = vmatpush.bf16.msrb.mxu3 %v6645_v9  ;;  %v6228_v62 = vld [vmem:[%s10909_s8 + $0x2e8] sm:$0xf]  ;;  %v7165_v9 = vld [vmem:[%s10909_s8 + $0x300] sm:$0xf0] }
 0x2ea   :  { %4221 = vmatpush.bf16.msrb.mxu0 %v5917_v37  ;;  %4235 = vmatpush.bf16.msrb.mxu1 %v6141_v42  ;;  %v6005_v37 = vor.u32 %v7109_v6, %v6004_v5  ;;  %v6229_v42 = vor.u32 %v7165_v9, %v6228_v62  ;;  %v5864_v5 = vld [vmem:[%s10909_s8 + $0x10] sm:$0xf]  ;;  %v7074_v6 = vld [vmem:[%s10909_s8 + $0x28] sm:$0xf0] }
 0x2eb   :  { %v7130_v9 = vld [vmem:[%s10909_s8 + $0x1e8] sm:$0xf0] }
 0x2ec   :  { %4248 = vmatpush.bf16.msrb.mxu2 %v6393_v17  ;;  %4262 = vmatpush.bf16.msrb.mxu3 %v6617_v30  ;;  %v6200_v17 = vld [vmem:[%s10909_s8 + $0x2b0] sm:$0xf]  ;;  %v7158_v30 = vld [vmem:[%s10909_s8 + $0x2c8] sm:$0xf0] }
 0x2ee   :  { %4222 = vmatpush.bf16.msrb.mxu0 %v5889_v24  ;;  %4236 = vmatpush.bf16.msrb.mxu1 %v6113_v25  ;;  %v5977_v24 = vor.u32 %v7102_v2, %v5976_v23  ;;  %v6201_v25 = vor.u32 %v7158_v30, %v6200_v17  ;;  %v6564_v23 = vld [vmem:[%s10909_s8 + $0x588] sm:$0xf]  ;;  %v7249_v2 = vld [vmem:[%s10909_s8 + $0x5a0] sm:$0xf0]  ;;  %v6065_v17 = vor.u32 %v7120_v10, %v6062_v12  ;;  %v7211_v10 = vld [vmem:[%s10909_s8 + $0x474] sm:$0xf] }
 0x2ef   :  { %v6289_v30 = vor.u32 %v7176_v13, %v6286_v14  ;;  %v6426_v12 = vld [vmem:[%s10909_s8 + $0x48c] sm:$0xf0]  ;;  %v7267_v13 = vld [vmem:[%s10909_s8 + $0x634] sm:$0xf] }
 0x2f0   :  { %4249 = vmatpush.bf16.msrb.mxu2 %v6365_v1  ;;  %4263 = vmatpush.bf16.msrb.mxu3 %v6589_v38  ;;  %v6424_v1 = vld [vmem:[%s10909_s8 + $0x470] sm:$0xf]  ;;  %v7214_v38 = vld [vmem:[%s10909_s8 + $0x488] sm:$0xf0] }
 0x2f1   :  { %v6650_v14 = vld [vmem:[%s10909_s8 + $0x64c] sm:$0xf0] }
 0x2f2   :  { %4223 = vmatpush.bf16.msrb.mxu0 %v5861_v44  ;;  %4237 = vmatpush.bf16.msrb.mxu1 %v6085_v11  ;;  %v6425_v44 = vor.u32 %v7214_v38, %v6424_v1  ;;  %v6649_v11 = vor.u32 %v7270_v35, %v6648_v34  ;;  %v7288_v1 = vld [vmem:[%s10909_s8 + $0x6dc] sm:$0xf]  ;;  %v6734_v38 = vld [vmem:[%s10909_s8 + $0x6f4] sm:$0xf0]  ;;  %v6037_v34 = vor.u32 %v7113_v18, %v6034_v19 }
 0x2f3   :  { %v7204_v18 = vld [vmem:[%s10909_s8 + $0x43c] sm:$0xf]  ;;  %v6398_v19 = vld [vmem:[%s10909_s8 + $0x454] sm:$0xf0] }
 0x2f4   :  { %4250 = vmatpush.bf16.msrb.mxu2 %v6337_v47  ;;  %4264 = vmatpush.bf16.msrb.mxu3 %v6561_v48  ;;  %v7263_v47 = vld [vmem:[%s10909_s8 + $0x610] sm:$0xf0]  ;;  %v5921_v48 = vor.u32 %v7088_v43, %v5920_v40  ;;  %v7106_v40 = vld [vmem:[%s10909_s8 + $0x12c] sm:$0xf]  ;;  %v6006_v43 = vld [vmem:[%s10909_s8 + $0x144] sm:$0xf0] }
 0x2f5   :  { %4224 = vmatmul.bf16.vlgmr.msrb.gmra.mxu0 %v9884_v32  ;;  %4238 = vmatmul.bf16.vlgmr.msrb.gmra.mxu1 %v9886_v33  ;;  %v6621_v53 = vor.u32 %v7263_v47, %v6620_v57  ;;  %v7281_v57 = vld [vmem:[%s10909_s8 + $0x6a4] sm:$0xf]  ;;  %v6706_v47 = vld [vmem:[%s10909_s8 + $0x6bc] sm:$0xf0] }
 0x2f6   :  { %4272 = vmatpush.bf16.msra.mxu0 %v6061_v45  ;;  %4286 = vmatpush.bf16.msra.mxu1 %v6285_v0  ;;  %v6144_v45 = vld [vmem:[%s10909_s8 + $0x240] sm:$0xf]  ;;  %v7144_v0 = vld [vmem:[%s10909_s8 + $0x258] sm:$0xf0] }
 0x2f7   :  { %v6145_v49 = vor.u32 %v7144_v0, %v6144_v45  ;;  %v7162_v45 = vld [vmem:[%s10909_s8 + $0x2ec] sm:$0xf]  ;;  %v6230_v0 = vld [vmem:[%s10909_s8 + $0x304] sm:$0xf0] }
 0x2f8   :  { %4251 = vmatpush.bf16.msrb.mxu2 %v6309_v3  ;;  %4265 = vmatpush.bf16.msrb.mxu3 %v6533_v4  ;;  %v5893_v3 = vor.u32 %v7081_v51, %v5892_v50  ;;  %v6117_v4 = vor.u32 %v7137_v55, %v6116_v54  ;;  %v7099_v50 = vld [vmem:[%s10909_s8 + $0xf4] sm:$0xf]  ;;  %v5978_v51 = vld [vmem:[%s10909_s8 + $0x10c] sm:$0xf0] }
 0x2f9   :  { %v7155_v54 = vld [vmem:[%s10909_s8 + $0x2b4] sm:$0xf]  ;;  %v6202_v55 = vld [vmem:[%s10909_s8 + $0x2cc] sm:$0xf0] }
 0x2fa   :  { %4273 = vmatpush.bf16.msra.mxu0 %v6033_v59  ;;  %4287 = vmatpush.bf16.msra.mxu1 %v6257_v63  ;;  %v6592_v59 = vld [vmem:[%s10909_s8 + $0x5c0] sm:$0xf]  ;;  %v7256_v63 = vld [vmem:[%s10909_s8 + $0x5d8] sm:$0xf0] }
 0x2fb   :  { %4252 = vmatmul.bf16.vlgmr.msrb.gmra.mxu2 %v9926_v60  ;;  %4266 = vmatmul.bf16.vlgmr.msrb.gmra.mxu3 %v9928_v61  ;;  %v6593_v62 = vor.u32 %v7256_v63, %v6592_v59  ;;  %v7274_v59 = vld [vmem:[%s10909_s8 + $0x66c] sm:$0xf]  ;;  %v6678_v63 = vld [vmem:[%s10909_s8 + $0x684] sm:$0xf0] }
 0x2fc   :  { %4300 = vmatpush.bf16.msra.mxu2 %v6509_v7  ;;  %4314 = vmatpush.bf16.msra.mxu3 %v6733_v8  ;;  %v6088_v7 = vld [vmem:[%s10909_s8 + $0x1d0] sm:$0xf]  ;;  %v6369_v8 = vor.u32 %v7200_v58, %v6368_v56  ;;  %v7218_v56 = vld [vmem:[%s10909_s8 + $0x4ac] sm:$0xf]  ;;  %v6454_v58 = vld [vmem:[%s10909_s8 + $0x4c4] sm:$0xf0] }
 0x2fe   :  { %4274 = vmatpush.bf16.msra.mxu0 %v6005_v37  ;;  %4288 = vmatpush.bf16.msra.mxu1 %v6229_v42  ;;  %v6340_v37 = vld [vmem:[%s10909_s8 + $0x3c8] sm:$0xf]  ;;  %v7193_v42 = vld [vmem:[%s10909_s8 + $0x3e0] sm:$0xf0] }
 0x2ff   :  { %v6341_v21 = vor.u32 %v7193_v42, %v6340_v37 }
 0x300   :  { %4301 = vmatpush.bf16.msra.mxu2 %v6481_v41  ;;  %4315 = vmatpush.bf16.msra.mxu3 %v6705_v16  ;;  %v5865_v41 = vor.u32 %v7074_v6, %v5864_v5  ;;  %v6089_v16 = vor.u32 %v7130_v9, %v6088_v7  ;;  %v7092_v5 = vld [vmem:[%s10909_s8 + $0xbc] sm:$0xf]  ;;  %v5950_v6 = vld [vmem:[%s10909_s8 + $0xd4] sm:$0xf0]  ;;  %v6457_v7 = vor.u32 %v7218_v56, %v6454_v58  ;;  %v6040_v56 = vld [vmem:[%s10909_s8 + $0x168] sm:$0xf] }
 0x301   :  { %v6174_v9 = vld [vmem:[%s10909_s8 + $0x294] sm:$0xf0]  ;;  %v5953_v37 = vor.u32 %v7092_v5, %v5950_v6  ;;  %v7117_v58 = vld [vmem:[%s10909_s8 + $0x180] sm:$0xf0]  ;;  %v7183_v5 = vld [vmem:[%s10909_s8 + $0x394] sm:$0xf] }
 0x302   :  { %4275 = vmatpush.bf16.msra.mxu0 %v5977_v24  ;;  %4289 = vmatpush.bf16.msra.mxu1 %v6201_v25  ;;  %v6565_v24 = vor.u32 %v7249_v2, %v6564_v23  ;;  %v6258_v25 = vld [vmem:[%s10909_s8 + $0x33c] sm:$0xf0]  ;;  %v7085_v23 = vld [vmem:[%s10909_s8 + $0x84] sm:$0xf]  ;;  %v6314_v6 = vld [vmem:[%s10909_s8 + $0x3ac] sm:$0xf0] }
 0x303   :  { %v6261_v35 = vor.u32 %v7169_v20, %v6258_v25  ;;  %v5922_v2 = vld [vmem:[%s10909_s8 + $0x9c] sm:$0xf0]  ;;  %v7260_v20 = vld [vmem:[%s10909_s8 + $0x5fc] sm:$0xf] }
 0x304   :  { %4302 = vmatpush.bf16.msra.mxu2 %v6453_v27  ;;  %4316 = vmatpush.bf16.msra.mxu3 %v6677_v28  ;;  %v6536_v27 = vld [vmem:[%s10909_s8 + $0x550] sm:$0xf]  ;;  %v7242_v28 = vld [vmem:[%s10909_s8 + $0x568] sm:$0xf0] }
 0x306   :  { %4276 = vmatpush.bf16.msra.mxu0 %v5949_v36  ;;  %4290 = vmatpush.bf16.msra.mxu1 %v6173_v39  ;;  %v6313_v36 = vor.u32 %v7186_v26, %v6312_v22  ;;  %v6537_v39 = vor.u32 %v7242_v28, %v6536_v27  ;;  %v7078_v22 = vld [vmem:[%s10909_s8 + $0x4c] sm:$0xf]  ;;  %v5894_v26 = vld [vmem:[%s10909_s8 + $0x64] sm:$0xf0]  ;;  %v6401_v27 = vor.u32 %v7204_v18, %v6398_v19  ;;  %v7229_v19 = vld [vmem:[%s10909_s8 + $0x500] sm:$0xf0] }
 0x307   :  { %v6488_v18 = vld [vmem:[%s10909_s8 + $0x4e8] sm:$0xf] }
 0x308   :  { %4303 = vmatpush.bf16.msra.mxu2 %v6425_v44  ;;  %4317 = vmatpush.bf16.msra.mxu3 %v6649_v11  ;;  %v6513_v44 = vor.u32 %v7232_v29, %v6510_v31  ;;  %v6737_v11 = vor.u32 %v7288_v1, %v6734_v38  ;;  %v7134_v29 = vld [vmem:[%s10909_s8 + $0x20c] sm:$0xf]  ;;  %v6118_v31 = vld [vmem:[%s10909_s8 + $0x224] sm:$0xf0]  ;;  %v7197_v1 = vld [vmem:[%s10909_s8 + $0x404] sm:$0xf] }
 0x309   :  { %v6370_v38 = vld [vmem:[%s10909_s8 + $0x41c] sm:$0xf0] }
 0x30a   :  { %4277 = vmatpush.bf16.msra.mxu0 %v5921_v48  ;;  %4291 = vmatpush.bf16.msra.mxu1 %v6145_v49  ;;  %v6009_v48 = vor.u32 %v7106_v40, %v6006_v43  ;;  %v6233_v49 = vor.u32 %v7162_v45, %v6230_v0  ;;  %v7071_v40 = vld [vmem:[%s10909_s8 + $0x14] sm:$0xf]  ;;  %v5866_v43 = vld [vmem:[%s10909_s8 + $0x2c] sm:$0xf0] }
 0x30b   :  { %v6090_v0 = vld [vmem:[%s10909_s8 + $0x1ec] sm:$0xf0] }
 0x30c   :  { %4304 = vmatpush.bf16.msra.mxu2 %v6397_v52  ;;  %4318 = vmatpush.bf16.msra.mxu3 %v6621_v53  ;;  %v6485_v52 = vor.u32 %v7225_v15, %v6482_v46  ;;  %v6709_v53 = vor.u32 %v7281_v57, %v6706_v47  ;;  %v6068_v15 = vld [vmem:[%s10909_s8 + $0x1a0] sm:$0xf]  ;;  %v7124_v46 = vld [vmem:[%s10909_s8 + $0x1b8] sm:$0xf0] }
 0x30d   :  { %v6292_v57 = vld [vmem:[%s10909_s8 + $0x360] sm:$0xf]  ;;  %v7180_v47 = vld [vmem:[%s10909_s8 + $0x378] sm:$0xf0] }
 0x30e   :  { %4278 = vmatpush.bf16.msra.mxu0 %v5893_v3  ;;  %4292 = vmatpush.bf16.msra.mxu1 %v6117_v4  ;;  %v5981_v3 = vor.u32 %v7099_v50, %v5978_v51  ;;  %v6205_v4 = vor.u32 %v7155_v54, %v6202_v55  ;;  %v7246_v50 = vld [vmem:[%s10909_s8 + $0x58c] sm:$0xf]  ;;  %v6566_v51 = vld [vmem:[%s10909_s8 + $0x5a4] sm:$0xf0]  ;;  %v6069_v54 = vor.u32 %v7124_v46, %v6068_v15 }
 0x30f   :  { %v6293_v55 = vor.u32 %v7180_v47, %v6292_v57  ;;  %v6180_v57 = vld [vmem:[%s10909_s8 + $0x280] sm:$0xf]  ;;  %v7152_v47 = vld [vmem:[%s10909_s8 + $0x298] sm:$0xf0] }
 0x310   :  { %4305 = vmatpush.bf16.msra.mxu2 %v6369_v8  ;;  %4319 = vmatpush.bf16.msra.mxu3 %v6593_v62  ;;  %v6681_v8 = vor.u32 %v7274_v59, %v6678_v63  ;;  %v7148_v62 = vld [vmem:[%s10909_s8 + $0x27c] sm:$0xf]  ;;  %v6264_v59 = vld [vmem:[%s10909_s8 + $0x328] sm:$0xf] }
 0x311   :  { %v6177_v42 = vor.u32 %v7148_v62, %v6174_v9  ;;  %v6516_v62 = vld [vmem:[%s10909_s8 + $0x520] sm:$0xf]  ;;  %v7236_v9 = vld [vmem:[%s10909_s8 + $0x538] sm:$0xf0] }
 0x312   :  { %4279 = vmatpush.bf16.msra.mxu0 %v5865_v41  ;;  %4293 = vmatpush.bf16.msra.mxu1 %v6089_v16  ;;  %v6429_v41 = vor.u32 %v7211_v10, %v6426_v12  ;;  %v6653_v16 = vor.u32 %v7267_v13, %v6650_v14  ;;  %v6740_v10 = vld [vmem:[%s10909_s8 + $0x6e0] sm:$0xf]  ;;  %v7292_v12 = vld [vmem:[%s10909_s8 + $0x6f8] sm:$0xf0]  ;;  %v6041_v13 = vor.u32 %v7117_v58, %v6040_v56  ;;  %v7089_v56 = vld [vmem:[%s10909_s8 + $0xa0] sm:$0xf0] }
 0x314   :  { %4306 = vmatpush.bf16.msra.mxu2 %v6341_v21  ;;  %4320 = vmatpush.bf16.msra.mxu3 %v6565_v24  ;;  %v6622_v21 = vld [vmem:[%s10909_s8 + $0x614] sm:$0xf0]  ;;  %v5925_v24 = vor.u32 %v7085_v23, %v5922_v2  ;;  %v6012_v23 = vld [vmem:[%s10909_s8 + $0x130] sm:$0xf]  ;;  %v7110_v2 = vld [vmem:[%s10909_s8 + $0x148] sm:$0xf0] }
 0x315   :  { %4280 = vmatmul.bf16.vlgmr.msra.gmra.mxu0 %v9884_v32  ;;  %4294 = vmatmul.bf16.vlgmr.msra.gmra.mxu1 %v9886_v33  ;;  %v6625_v28 = vor.u32 %v7260_v20, %v6622_v21  ;;  %v6712_v20 = vld [vmem:[%s10909_s8 + $0x6a8] sm:$0xf]  ;;  %v7285_v21 = vld [vmem:[%s10909_s8 + $0x6c0] sm:$0xf0] }
 0x316   :  { %4328 = vmatpush.bf16.msrb.mxu0 %v6065_v17  ;;  %4342 = vmatpush.bf16.msrb.mxu1 %v6289_v30  ;;  %v7141_v17 = vld [vmem:[%s10909_s8 + $0x244] sm:$0xf]  ;;  %v6146_v30 = vld [vmem:[%s10909_s8 + $0x25c] sm:$0xf0] }
 0x317   :  { %v6149_v25 = vor.u32 %v7141_v17, %v6146_v30  ;;  %v6236_v17 = vld [vmem:[%s10909_s8 + $0x2f0] sm:$0xf]  ;;  %v7166_v30 = vld [vmem:[%s10909_s8 + $0x308] sm:$0xf0] }
 0x318   :  { %4307 = vmatpush.bf16.msra.mxu2 %v6313_v36  ;;  %4321 = vmatpush.bf16.msra.mxu3 %v6537_v39  ;;  %v5897_v36 = vor.u32 %v7078_v22, %v5894_v26  ;;  %v6121_v39 = vor.u32 %v7134_v29, %v6118_v31  ;;  %v10727_v22 = vld [vmem:[%s10912_s9] sm:$0xff]  ;;  %v6489_v29 = vor.u32 %v7229_v19, %v6488_v18 }
 0x319   :  { %v6713_v31 = vor.u32 %v7285_v21, %v6712_v20  ;;  %v7257_v18 = vld [vmem:[%s10909_s8 + $0x5e0] sm:$0xf0] }
 0x31a   :  { %4329 = vmatpush.bf16.msrb.mxu0 %v6037_v34  ;;  %4343 = vmatpush.bf16.msrb.mxu1 %v6261_v35  ;;  %v7253_v34 = vld [vmem:[%s10909_s8 + $0x5c4] sm:$0xf]  ;;  %v6594_v35 = vld [vmem:[%s10909_s8 + $0x5dc] sm:$0xf0] }
 0x31b   :  { %4308 = vmatmul.bf16.vlgmr.msra.gmra.mxu2 %v9926_v60  ;;  %4322 = vmatmul.bf16.vlgmr.msra.gmra.mxu3 %v9928_v61  ;;  %v6597_v45 = vor.u32 %v7253_v34, %v6594_v35  ;;  %v6460_v34 = vld [vmem:[%s10909_s8 + $0x4b0] sm:$0xf]  ;;  %v7222_v35 = vld [vmem:[%s10909_s8 + $0x4c8] sm:$0xf0] }
 0x31c   :  { %4356 = vmatpush.bf16.msrb.mxu2 %v6513_v44  ;;  %4370 = vmatpush.bf16.msrb.mxu3 %v6737_v11  ;;  %v7127_v44 = vld [vmem:[%s10909_s8 + $0x1d4] sm:$0xf]  ;;  %v6373_v11 = vor.u32 %v7197_v1, %v6370_v38  ;;  %v6208_v1 = vld [vmem:[%s10909_s8 + $0x2b8] sm:$0xf]  ;;  %v6461_v15 = vor.u32 %v7222_v35, %v6460_v34  ;;  %v7194_v34 = vld [vmem:[%s10909_s8 + $0x3e8] sm:$0xf0] }
 0x31d   :  { %v7159_v38 = vld [vmem:[%s10909_s8 + $0x2d0] sm:$0xf0]  ;;  %v6572_v35 = vld [vmem:[%s10909_s8 + $0x590] sm:$0xf] }
 0x31e   :  { %4330 = vmatpush.bf16.msrb.mxu0 %v6009_v48  ;;  %4344 = vmatpush.bf16.msrb.mxu1 %v6233_v49  ;;  %v7190_v48 = vld [vmem:[%s10909_s8 + $0x3cc] sm:$0xf]  ;;  %v6342_v49 = vld [vmem:[%s10909_s8 + $0x3e4] sm:$0xf0] }
 0x31f   :  { %v6345_v63 = vor.u32 %v7190_v48, %v6342_v49  ;;  %v6432_v48 = vld [vmem:[%s10909_s8 + $0x478] sm:$0xf]  ;;  %v7215_v49 = vld [vmem:[%s10909_s8 + $0x490] sm:$0xf0] }
 0x320   :  { %4357 = vmatpush.bf16.msrb.mxu2 %v6485_v52  ;;  %4371 = vmatpush.bf16.msrb.mxu3 %v6709_v53  ;;  %v5869_v52 = vor.u32 %v7071_v40, %v5866_v43  ;;  %v6093_v53 = vor.u32 %v7127_v44, %v6090_v0  ;;  %v2882_v40 = vperm.slane %v10727_v22, 0  ;;  %v6209_v44 = vor.u32 %v7159_v38, %v6208_v1  ;;  %v6348_v1 = vld [vmem:[%s10909_s8 + $0x3d0] sm:$0xf] }
 0x321   :  { %v6433_v58 = vor.u32 %v7215_v49, %v6432_v48  ;;  %v6544_v48 = vld [vmem:[%s10909_s8 + $0x558] sm:$0xf]  ;;  %v7243_v49 = vld [vmem:[%s10909_s8 + $0x570] sm:$0xf0] }
 0x322   :  { %4331 = vmatpush.bf16.msrb.mxu0 %v5981_v3  ;;  %4345 = vmatpush.bf16.msrb.mxu1 %v6205_v4  ;;  %v6569_v3 = vor.u32 %v7246_v50, %v6566_v51  ;;  %v7173_v4 = vld [vmem:[%s10909_s8 + $0x340] sm:$0xf0]  ;;  %v6656_v50 = vld [vmem:[%s10909_s8 + $0x638] sm:$0xf]  ;;  %v7271_v51 = vld [vmem:[%s10909_s8 + $0x650] sm:$0xf0] }
 0x323   :  { %v6265_v14 = vor.u32 %v7173_v4, %v6264_v59  ;;  %v6657_v59 = vor.u32 %v7271_v51, %v6656_v50  ;;  %v6404_v4 = vld [vmem:[%s10909_s8 + $0x440] sm:$0xf] }
 0x324   :  { %4358 = vmatpush.bf16.msrb.mxu2 %v6457_v7  ;;  %4372 = vmatpush.bf16.msrb.mxu3 %v6681_v8  ;;  %v7239_v7 = vld [vmem:[%s10909_s8 + $0x554] sm:$0xf]  ;;  %v6538_v8 = vld [vmem:[%s10909_s8 + $0x56c] sm:$0xf0] }
 0x326   :  { %4332 = vmatpush.bf16.msrb.mxu0 %v5953_v37  ;;  %4346 = vmatpush.bf16.msrb.mxu1 %v6177_v42  ;;  %v6317_v37 = vor.u32 %v7183_v5, %v6314_v6  ;;  %v6541_v42 = vor.u32 %v7239_v7, %v6538_v8  ;;  %v7208_v6 = vld [vmem:[%s10909_s8 + $0x458] sm:$0xf0]  ;;  %v6628_v7 = vld [vmem:[%s10909_s8 + $0x600] sm:$0xf] }
 0x327   :  { %v7264_v8 = vld [vmem:[%s10909_s8 + $0x618] sm:$0xf0] }
 0x328   :  { %4359 = vmatpush.bf16.msrb.mxu2 %v6429_v41  ;;  %4373 = vmatpush.bf16.msrb.mxu3 %v6653_v16  ;;  %v6517_v41 = vor.u32 %v7236_v9, %v6516_v62  ;;  %v6741_v16 = vor.u32 %v7292_v12, %v6740_v10  ;;  %v5900_v10 = vld [vmem:[%s10909_s8 + $0x50] sm:$0xf]  ;;  %v7082_v12 = vld [vmem:[%s10909_s8 + $0x68] sm:$0xf0] }
 0x329   :  { %v5901_v21 = vor.u32 %v7082_v12, %v5900_v10 }
 0x32a   :  { %4333 = vmatpush.bf16.msrb.mxu0 %v5925_v24  ;;  %4347 = vmatpush.bf16.msrb.mxu1 %v6149_v25  ;;  %v6013_v24 = vor.u32 %v7110_v2, %v6012_v23  ;;  %v6237_v25 = vor.u32 %v7166_v30, %v6236_v17  ;;  %v6124_v23 = vld [vmem:[%s10909_s8 + $0x210] sm:$0xf]  ;;  %v7138_v2 = vld [vmem:[%s10909_s8 + $0x228] sm:$0xf0]  ;;  %v7201_v17 = vld [vmem:[%s10909_s8 + $0x420] sm:$0xf0] }
 0x32b   :  { %v6600_v30 = vld [vmem:[%s10909_s8 + $0x5c8] sm:$0xf] }
 0x32c   :  { %4360 = vmatpush.bf16.msrb.mxu2 %v6401_v27  ;;  %4374 = vmatpush.bf16.msrb.mxu3 %v6625_v28  ;;  %v5984_v27 = vld [vmem:[%s10909_s8 + $0xf8] sm:$0xf]  ;;  %v7103_v28 = vld [vmem:[%s10909_s8 + $0x110] sm:$0xf0] }
 0x32d   :  { %v5985_v43 = vor.u32 %v7103_v28, %v5984_v27  ;;  %v6601_v28 = vor.u32 %v7257_v18, %v6600_v30 }
 0x32e   :  { %4334 = vmatpush.bf16.msrb.mxu0 %v5897_v36  ;;  %4348 = vmatpush.bf16.msrb.mxu1 %v6121_v39  ;;  %v6684_v36 = vld [vmem:[%s10909_s8 + $0x670] sm:$0xf]  ;;  %v7278_v39 = vld [vmem:[%s10909_s8 + $0x688] sm:$0xf0] }
 0x32f   :  { %v6685_v46 = vor.u32 %v7278_v39, %v6684_v36  ;;  %v7250_v36 = vld [vmem:[%s10909_s8 + $0x5a8] sm:$0xf0] }
 0x330   :  { %4361 = vmatpush.bf16.msrb.mxu2 %v6373_v11  ;;  %4375 = vmatpush.bf16.msrb.mxu3 %v6597_v45  ;;  %v5956_v11 = vld [vmem:[%s10909_s8 + $0xc0] sm:$0xf]  ;;  %v7096_v45 = vld [vmem:[%s10909_s8 + $0xd8] sm:$0xf0] }
 0x331   :  { %v4057_v26 = vpop.f32.mrf.mxu0  ;;  %v4071_v0 = vpop.f32.mrf.mxu1 }
 0x332   :  { %4335 = vmatpush.bf16.msrb.mxu0 %v5869_v52  ;;  %4349 = vmatpush.bf16.msrb.mxu1 %v6093_v53  ;;  %v5957_v52 = vor.u32 %v7096_v45, %v5956_v11  ;;  %v6181_v53 = vor.u32 %v7152_v47, %v6180_v57  ;;  %v4058_v5 = vadd.f32 %v4057_v26, %v2882_v40  ;;  %v7075_v26 = vld [vmem:[%s10909_s8 + $0x30] sm:$0xf0]  ;;  %v6320_v47 = vld [vmem:[%s10909_s8 + $0x398] sm:$0xf] }
 0x333   :  { %v6573_v57 = vor.u32 %v7250_v36, %v6572_v35 }
 0x334   :  { %4362 = vmatpush.bf16.msrb.mxu2 %v6345_v63  ;;  %4376 = vmatpush.bf16.msrb.mxu3 %v6569_v3  ;;  %v6152_v63 = vld [vmem:[%s10909_s8 + $0x248] sm:$0xf]  ;;  %v7145_v3 = vld [vmem:[%s10909_s8 + $0x260] sm:$0xf0] }
 0x335   :  { %4336 = vmatmul.bf16.vlgmr.msrb.gmra.mxu0 %v9884_v32  ;;  %4350 = vmatmul.bf16.vlgmr.msrb.gmra.mxu1 %v9886_v33  ;;  %v6153_v9 = vor.u32 %v7145_v3, %v6152_v63 }
 0x336   :  { %4384 = vmatpush.bf16.msra.mxu0 %v6069_v54  ;;  %4398 = vmatpush.bf16.msra.mxu1 %v6293_v55  ;;  %v5928_v55 = vld [vmem:[%s10909_s8 + $0x88] sm:$0xf] }
 0x337   :  { %v5929_v62 = vor.u32 %v7089_v56, %v5928_v55  ;;  %v6545_v56 = vor.u32 %v7243_v49, %v6544_v48 }
 0x338   :  { %4363 = vmatpush.bf16.msrb.mxu2 %v6317_v37  ;;  %4377 = vmatpush.bf16.msrb.mxu3 %v6541_v42  ;;  %v6405_v37 = vor.u32 %v7208_v6, %v6404_v4  ;;  %v6629_v42 = vor.u32 %v7264_v8, %v6628_v7 }
 0x339   :  { %v4059_v54 = vpop.f32.mrf.mxu0  ;;  %v4073_v19 = vpop.f32.mrf.mxu1 }
 0x33a   :  { %4385 = vmatpush.bf16.msra.mxu0 %v6041_v13  ;;  %4399 = vmatpush.bf16.msra.mxu1 %v6265_v14  ;;  %v4060_v39 = vadd.f32 %v4059_v54, %v2882_v40  ;;  %v7187_v40 = vld [vmem:[%s10909_s8 + $0x3b0] sm:$0xf0] }
 0x33b   :  { %4364 = vmatmul.bf16.vlgmr.msrb.gmra.mxu2 %v9926_v60  ;;  %4378 = vmatmul.bf16.vlgmr.msrb.gmra.mxu3 %v9928_v61  ;;  %v6321_v55 = vor.u32 %v7187_v40, %v6320_v47 }
 0x33c   :  { %4412 = vmatpush.bf16.msra.mxu2 %v6517_v41  ;;  %4426 = vmatpush.bf16.msra.mxu3 %v6741_v16  ;;  %v6376_v41 = vld [vmem:[%s10909_s8 + $0x408] sm:$0xf]  ;;  %v4072_v16 = vadd.f32 %v4071_v0, %v4058_v5  ;;  %v4074_v50 = vadd.f32 %v4073_v19, %v4060_v39 }
 0x33d   :  { %v6377_v27 = vor.u32 %v7201_v17, %v6376_v41 }
 0x33e   :  { %4386 = vmatpush.bf16.msra.mxu0 %v6013_v24  ;;  %4400 = vmatpush.bf16.msra.mxu1 %v6237_v25  ;;  %v4085_v13 = vpop.f32.mrf.mxu2  ;;  %v4099_v14 = vpop.f32.mrf.mxu3  ;;  %v6125_v24 = vor.u32 %v7138_v2, %v6124_v23  ;;  %v5872_v25 = vld [vmem:[%s10909_s8 + $0x18] sm:$0xf] }
 0x33f   :  { %v4086_v20 = vadd.f32 %v4085_v13, %v4072_v16  ;;  %v5873_v11 = vor.u32 %v7075_v26, %v5872_v25 }
 0x340   :  { %4413 = vmatpush.bf16.msra.mxu2 %v6489_v29  ;;  %4427 = vmatpush.bf16.msra.mxu3 %v6713_v31  ;;  %v6096_v29 = vld [vmem:[%s10909_s8 + $0x1d8] sm:$0xf]  ;;  %v7131_v31 = vld [vmem:[%s10909_s8 + $0x1f0] sm:$0xf0] }
 0x341   :  { %v6097_v45 = vor.u32 %v7131_v31, %v6096_v29 }
 0x342   :  { %4387 = vmatpush.bf16.msra.mxu0 %v5985_v43  ;;  %4401 = vmatpush.bf16.msra.mxu1 %v6209_v44  ;;  %v4113_v38 = vpop.f32.mrf.mxu0  ;;  %v4100_v43 = vadd.f32 %v4099_v14, %v4086_v20  ;;  %v2883_v44 = vperm.slane %v10727_v22, 1  ;;  %v2884_v20 = vperm.slane %v10727_v22, 2 }
 0x344   :  { %4414 = vmatpush.bf16.msra.mxu2 %v6461_v15  ;;  %4428 = vmatpush.bf16.msra.mxu3 %v6685_v46  ;;  %v6349_v46 = vor.u32 %v7194_v34, %v6348_v1  ;;  %v4440_v51 = vsub.f32 0.0, %v4100_v43 }
 0x346   :  { %4388 = vmatpush.bf16.msra.mxu0 %v5957_v52  ;;  %4402 = vmatpush.bf16.msra.mxu1 %v6181_v53  ;;  %v4087_v0 = vpop.f32.mrf.mxu2  ;;  %v4101_v15 = vpop.f32.mrf.mxu3  ;;  %v4114_v52 = vadd.f32 %v4113_v38, %v2883_v44 }
 0x347   :  { %v4127_v53 = vpop.f32.mrf.mxu1  ;;  %v4088_v54 = vadd.f32 %v4087_v0, %v4074_v50  ;;  %v2885_v0 = vperm.slane %v10727_v22, 3 }
 0x348   :  { %4415 = vmatpush.bf16.msra.mxu2 %v6433_v58  ;;  %4429 = vmatpush.bf16.msra.mxu3 %v6657_v59  ;;  %v4454_v58 = vmul.f32 1.442695, %v4440_v51  ;;  %v4128_v59 = vadd.f32 %v4127_v53, %v4114_v52 }
 0x349   :  { %v4102_v3 = vadd.f32 %v4101_v15, %v4088_v54 }
 0x34a   :  { %4389 = vmatpush.bf16.msra.mxu0 %v5929_v62  ;;  %4403 = vmatpush.bf16.msra.mxu1 %v6153_v9  ;;  %v4115_v63 = vpop.f32.mrf.mxu0  ;;  %7297 = vpow2.f32 %v4454_v58 }
 0x34b   :  { %v4116_v7 = vadd.f32 %v4115_v63, %v2883_v44  ;;  %v4447_v62 = vsub.f32 0.0, %v4102_v3 }
 0x34c   :  { %4416 = vmatpush.bf16.msra.mxu2 %v6405_v37  ;;  %4430 = vmatpush.bf16.msra.mxu3 %v6629_v42 }
 0x34d   :  { %v4468_v12 = vmul.f32 1.442695, %v4447_v62 }
 0x34e   :  { %4390 = vmatpush.bf16.msra.mxu0 %v5901_v21  ;;  %4404 = vmatpush.bf16.msra.mxu1 %v6125_v24  ;;  %v4141_v4 = vpop.f32.mrf.mxu2  ;;  %v4155_v5 = vpop.f32.mrf.mxu3 }
 0x34f   :  { %v4142_v6 = vadd.f32 %v4141_v4, %v4128_v59  ;;  %v4129_v9 = vpop.f32.mrf.mxu1 }
 0x350   :  { %4417 = vmatpush.bf16.msra.mxu2 %v6377_v27  ;;  %4431 = vmatpush.bf16.msra.mxu3 %v6601_v28  ;;  %v7298_v14 = vpop.eup %7297 }
 0x351   :  { %v4156_v8 = vadd.f32 %v4155_v5, %v4142_v6  ;;  %v4482_v2 = vadd.f32 1.0, %v7298_v14 }
 0x352   :  { %4391 = vmatpush.bf16.msra.mxu0 %v5873_v11  ;;  %4405 = vmatpush.bf16.msra.mxu1 %v6097_v45 }
 0x354   :  { %4418 = vmatpush.bf16.msra.mxu2 %v6349_v46  ;;  %4432 = vmatpush.bf16.msra.mxu3 %v6573_v57 }
 0x355   :  { %4392 = vmatmul.bf16.vlgmr.msra.gmra.mxu0 %v9884_v32  ;;  %4406 = vmatmul.bf16.vlgmr.msra.gmra.mxu1 %v9886_v33  ;;  %v4441_v32 = vsub.f32 0.0, %v4156_v8  ;;  %v4130_v33 = vadd.f32 %v4129_v9, %v4116_v7 }
 0x356   :  { %v4143_v13 = vpop.f32.mrf.mxu2  ;;  %v4157_v42 = vpop.f32.mrf.mxu3 }
 0x357   :  { %v4456_v10 = vmul.f32 1.442695, %v4441_v32  ;;  %v4144_v37 = vadd.f32 %v4143_v13, %v4130_v33  ;;  %v4183_v24 = vpop.f32.mrf.mxu1 }
 0x358   :  { %4419 = vmatpush.bf16.msra.mxu2 %v6321_v55  ;;  %4433 = vmatpush.bf16.msra.mxu3 %v6545_v56 }
 0x359   :  { %7299 = vpow2.f32 %v4456_v10  ;;  %v4158_v23 = vadd.f32 %v4157_v42, %v4144_v37 }
 0x35a   :  { %7301 = vpow2.f32 %v4468_v12 }
 0x35b   :  { %4420 = vmatmul.bf16.vlgmr.msra.gmra.mxu2 %v9926_v60  ;;  %4434 = vmatmul.bf16.vlgmr.msra.gmra.mxu3 %v9928_v61  ;;  %v4448_v41 = vsub.f32 0.0, %v4158_v23  ;;  %7303 = vrcp.f32 %v4482_v2  ;;  %v4169_v61 = vpop.f32.mrf.mxu0 }
 0x35c   :  { %v4170_v28 = vadd.f32 %v4169_v61, %v2884_v20 }
 0x35d   :  { %v4470_v17 = vmul.f32 1.442695, %v4448_v41 }
 0x35e   :  { %v4197_v31 = vpop.f32.mrf.mxu2  ;;  %v4211_v1 = vpop.f32.mrf.mxu3  ;;  %v4184_v38 = vadd.f32 %v4183_v24, %v4170_v28 }
 0x35f   :  { %v7300_v16 = vpop.eup %7299  ;;  %7305 = vpow2.f32 %v4470_v17  ;;  %v4185_v43 = vpop.f32.mrf.mxu1 }
 0x360   :  { %v4483_v60 = vadd.f32 1.0, %v7300_v16  ;;  %v7302_v30 = vpop.eup %7301  ;;  %v4198_v36 = vadd.f32 %v4197_v31, %v4184_v38 }
 0x361   :  { %v4489_v18 = vadd.f32 1.0, %v7302_v30  ;;  %v7304_v19 = vpop.eup %7303 }
 0x362   :  { %7307 = vrcp.f32 %v4483_v60  ;;  %v4212_v45 = vadd.f32 %v4211_v1, %v4198_v36 }
 0x363   :  { %7309 = vrcp.f32 %v4489_v18  ;;  %v4171_v29 = vpop.f32.mrf.mxu0 }
 0x364   :  { %v4172_v11 = vadd.f32 %v4171_v29, %v2884_v20  ;;  %v4442_v47 = vsub.f32 0.0, %v4212_v45  ;;  %v2886_v20 = vperm.slane %v10727_v22, 4 }
 0x365   :  { %v7306_v21 = vpop.eup %7305 }
 0x366   :  { %v4490_v26 = vadd.f32 1.0, %v7306_v21  ;;  %v4199_v15 = vpop.f32.mrf.mxu2  ;;  %v4213_v46 = vpop.f32.mrf.mxu3  ;;  %v4186_v57 = vadd.f32 %v4185_v43, %v4172_v11  ;;  %v4458_v50 = vmul.f32 1.442695, %v4442_v47 }
 0x368   :  { %v7308_v25 = vpop.eup %7307  ;;  %7311 = vrcp.f32 %v4490_v26  ;;  %v4200_v48 = vadd.f32 %v4199_v15, %v4186_v57 }
 0x369   :  { %v4510_v27 = vpack.c.bf16 %v7308_v25, %v7304_v19  ;;  %v7310_v34 = vpop.eup %7309  ;;  %7313 = vpow2.f32 %v4458_v50 }
 0x36a   :  { %v4214_v53 = vadd.f32 %v4213_v46, %v4200_v48 }
 0x36b   :  { %4518 = vst [vmem:[%s10913_s10] sm:$0xff] %v4510_v27 }
 0x36c   :  { %v4449_v63 = vsub.f32 0.0, %v4214_v53 }
 0x36e   :  { %v7312_v35 = vpop.eup %7311  ;;  %v4472_v7 = vmul.f32 1.442695, %v4449_v63 }
 0x36f   :  { %v4514_v39 = vpack.c.bf16 %v7312_v35, %v7310_v34  ;;  %v7314_v62 = vpop.eup %7313  ;;  %v2887_v35 = vperm.slane %v10727_v22, 5 }
 0x370   :  { %v4484_v10 = vadd.f32 1.0, %v7314_v62 }
 0x371   :  { %4522 = vst [vmem:[%s10913_s10 + $0x1c] sm:$0xff] %v4514_v39 }
 0x372   :  { %v4225_v44 = vpop.f32.mrf.mxu0  ;;  %v4239_v49 = vpop.f32.mrf.mxu1 }
 0x373   :  { %v4226_v40 = vadd.f32 %v4225_v44, %v2885_v0 }
 0x375   :  { %v4240_v51 = vadd.f32 %v4239_v49, %v4226_v40 }
 0x37a   :  { %v4227_v52 = vpop.f32.mrf.mxu0  ;;  %v4241_v4 = vpop.f32.mrf.mxu1 }
 0x37b   :  { %v4228_v58 = vadd.f32 %v4227_v52, %v2885_v0 }
 0x37d   :  { %v4242_v5 = vadd.f32 %v4241_v4, %v4228_v58 }
 0x37e   :  { %v4253_v54 = vpop.f32.mrf.mxu2  ;;  %v4267_v55 = vpop.f32.mrf.mxu3 }
 0x37f   :  { %v4254_v56 = vadd.f32 %v4253_v54, %v4240_v51 }
 0x381   :  { %v4268_v59 = vadd.f32 %v4267_v55, %v4254_v56 }
 0x383   :  { %v4443_v3 = vsub.f32 0.0, %v4268_v59 }
 0x385   :  { %v4460_v6 = vmul.f32 1.442695, %v4443_v3 }
 0x386   :  { %v4255_v8 = vpop.f32.mrf.mxu2  ;;  %v4269_v9 = vpop.f32.mrf.mxu3 }
 0x387   :  { %7315 = vpow2.f32 %v4460_v6  ;;  %v4256_v32 = vadd.f32 %v4255_v8, %v4242_v5 }
 0x388   :  { %7317 = vpow2.f32 %v4472_v7 }
 0x389   :  { %v4270_v33 = vadd.f32 %v4269_v9, %v4256_v32  ;;  %7319 = vrcp.f32 %v4484_v10  ;;  %v2888_v10 = vperm.slane %v10727_v22, 6 }
 0x38b   :  { %v4450_v12 = vsub.f32 0.0, %v4270_v33 }
 0x38d   :  { %v7316_v13 = vpop.eup %7315  ;;  %v4474_v14 = vmul.f32 1.442695, %v4450_v12 }
 0x38e   :  { %v4485_v37 = vadd.f32 1.0, %v7316_v13  ;;  %v7318_v42 = vpop.eup %7317 }
 0x38f   :  { %7321 = vpow2.f32 %v4474_v14  ;;  %v4491_v23 = vadd.f32 1.0, %v7318_v42  ;;  %v7320_v2 = vpop.eup %7319 }
 0x390   :  { %7323 = vrcp.f32 %v4485_v37 }
 0x391   :  { %7325 = vrcp.f32 %v4491_v23 }
 0x392   :  { %v4281_v30 = vpop.f32.mrf.mxu0  ;;  %v4295_v21 = vpop.f32.mrf.mxu1 }
 0x393   :  { %v4282_v24 = vadd.f32 %v4281_v30, %v2886_v20 }
 0x395   :  { %v7322_v41 = vpop.eup %7321  ;;  %v4296_v28 = vadd.f32 %v4295_v21, %v4282_v24 }
 0x396   :  { %v7324_v16 = vpop.eup %7323  ;;  %v4492_v17 = vadd.f32 1.0, %v7322_v41 }
 0x397   :  { %v4511_v60 = vpack.c.bf16 %v7324_v16, %v7320_v2  ;;  %v7326_v61 = vpop.eup %7325 }
 0x398   :  { %7327 = vrcp.f32 %v4492_v17 }
 0x399   :  { %4519 = vst [vmem:[%s10913_s10 + $0x8] sm:$0xff] %v4511_v60 }
 0x39a   :  { %v4283_v25 = vpop.f32.mrf.mxu0  ;;  %v4297_v31 = vpop.f32.mrf.mxu1 }
 0x39b   :  { %v4284_v38 = vadd.f32 %v4283_v25, %v2886_v20 }
 0x39d   :  { %v4298_v43 = vadd.f32 %v4297_v31, %v4284_v38 }
 0x39e   :  { %v7328_v18 = vpop.eup %7327  ;;  %v4309_v26 = vpop.f32.mrf.mxu2 }
 0x39f   :  { %v4515_v19 = vpack.c.bf16 %v7328_v18, %v7326_v61  ;;  %v4323_v27 = vpop.f32.mrf.mxu3  ;;  %v4310_v29 = vadd.f32 %v4309_v26, %v4296_v28 }
 0x3a1   :  { %4523 = vst [vmem:[%s10913_s10 + $0x24] sm:$0xff] %v4515_v19  ;;  %v4324_v34 = vadd.f32 %v4323_v27, %v4310_v29 }
 0x3a3   :  { %v4444_v44 = vsub.f32 0.0, %v4324_v34 }
 0x3a5   :  { %v4462_v15 = vmul.f32 1.442695, %v4444_v44 }
 0x3a6   :  { %v4311_v36 = vpop.f32.mrf.mxu2 }
 0x3a7   :  { %v4325_v39 = vpop.f32.mrf.mxu3  ;;  %v4312_v45 = vadd.f32 %v4311_v36, %v4298_v43  ;;  %7329 = vpow2.f32 %v4462_v15 }
 0x3a9   :  { %v4326_v47 = vadd.f32 %v4325_v39, %v4312_v45 }
 0x3ab   :  { %v4451_v52 = vsub.f32 0.0, %v4326_v47 }
 0x3ad   :  { %v4476_v58 = vmul.f32 1.442695, %v4451_v52  ;;  %v7330_v63 = vpop.eup %7329 }
 0x3ae   :  { %v4486_v6 = vadd.f32 1.0, %v7330_v63 }
 0x3b2   :  { %v4337_v1 = vpop.f32.mrf.mxu0  ;;  %v4351_v0 = vpop.f32.mrf.mxu1 }
 0x3b3   :  { %v4338_v11 = vadd.f32 %v4337_v1, %v2887_v35 }
 0x3b5   :  { %v4352_v46 = vadd.f32 %v4351_v0, %v4338_v11 }
 0x3ba   :  { %v4339_v57 = vpop.f32.mrf.mxu0  ;;  %v4353_v54 = vpop.f32.mrf.mxu1 }
 0x3bb   :  { %v4340_v50 = vadd.f32 %v4339_v57, %v2887_v35 }
 0x3bd   :  { %v4354_v55 = vadd.f32 %v4353_v54, %v4340_v50 }
 0x3be   :  { %v4365_v40 = vpop.f32.mrf.mxu2  ;;  %v4379_v48 = vpop.f32.mrf.mxu3 }
 0x3bf   :  { %v4366_v49 = vadd.f32 %v4365_v40, %v4352_v46 }
 0x3c1   :  { %v4380_v51 = vadd.f32 %v4379_v48, %v4366_v49 }
 0x3c3   :  { %v4445_v53 = vsub.f32 0.0, %v4380_v51 }
 0x3c5   :  { %v4464_v56 = vmul.f32 1.442695, %v4445_v53 }
 0x3c6   :  { %v4367_v59 = vpop.f32.mrf.mxu2  ;;  %v4381_v4 = vpop.f32.mrf.mxu3 }
 0x3c7   :  { %7331 = vpow2.f32 %v4464_v56  ;;  %v4368_v3 = vadd.f32 %v4367_v59, %v4354_v55 }
 0x3c8   :  { %7333 = vpow2.f32 %v4476_v58 }
 0x3c9   :  { %v4382_v5 = vadd.f32 %v4381_v4, %v4368_v3  ;;  %7335 = vrcp.f32 %v4486_v6 }
 0x3cb   :  { %v4452_v7 = vsub.f32 0.0, %v4382_v5 }
 0x3cd   :  { %v7332_v8 = vpop.eup %7331  ;;  %v4478_v62 = vmul.f32 1.442695, %v4452_v7 }
 0x3ce   :  { %v4487_v32 = vadd.f32 1.0, %v7332_v8  ;;  %v7334_v9 = vpop.eup %7333 }
 0x3cf   :  { %7337 = vpow2.f32 %v4478_v62  ;;  %v4493_v12 = vadd.f32 1.0, %v7334_v9  ;;  %v7336_v13 = vpop.eup %7335 }
 0x3d0   :  { %7339 = vrcp.f32 %v4487_v32 }
 0x3d1   :  { %7341 = vrcp.f32 %v4493_v12 }
 0x3d2   :  { %v4393_v33 = vpop.f32.mrf.mxu0  ;;  %v4407_v41 = vpop.f32.mrf.mxu1 }
 0x3d3   :  { %v4394_v23 = vadd.f32 %v4393_v33, %v2888_v10 }
 0x3d5   :  { %v7338_v14 = vpop.eup %7337  ;;  %v4408_v16 = vadd.f32 %v4407_v41, %v4394_v23 }
 0x3d6   :  { %v7340_v37 = vpop.eup %7339  ;;  %v4494_v42 = vadd.f32 1.0, %v7338_v14 }
 0x3d7   :  { %v4512_v2 = vpack.c.bf16 %v7340_v37, %v7336_v13  ;;  %v7342_v22 = vpop.eup %7341 }
 0x3d8   :  { %7343 = vrcp.f32 %v4494_v42 }
 0x3d9   :  { %4520 = vst [vmem:[%s10913_s10 + $0x10] sm:$0xff] %v4512_v2 }
 0x3da   :  { %v4395_v17 = vpop.f32.mrf.mxu0  ;;  %v4409_v25 = vpop.f32.mrf.mxu1 }
 0x3db   :  { %v4396_v19 = vadd.f32 %v4395_v17, %v2888_v10 }
 0x3dd   :  { %v4410_v26 = vadd.f32 %v4409_v25, %v4396_v19 }
 0x3de   :  { %v4421_v60 = vpop.f32.mrf.mxu2  ;;  %v4435_v61 = vpop.f32.mrf.mxu3 }
 0x3df   :  { %v4422_v30 = vadd.f32 %v4421_v60, %v4408_v16  ;;  %v7344_v18 = vpop.eup %7343 }
 0x3e0   :  { %v4516_v21 = vpack.c.bf16 %v7344_v18, %v7342_v22 }
 0x3e1   :  { %v4436_v20 = vadd.f32 %v4435_v61, %v4422_v30 }
 0x3e2   :  { %4524 = vst [vmem:[%s10913_s10 + $0x2c] sm:$0xff] %v4516_v21 }
 0x3e3   :  { %v4446_v24 = vsub.f32 0.0, %v4436_v20 }
 0x3e5   :  { %v4466_v27 = vmul.f32 1.442695, %v4446_v24 }
 0x3e6   :  { %v4423_v28 = vpop.f32.mrf.mxu2  ;;  %v4437_v31 = vpop.f32.mrf.mxu3 }
 0x3e7   :  { %7345 = vpow2.f32 %v4466_v27  ;;  %v4424_v29 = vadd.f32 %v4423_v28, %v4410_v26 }
 0x3e9   :  { %v4438_v1 = vadd.f32 %v4437_v31, %v4424_v29 }
 0x3eb   :  { %v4453_v38 = vsub.f32 0.0, %v4438_v1 }
 0x3ed   :  { %v7346_v34 = vpop.eup %7345  ;;  %v4480_v35 = vmul.f32 1.442695, %v4453_v38 }
 0x3ee   :  { %v4488_v36 = vadd.f32 1.0, %v7346_v34 }
 0x3ef   :  { %7347 = vpow2.f32 %v4480_v35 }
 0x3f0   :  { %7349 = vrcp.f32 %v4488_v36 }
 0x3f5   :  { %v7348_v39 = vpop.eup %7347 }
 0x3f6   :  { %v7350_v43 = vpop.eup %7349  ;;  %v4495_v44 = vadd.f32 1.0, %v7348_v39 }
 0x3f7   :  { %v4513_v11 = vpack.c.bf16 %v7350_v43, %v7350_v43 }
 0x3f8   :  { %7351 = vrcp.f32 %v4495_v44 }
 0x3f9   :  { %4521 = vst [vmem:[%s10913_s10 + $0x18] sm:$0xf] %v4513_v11 }
 0x3fe   :  { %v7352_v45 = vpop.eup %7351 }
 0x3ff   :  { %v4517_v0 = vpack.c.bf16 %v7352_v45, %v7352_v45 }
 0x401   :  { %4525 = vst [vmem:[%s10913_s10 + $0x34] sm:$0xf] %v4517_v0 }

</bundles_post_ra>
